<compile_context>
chip_gen: v6e
topology: v6e:2x2x1
jax: 0.10.0
libtpu: 0.0.40
codegen_flags: <defaults>
</compile_context>

<pallas_src>
import functools

import jax
import jax.numpy as jnp
import numpy as np
from jax.experimental import pallas as pl
from jax.experimental.pallas import tpu as pltpu


# ------------------------------ fused kernel ---------------------------------

def _mstcn_kernel(num_layers, num_refine, nb, t_len, len_ref, *refs):
    """Full MultiStageModel forward for one block of `nb` batch samples.

    refs layout:
      refs[0]      x_ref        (Cin, nb*T)  bf16
      refs[1:9]    stage-1 params
      refs[9:17]   stacked refinement params   (only if num_refine > 0)
      refs[-1]     o_ref        (S, K, nb*T)  f32
    """
    x_ref = refs[0]
    (s1_in_w, s1_in_b, s1_wd, s1_bd, s1_w1, s1_b1, s1_out_w, s1_out_b) = refs[1:9]
    if num_refine > 0:
        (r_in_w, r_in_b, r_wd, r_bd, r_w1, r_b1, r_out_w, r_out_b) = refs[9:17]
        o_ref = refs[17]
    else:
        o_ref = refs[9]

    g = pl.program_id(0)
    tt = nb * t_len
    col = jax.lax.broadcasted_iota(jnp.int32, (1, tt), 1)

    # Per-sample local time index + valid-frame mask, rebuilt from the
    # SMEM-prefetched lengths (no mask DMA).  Static loop over folded samples.
    t_loc = col
    mask = jnp.zeros((1, tt), jnp.float32)
    for m in range(nb):
        if m:
            t_loc = jnp.where(col >= m * t_len, col - m * t_len, t_loc)
        valid = len_ref[g * nb + m]                       # scalar from SMEM
        mask = jnp.where((col >= m * t_len) & (col < m * t_len + valid),
                         1.0, mask)

    def mxu(w, x):  # bf16 operands, f32 accumulate (native MXU path)
        return jnp.dot(w, x.astype(jnp.bfloat16),
                       preferred_element_type=jnp.float32)

    def run_stage(x_in, in_w, in_b, wd, bd, w1, b1, out_w, out_b):
        # in_w()/in_b()/out_w()/out_b(): zero-arg ref loaders
        # wd(i)/bd(i)/w1(i)/b1(i):       per-layer ref loaders
        out = mxu(in_w(), x_in) + in_b()                  # input 1x1 conv
        f = out.shape[0]
        for i in range(num_layers):
            d = 2 ** i
            # Dilated k=3 conv via shift-after-matmul (no (3F,TT) operand
            # stack):  z = [W0;W1;W2] @ out ;  y[t] = z0[t-d] + z1[t] + z2[t+d]
            z = mxu(wd(i), out)                           # (3F, TT) f32
            h = z[f:2 * f] + bd(i)
            if d < t_len:   # static guard: d >= T taps hit only zero padding
                h = h + jnp.where(t_loc >= d,
                                  pltpu.roll(z[:f], d, axis=1), 0.0)
                h = h + jnp.where(t_loc < t_len - d,
                                  pltpu.roll(z[2 * f:], tt - d, axis=1), 0.0)
            h = jnp.maximum(h, 0.0)                       # ReLU (f32)
            # TODO(synk): nn.Dropout() is identity at inference; no RNG here.
            h = mxu(w1(i), h) + b1(i)                     # 1x1 conv
            out = (out + h) * mask                        # residual + mask
        return (mxu(out_w(), out) + out_b()) * mask       # output 1x1 conv

    # ----- stage 1 -----
    y = run_stage(
        x_ref[...],
        lambda: s1_in_w[...], lambda: s1_in_b[...],
        lambda i: s1_wd[i], lambda i: s1_bd[i],
        lambda i: s1_w1[i], lambda i: s1_b1[i],
        lambda: s1_out_w[...], lambda: s1_out_b[...])
    o_ref[0] = y.astype(o_ref.dtype)

    # ----- refinement stages (activation stays resident; softmax fused) -----
    for s in range(num_refine):
        y_max = jnp.max(y, axis=0, keepdims=True)         # softmax over channels
        e = jnp.exp(y - y_max)
        inv = pl.reciprocal(jnp.sum(e, axis=0, keepdims=True), approx=True)
        xs = e * inv * mask
        base = s * num_layers
        y = run_stage(
            xs,
            lambda s=s: r_in_w[s], lambda s=s: r_in_b[s],
            lambda i, b=base: r_wd[b + i], lambda i, b=base: r_bd[b + i],
            lambda i, b=base: r_w1[b + i], lambda i, b=base: r_b1[b + i],
            lambda s=s: r_out_w[s], lambda s=s: r_out_b[s])
        o_ref[1 + s] = y.astype(o_ref.dtype)


# ------------------------------ wrapper ---------------------------------------

def _pick_batch_block(n, t, batch_block):
    if batch_block is not None:
        if n % batch_block:
            raise ValueError("batch_block must divide N")
        nb = batch_block
    else:
        # Fold samples onto the lane axis for MXU utilization, but keep >= 2
        # grid steps when possible so both TensorCores (v7x) get work.
        target = max(1, n // 2)
        nb = 1
        for cand in range(1, target + 1):
            if n % cand == 0:
                nb = cand
    if nb < n and (nb * t) % 128 != 0:
        nb = n   # keep the lane block a multiple of 128 (or the full extent)
    return nb


def multi_stage_forward(x_nct, mask_nct, packed, batch_block=None):
    """x: (N, dim, T), mask: (N, num_classes, T) -> (num_stages, N, K, T)."""
    n, cin, t = x_nct.shape
    s1 = packed["s1"]
    ref = packed["refine"]
    f = s1["in_w"].shape[0]
    k = s1["out_w"].shape[0]
    num_layers = s1["wd"].shape[0]
    num_refine = 0 if ref is None else ref["in_w"].shape[0]
    num_stages = num_refine + 1

    nb = _pick_batch_block(n, t, batch_block)
    ttb = nb * t

    # The mask is the standard MS-TCN prefix (valid-length) mask; derive the
    # per-batch lengths once and rebuild the mask in-kernel from an iota.
    lengths = jnp.sum(mask_nct[:, 0, :], axis=-1).astype(jnp.int32)       # (N,)
    # Channels-on-sublanes, (batch*time)-on-lanes layout; bf16 halves the DMA.
    x_flat = jnp.transpose(x_nct, (1, 0, 2)).reshape(cin, n * t).astype(jnp.bfloat16)

    s1_args = [s1["in_w"], s1["in_b"], s1["wd"], s1["bd"],
               s1["w1"], s1["b1"], s1["out_w"], s1["out_b"]]
    r_args = [] if num_refine == 0 else [
        ref["in_w"], ref["in_b"], ref["wd"], ref["bd"],
        ref["w1"], ref["b1"], ref["out_w"], ref["out_b"]]

    def _const_spec(a):
        nd = a.ndim
        return pl.BlockSpec(a.shape, lambda g, lens, _nd=nd: (0,) * _nd)

    in_specs = ([pl.BlockSpec((cin, ttb), lambda g, lens: (0, g))]
                + [_const_spec(a) for a in s1_args]
                + [_const_spec(a) for a in r_args])
    out_specs = pl.BlockSpec((num_stages, k, ttb), lambda g, lens: (0, 0, g))

    # Advisory cost estimate so XLA schedules surrounding ops sensibly.
    cols = n * t
    flops_s1 = 2 * f * cin + num_layers * (2 * f * 3 * f + 2 * f * f) + 2 * k * f
    flops_rf = 2 * f * k + num_layers * (2 * f * 3 * f + 2 * f * f) + 2 * k * f
    flops = cols * (flops_s1 + num_refine * flops_rf)
    transcendentals = cols * k * num_refine                     # softmax exp
    bytes_accessed = (x_flat.size * x_flat.dtype.itemsize
                      + sum(a.size * a.dtype.itemsize for a in s1_args + r_args)
                      + num_stages * k * n * t * 4)

    kernel = functools.partial(_mstcn_kernel, num_layers, num_refine, nb, t)

    out_flat = pl.pallas_call(
        kernel,
        out_shape=jax.ShapeDtypeStruct((num_stages, k, n * t), jnp.float32),
        grid_spec=pltpu.PrefetchScalarGridSpec(
            num_scalar_prefetch=1,          # per-batch valid lengths -> SMEM
            grid=(n // nb,),
            in_specs=in_specs,
            out_specs=out_specs,
        ),
        compiler_params=pltpu.CompilerParams(
            dimension_semantics=("parallel",),
            # Explicit VMEM budget (safe on v5e/v6e 128 MiB and v7x 64 MiB).
            vmem_limit_bytes=48 * 1024 * 1024,
        ),
        cost_estimate=pl.CostEstimate(flops=int(flops),
                                      transcendentals=int(transcendentals),
                                      bytes_accessed=int(bytes_accessed)),
    )(lengths, x_flat, *s1_args, *r_args)

    # (S, K, N*T) -> (S, N, K, T)  (back to the PyTorch layout)
    return jnp.transpose(out_flat.reshape(num_stages, k, n, t), (0, 2, 1, 3))


# --------------------------- parameter creation -------------------------------

def init_conv1d(key, cout, cin, ksize):
    # Deterministic, PyTorch-like uniform(-1/sqrt(fan_in), 1/sqrt(fan_in)) init.
    k1, k2 = jax.random.split(key)
    bound = 1.0 / np.sqrt(cin * ksize)
    w = jax.random.uniform(k1, (cout, cin, ksize), jnp.float32, -bound, bound)
    b = jax.random.uniform(k2, (cout,), jnp.float32, -bound, bound)
    return w, b


def init_stage(key, num_layers, num_f_maps, dim, num_classes):
    """Raw PyTorch-layout weights: conv weight (Cout, Cin, K), bias (Cout,)."""
    keys = jax.random.split(key, num_layers * 2 + 2)
    in_w, in_b = init_conv1d(keys[0], num_f_maps, dim, 1)
    layers = []
    for i in range(num_layers):
        wd, bd = init_conv1d(keys[1 + 2 * i], num_f_maps, num_f_maps, 3)
        w1, b1 = init_conv1d(keys[2 + 2 * i], num_f_maps, num_f_maps, 1)
        layers.append({"wd": wd, "bd": bd, "w1": w1, "b1": b1})
    out_w, out_b = init_conv1d(keys[-1], num_classes, num_f_maps, 1)
    return {"in_w": in_w, "in_b": in_b, "layers": layers,
            "out_w": out_w, "out_b": out_b}


def pack_stage_params(raw):
    """Host-side packing into MXU-friendly layouts (weights bf16, biases f32)."""
    def taps(w):   # (F, F, 3) -> (3F, F); tap order [x[t-d], x[t], x[t+d]]
        return jnp.concatenate([w[:, :, 0], w[:, :, 1], w[:, :, 2]], axis=0)
    return {
        "in_w": raw["in_w"][:, :, 0].astype(jnp.bfloat16),            # (F, Cin)
        "in_b": raw["in_b"][:, None].astype(jnp.float32),             # (F, 1)
        "wd": jnp.stack([taps(l["wd"]) for l in raw["layers"]]).astype(jnp.bfloat16),
        "bd": jnp.stack([l["bd"][:, None] for l in raw["layers"]]).astype(jnp.float32),
        "w1": jnp.stack([l["w1"][:, :, 0] for l in raw["layers"]]).astype(jnp.bfloat16),
        "b1": jnp.stack([l["b1"][:, None] for l in raw["layers"]]).astype(jnp.float32),
        "out_w": raw["out_w"][:, :, 0].astype(jnp.bfloat16),          # (K, F)
        "out_b": raw["out_b"][:, None].astype(jnp.float32),           # (K, 1)
    }


def pack_params(raw_params):
    s1 = pack_stage_params(raw_params[0])
    refine = None
    if len(raw_params) > 1:
        ps = [pack_stage_params(p) for p in raw_params[1:]]
        refine = {
            "in_w": jnp.stack([p["in_w"] for p in ps]),               # (R, F, K)
            "in_b": jnp.stack([p["in_b"] for p in ps]),               # (R, F, 1)
            # per-layer tensors: fold (R, L) -> R*L so the kernel only needs
            # single-integer ref indexing (s * L + i).
            "wd": jnp.concatenate([p["wd"] for p in ps], axis=0),     # (R*L, 3F, F)
            "bd": jnp.concatenate([p["bd"] for p in ps], axis=0),
            "w1": jnp.concatenate([p["w1"] for p in ps], axis=0),
            "b1": jnp.concatenate([p["b1"] for p in ps], axis=0),
            "out_w": jnp.stack([p["out_w"] for p in ps]),             # (R, K, F)
            "out_b": jnp.stack([p["out_b"] for p in ps]),             # (R, K, 1)
        }
    return {"s1": s1, "refine": refine}


# ---------------------------- pure-JAX reference ------------------------------

def _ref_pointwise(x_nct, w, b):
    return (jnp.einsum("oc,nct->not", w[:, :, 0], x_nct,
                       precision=jax.lax.Precision.HIGHEST)
            + b[None, :, None])


def _ref_dilated(x_nct, w, b, d):
    y = jax.lax.conv_general_dilated(
        x_nct, w, window_strides=(1,), padding=[(d, d)], rhs_dilation=(d,),
        dimension_numbers=("NCH", "OIH", "NCH"),
        precision=jax.lax.Precision.HIGHEST)
    return y + b[None, :, None]


def _ref_single_stage(x_nct, m1, p, num_layers):
    out = _ref_pointwise(x_nct, p["in_w"], p["in_b"])
    for i, lp in enumerate(p["layers"]):
        h = jax.nn.relu(_ref_dilated(out, lp["wd"], lp["bd"], 2 ** i))
        h = _ref_pointwise(h, lp["w1"], lp["b1"])
        out = (out + h) * m1
    return _ref_pointwise(out, p["out_w"], p["out_b"]) * m1


def _ref_multi_stage(x_nct, mask_nct, raw_params, num_layers):
    m1 = mask_nct[:, 0:1, :]
    out = _ref_single_stage(x_nct, m1, raw_params[0], num_layers)
    outs = [out]
    for p in raw_params[1:]:
        out = _ref_single_stage(jax.nn.softmax(out, axis=1) * m1, m1, p,
                                num_layers)
        outs.append(out)
    return jnp.stack(outs, axis=0)


# ------------------------------------ main -------------------------------------

if __name__ == "__main__":
    num_stages, num_layers = 3, 3
    num_f_maps, dim, num_classes = 32, 16, 8
    N, T = 4, 128

    key = jax.random.PRNGKey(0)
    k_x, k_p = jax.random.split(key)
    x = jax.random.normal(k_x, (N, dim, T), jnp.float32)

    # MS-TCN mask: 1 for valid frames, 0 for padded frames (channel-replicated).
    valid = jnp.array([T, T - 32, T, T - 96], jnp.int32)
    t_idx = jnp.arange(T)[None, :]
    mask_row = (t_idx < valid[:, None]).astype(jnp.float32)           # (N, T)
    mask = jnp.broadcast_to(mask_row[:, None, :], (N, num_classes, T))

    stage_keys = jax.random.split(k_p, num_stages)
    raw_params = [init_stage(stage_keys[0], num_layers, num_f_maps, dim,
                             num_classes)]
    for s in range(1, num_stages):
        raw_params.append(init_stage(stage_keys[s], num_layers, num_f_maps,
                                     num_classes, num_classes))
    packed_params = pack_params(raw_params)

    fwd = jax.jit(multi_stage_forward)
    out = jax.block_until_ready(fwd(x, mask, packed_params))
    assert out.shape == (num_stages, N, num_classes, T), out.shape

    ref = jax.block_until_ready(_ref_multi_stage(x, mask, raw_params, num_layers))
    out_np = np.asarray(out, np.float32)
    ref_np = np.asarray(ref, np.float32)
    err = float(np.max(np.abs(out_np - ref_np)))
    scale = float(np.max(np.abs(ref_np)))
    tol = 5e-2 * max(scale, 1.0)            # bf16-MXU precision tradeoff
    if not np.isfinite(err) or err > tol:
        raise AssertionError(
            f"Pallas output mismatch vs reference: max|err|={err:.4g} > tol={tol:.4g}")

    print("KERNEL_OK")
</pallas_src>

<mosaic_0001>
module attributes {stable_mosaic.version = 11 : i64} {
  func.func @_mstcn_kernel(%arg0: i32, %arg1: memref<4xi32, #tpu.memory_space<smem>>, %arg2: memref<16x256xbf16, #tpu.memory_space<vmem>>, %arg3: memref<32x16xbf16, #tpu.memory_space<vmem>>, %arg4: memref<32x1xf32, #tpu.memory_space<vmem>>, %arg5: memref<3x96x32xbf16, #tpu.memory_space<vmem>>, %arg6: memref<3x32x1xf32, #tpu.memory_space<vmem>>, %arg7: memref<3x32x32xbf16, #tpu.memory_space<vmem>>, %arg8: memref<3x32x1xf32, #tpu.memory_space<vmem>>, %arg9: memref<8x32xbf16, #tpu.memory_space<vmem>>, %arg10: memref<8x1xf32, #tpu.memory_space<vmem>>, %arg11: memref<2x32x8xbf16, #tpu.memory_space<vmem>>, %arg12: memref<2x32x1xf32, #tpu.memory_space<vmem>>, %arg13: memref<6x96x32xbf16, #tpu.memory_space<vmem>>, %arg14: memref<6x32x1xf32, #tpu.memory_space<vmem>>, %arg15: memref<6x32x32xbf16, #tpu.memory_space<vmem>>, %arg16: memref<6x32x1xf32, #tpu.memory_space<vmem>>, %arg17: memref<2x8x32xbf16, #tpu.memory_space<vmem>>, %arg18: memref<2x8x1xf32, #tpu.memory_space<vmem>>, %arg19: memref<3x8x256xf32, #tpu.memory_space<vmem>>) attributes {dimension_semantics = [#tpu.dimension_semantics<parallel>], iteration_bounds = array<i64: 2>, scalar_prefetch = 1 : i64, scratch_operands = 0 : i64, tpu.core_type = #tpu.core_type<tc>, window_params = [{transform_indices = @transform_0, window_bounds = array<i64: 16, 256>}, {pipeline_mode = #tpu.pipeline_mode<synchronous>, transform_indices = @transform_1, window_bounds = array<i64: 32, 16>}, {pipeline_mode = #tpu.pipeline_mode<synchronous>, transform_indices = @transform_2, window_bounds = array<i64: 32, 1>}, {pipeline_mode = #tpu.pipeline_mode<synchronous>, transform_indices = @transform_3, window_bounds = array<i64: 3, 96, 32>}, {pipeline_mode = #tpu.pipeline_mode<synchronous>, transform_indices = @transform_4, window_bounds = array<i64: 3, 32, 1>}, {pipeline_mode = #tpu.pipeline_mode<synchronous>, transform_indices = @transform_5, window_bounds = array<i64: 3, 32, 32>}, {pipeline_mode = #tpu.pipeline_mode<synchronous>, transform_indices = @transform_6, window_bounds = array<i64: 3, 32, 1>}, {pipeline_mode = #tpu.pipeline_mode<synchronous>, transform_indices = @transform_7, window_bounds = array<i64: 8, 32>}, {pipeline_mode = #tpu.pipeline_mode<synchronous>, transform_indices = @transform_8, window_bounds = array<i64: 8, 1>}, {pipeline_mode = #tpu.pipeline_mode<synchronous>, transform_indices = @transform_9, window_bounds = array<i64: 2, 32, 8>}, {pipeline_mode = #tpu.pipeline_mode<synchronous>, transform_indices = @transform_10, window_bounds = array<i64: 2, 32, 1>}, {pipeline_mode = #tpu.pipeline_mode<synchronous>, transform_indices = @transform_11, window_bounds = array<i64: 6, 96, 32>}, {pipeline_mode = #tpu.pipeline_mode<synchronous>, transform_indices = @transform_12, window_bounds = array<i64: 6, 32, 1>}, {pipeline_mode = #tpu.pipeline_mode<synchronous>, transform_indices = @transform_13, window_bounds = array<i64: 6, 32, 32>}, {pipeline_mode = #tpu.pipeline_mode<synchronous>, transform_indices = @transform_14, window_bounds = array<i64: 6, 32, 1>}, {pipeline_mode = #tpu.pipeline_mode<synchronous>, transform_indices = @transform_15, window_bounds = array<i64: 2, 8, 32>}, {pipeline_mode = #tpu.pipeline_mode<synchronous>, transform_indices = @transform_16, window_bounds = array<i64: 2, 8, 1>}, {transform_indices = @transform_17, window_bounds = array<i64: 3, 8, 256>}]} {
    %0 = tpu.iota {dimensions = array<i32: 1>} : vector<1x256xi32>
    %cst = arith.constant 0.000000e+00 : f32
    %1 = vector.broadcast %cst : f32 to vector<1x256xf32>
    %c2_i32 = arith.constant 2 : i32
    %2 = arith.muli %arg0, %c2_i32 : i32
    %c0_i32 = arith.constant 0 : i32
    %3 = arith.addi %2, %c0_i32 : i32
    %4 = arith.index_cast %3 : i32 to index
    %5 = memref.load %arg1[%4] : memref<4xi32, #tpu.memory_space<smem>>
    %c0_i32_0 = arith.constant 0 : i32
    %6 = vector.broadcast %c0_i32_0 : i32 to vector<1x256xi32>
    %7 = arith.cmpi sge, %0, %6 : vector<1x256xi32>
    %c0_i32_1 = arith.constant 0 : i32
    %8 = arith.addi %c0_i32_1, %5 : i32
    %9 = vector.broadcast %8 : i32 to vector<1x256xi32>
    %10 = arith.cmpi slt, %0, %9 : vector<1x256xi32>
    %11 = arith.andi %7, %10 : vector<1x256xi1>
    %cst_2 = arith.constant 1.000000e+00 : f32
    %12 = vector.broadcast %cst_2 : f32 to vector<1x256xf32>
    %13 = arith.select %11, %12, %1 : vector<1x256xi1>, vector<1x256xf32>
    %c128_i32 = arith.constant 128 : i32
    %14 = vector.broadcast %c128_i32 : i32 to vector<1x256xi32>
    %15 = arith.cmpi sge, %0, %14 : vector<1x256xi32>
    %c128_i32_3 = arith.constant 128 : i32
    %16 = vector.broadcast %c128_i32_3 : i32 to vector<1x256xi32>
    %17 = arith.subi %0, %16 : vector<1x256xi32>
    %18 = arith.select %15, %17, %0 : vector<1x256xi1>, vector<1x256xi32>
    %c2_i32_4 = arith.constant 2 : i32
    %19 = arith.muli %arg0, %c2_i32_4 : i32
    %c1_i32 = arith.constant 1 : i32
    %20 = arith.addi %19, %c1_i32 : i32
    %21 = arith.index_cast %20 : i32 to index
    %22 = memref.load %arg1[%21] : memref<4xi32, #tpu.memory_space<smem>>
    %c128_i32_5 = arith.constant 128 : i32
    %23 = vector.broadcast %c128_i32_5 : i32 to vector<1x256xi32>
    %24 = arith.cmpi sge, %0, %23 : vector<1x256xi32>
    %c128_i32_6 = arith.constant 128 : i32
    %25 = arith.addi %c128_i32_6, %22 : i32
    %26 = vector.broadcast %25 : i32 to vector<1x256xi32>
    %27 = arith.cmpi slt, %0, %26 : vector<1x256xi32>
    %28 = arith.andi %24, %27 : vector<1x256xi1>
    %cst_7 = arith.constant 1.000000e+00 : f32
    %29 = vector.broadcast %cst_7 : f32 to vector<1x256xf32>
    %30 = arith.select %28, %29, %13 : vector<1x256xi1>, vector<1x256xf32>
    %c0 = arith.constant 0 : index
    %c0_8 = arith.constant 0 : index
    %31 = vector.load %arg2[%c0, %c0_8] : memref<16x256xbf16, #tpu.memory_space<vmem>>, vector<16x256xbf16>
    %c0_9 = arith.constant 0 : index
    %c0_10 = arith.constant 0 : index
    %32 = vector.load %arg3[%c0_9, %c0_10] : memref<32x16xbf16, #tpu.memory_space<vmem>>, vector<32x16xbf16>
    %cst_11 = arith.constant dense<0.000000e+00> : vector<32x256xf32>
    %33 = tpu.matmul %32, %31, %cst_11 {dimension_numbers = #tpu.dot_dimension_numbers<[1], [0], [0], [1], [0, 0, 1, 1], [], []>} : vector<32x16xbf16>, vector<16x256xbf16>, vector<32x256xf32> -> vector<32x256xf32>
    %c0_12 = arith.constant 0 : index
    %c0_13 = arith.constant 0 : index
    %34 = vector.load %arg4[%c0_12, %c0_13] : memref<32x1xf32, #tpu.memory_space<vmem>>, vector<32x1xf32>
    %35 = vector.broadcast %34 : vector<32x1xf32> to vector<32x256xf32>
    %36 = arith.addf %33, %35 : vector<32x256xf32>
    %c0_14 = arith.constant 0 : index
    %c0_15 = arith.constant 0 : index
    %c0_16 = arith.constant 0 : index
    %37 = vector.load %arg5[%c0_14, %c0_15, %c0_16] : memref<3x96x32xbf16, #tpu.memory_space<vmem>>, vector<1x96x32xbf16>
    %38 = vector.shape_cast %37 : vector<1x96x32xbf16> to vector<96x32xbf16>
    %39 = arith.truncf %36 : vector<32x256xf32> to vector<32x256xbf16>
    %cst_17 = arith.constant dense<0.000000e+00> : vector<96x256xf32>
    %40 = tpu.matmul %38, %39, %cst_17 {dimension_numbers = #tpu.dot_dimension_numbers<[1], [0], [0], [1], [0, 0, 1, 1], [], []>} : vector<96x32xbf16>, vector<32x256xbf16>, vector<96x256xf32> -> vector<96x256xf32>
    %41 = vector.extract_strided_slice %40 {offsets = [32, 0], sizes = [32, 256], strides = [1, 1]} : vector<96x256xf32> to vector<32x256xf32>
    %c0_18 = arith.constant 0 : index
    %c0_19 = arith.constant 0 : index
    %c0_20 = arith.constant 0 : index
    %42 = vector.load %arg6[%c0_18, %c0_19, %c0_20] : memref<3x32x1xf32, #tpu.memory_space<vmem>>, vector<1x32x1xf32>
    %43 = vector.shape_cast %42 : vector<1x32x1xf32> to vector<32x1xf32>
    %44 = vector.broadcast %43 : vector<32x1xf32> to vector<32x256xf32>
    %45 = arith.addf %41, %44 : vector<32x256xf32>
    %c1_i32_21 = arith.constant 1 : i32
    %46 = vector.broadcast %c1_i32_21 : i32 to vector<1x256xi32>
    %47 = arith.cmpi sge, %18, %46 : vector<1x256xi32>
    %48 = vector.extract_strided_slice %40 {offsets = [0, 0], sizes = [32, 256], strides = [1, 1]} : vector<96x256xf32> to vector<32x256xf32>
    %c1_i32_22 = arith.constant 1 : i32
    %49 = tpu.dynamic_rotate %48 by %c1_i32_22 dim 1 : vector<32x256xf32>, i32 -> vector<32x256xf32>
    %cst_23 = arith.constant 0.000000e+00 : f32
    %50 = vector.shape_cast %47 : vector<1x256xi1> to vector<1x256xi1>
    %51 = vector.broadcast %50 : vector<1x256xi1> to vector<32x256xi1>
    %52 = vector.broadcast %cst_23 : f32 to vector<32x256xf32>
    %53 = arith.select %51, %49, %52 : vector<32x256xi1>, vector<32x256xf32>
    %54 = arith.addf %45, %53 : vector<32x256xf32>
    %c127_i32 = arith.constant 127 : i32
    %55 = vector.broadcast %c127_i32 : i32 to vector<1x256xi32>
    %56 = arith.cmpi slt, %18, %55 : vector<1x256xi32>
    %57 = vector.extract_strided_slice %40 {offsets = [64, 0], sizes = [32, 256], strides = [1, 1]} : vector<96x256xf32> to vector<32x256xf32>
    %c255_i32 = arith.constant 255 : i32
    %58 = tpu.dynamic_rotate %57 by %c255_i32 dim 1 : vector<32x256xf32>, i32 -> vector<32x256xf32>
    %cst_24 = arith.constant 0.000000e+00 : f32
    %59 = vector.shape_cast %56 : vector<1x256xi1> to vector<1x256xi1>
    %60 = vector.broadcast %59 : vector<1x256xi1> to vector<32x256xi1>
    %61 = vector.broadcast %cst_24 : f32 to vector<32x256xf32>
    %62 = arith.select %60, %58, %61 : vector<32x256xi1>, vector<32x256xf32>
    %63 = arith.addf %54, %62 : vector<32x256xf32>
    %cst_25 = arith.constant 0.000000e+00 : f32
    %64 = vector.broadcast %cst_25 : f32 to vector<32x256xf32>
    %65 = arith.maximumf %63, %64 : vector<32x256xf32>
    %c0_26 = arith.constant 0 : index
    %c0_27 = arith.constant 0 : index
    %c0_28 = arith.constant 0 : index
    %66 = vector.load %arg7[%c0_26, %c0_27, %c0_28] : memref<3x32x32xbf16, #tpu.memory_space<vmem>>, vector<1x32x32xbf16>
    %67 = vector.shape_cast %66 : vector<1x32x32xbf16> to vector<32x32xbf16>
    %68 = arith.truncf %65 : vector<32x256xf32> to vector<32x256xbf16>
    %cst_29 = arith.constant dense<0.000000e+00> : vector<32x256xf32>
    %69 = tpu.matmul %67, %68, %cst_29 {dimension_numbers = #tpu.dot_dimension_numbers<[1], [0], [0], [1], [0, 0, 1, 1], [], []>} : vector<32x32xbf16>, vector<32x256xbf16>, vector<32x256xf32> -> vector<32x256xf32>
    %c0_30 = arith.constant 0 : index
    %c0_31 = arith.constant 0 : index
    %c0_32 = arith.constant 0 : index
    %70 = vector.load %arg8[%c0_30, %c0_31, %c0_32] : memref<3x32x1xf32, #tpu.memory_space<vmem>>, vector<1x32x1xf32>
    %71 = vector.shape_cast %70 : vector<1x32x1xf32> to vector<32x1xf32>
    %72 = vector.broadcast %71 : vector<32x1xf32> to vector<32x256xf32>
    %73 = arith.addf %69, %72 : vector<32x256xf32>
    %74 = arith.addf %36, %73 : vector<32x256xf32>
    %75 = vector.broadcast %30 : vector<1x256xf32> to vector<32x256xf32>
    %76 = arith.mulf %74, %75 : vector<32x256xf32>
    %c1 = arith.constant 1 : index
    %c0_33 = arith.constant 0 : index
    %c0_34 = arith.constant 0 : index
    %77 = vector.load %arg5[%c1, %c0_33, %c0_34] : memref<3x96x32xbf16, #tpu.memory_space<vmem>>, vector<1x96x32xbf16>
    %78 = vector.shape_cast %77 : vector<1x96x32xbf16> to vector<96x32xbf16>
    %79 = arith.truncf %76 : vector<32x256xf32> to vector<32x256xbf16>
    %cst_35 = arith.constant dense<0.000000e+00> : vector<96x256xf32>
    %80 = tpu.matmul %78, %79, %cst_35 {dimension_numbers = #tpu.dot_dimension_numbers<[1], [0], [0], [1], [0, 0, 1, 1], [], []>} : vector<96x32xbf16>, vector<32x256xbf16>, vector<96x256xf32> -> vector<96x256xf32>
    %81 = vector.extract_strided_slice %80 {offsets = [32, 0], sizes = [32, 256], strides = [1, 1]} : vector<96x256xf32> to vector<32x256xf32>
    %c1_36 = arith.constant 1 : index
    %c0_37 = arith.constant 0 : index
    %c0_38 = arith.constant 0 : index
    %82 = vector.load %arg6[%c1_36, %c0_37, %c0_38] : memref<3x32x1xf32, #tpu.memory_space<vmem>>, vector<1x32x1xf32>
    %83 = vector.shape_cast %82 : vector<1x32x1xf32> to vector<32x1xf32>
    %84 = vector.broadcast %83 : vector<32x1xf32> to vector<32x256xf32>
    %85 = arith.addf %81, %84 : vector<32x256xf32>
    %c2_i32_39 = arith.constant 2 : i32
    %86 = vector.broadcast %c2_i32_39 : i32 to vector<1x256xi32>
    %87 = arith.cmpi sge, %18, %86 : vector<1x256xi32>
    %88 = vector.extract_strided_slice %80 {offsets = [0, 0], sizes = [32, 256], strides = [1, 1]} : vector<96x256xf32> to vector<32x256xf32>
    %c2_i32_40 = arith.constant 2 : i32
    %89 = tpu.dynamic_rotate %88 by %c2_i32_40 dim 1 : vector<32x256xf32>, i32 -> vector<32x256xf32>
    %cst_41 = arith.constant 0.000000e+00 : f32
    %90 = vector.shape_cast %87 : vector<1x256xi1> to vector<1x256xi1>
    %91 = vector.broadcast %90 : vector<1x256xi1> to vector<32x256xi1>
    %92 = vector.broadcast %cst_41 : f32 to vector<32x256xf32>
    %93 = arith.select %91, %89, %92 : vector<32x256xi1>, vector<32x256xf32>
    %94 = arith.addf %85, %93 : vector<32x256xf32>
    %c126_i32 = arith.constant 126 : i32
    %95 = vector.broadcast %c126_i32 : i32 to vector<1x256xi32>
    %96 = arith.cmpi slt, %18, %95 : vector<1x256xi32>
    %97 = vector.extract_strided_slice %80 {offsets = [64, 0], sizes = [32, 256], strides = [1, 1]} : vector<96x256xf32> to vector<32x256xf32>
    %c254_i32 = arith.constant 254 : i32
    %98 = tpu.dynamic_rotate %97 by %c254_i32 dim 1 : vector<32x256xf32>, i32 -> vector<32x256xf32>
    %cst_42 = arith.constant 0.000000e+00 : f32
    %99 = vector.shape_cast %96 : vector<1x256xi1> to vector<1x256xi1>
    %100 = vector.broadcast %99 : vector<1x256xi1> to vector<32x256xi1>
    %101 = vector.broadcast %cst_42 : f32 to vector<32x256xf32>
    %102 = arith.select %100, %98, %101 : vector<32x256xi1>, vector<32x256xf32>
    %103 = arith.addf %94, %102 : vector<32x256xf32>
    %cst_43 = arith.constant 0.000000e+00 : f32
    %104 = vector.broadcast %cst_43 : f32 to vector<32x256xf32>
    %105 = arith.maximumf %103, %104 : vector<32x256xf32>
    %c1_44 = arith.constant 1 : index
    %c0_45 = arith.constant 0 : index
    %c0_46 = arith.constant 0 : index
    %106 = vector.load %arg7[%c1_44, %c0_45, %c0_46] : memref<3x32x32xbf16, #tpu.memory_space<vmem>>, vector<1x32x32xbf16>
    %107 = vector.shape_cast %106 : vector<1x32x32xbf16> to vector<32x32xbf16>
    %108 = arith.truncf %105 : vector<32x256xf32> to vector<32x256xbf16>
    %cst_47 = arith.constant dense<0.000000e+00> : vector<32x256xf32>
    %109 = tpu.matmul %107, %108, %cst_47 {dimension_numbers = #tpu.dot_dimension_numbers<[1], [0], [0], [1], [0, 0, 1, 1], [], []>} : vector<32x32xbf16>, vector<32x256xbf16>, vector<32x256xf32> -> vector<32x256xf32>
    %c1_48 = arith.constant 1 : index
    %c0_49 = arith.constant 0 : index
    %c0_50 = arith.constant 0 : index
    %110 = vector.load %arg8[%c1_48, %c0_49, %c0_50] : memref<3x32x1xf32, #tpu.memory_space<vmem>>, vector<1x32x1xf32>
    %111 = vector.shape_cast %110 : vector<1x32x1xf32> to vector<32x1xf32>
    %112 = vector.broadcast %111 : vector<32x1xf32> to vector<32x256xf32>
    %113 = arith.addf %109, %112 : vector<32x256xf32>
    %114 = arith.addf %76, %113 : vector<32x256xf32>
    %115 = vector.broadcast %30 : vector<1x256xf32> to vector<32x256xf32>
    %116 = arith.mulf %114, %115 : vector<32x256xf32>
    %c2 = arith.constant 2 : index
    %c0_51 = arith.constant 0 : index
    %c0_52 = arith.constant 0 : index
    %117 = vector.load %arg5[%c2, %c0_51, %c0_52] : memref<3x96x32xbf16, #tpu.memory_space<vmem>>, vector<1x96x32xbf16>
    %118 = vector.shape_cast %117 : vector<1x96x32xbf16> to vector<96x32xbf16>
    %119 = arith.truncf %116 : vector<32x256xf32> to vector<32x256xbf16>
    %cst_53 = arith.constant dense<0.000000e+00> : vector<96x256xf32>
    %120 = tpu.matmul %118, %119, %cst_53 {dimension_numbers = #tpu.dot_dimension_numbers<[1], [0], [0], [1], [0, 0, 1, 1], [], []>} : vector<96x32xbf16>, vector<32x256xbf16>, vector<96x256xf32> -> vector<96x256xf32>
    %121 = vector.extract_strided_slice %120 {offsets = [32, 0], sizes = [32, 256], strides = [1, 1]} : vector<96x256xf32> to vector<32x256xf32>
    %c2_54 = arith.constant 2 : index
    %c0_55 = arith.constant 0 : index
    %c0_56 = arith.constant 0 : index
    %122 = vector.load %arg6[%c2_54, %c0_55, %c0_56] : memref<3x32x1xf32, #tpu.memory_space<vmem>>, vector<1x32x1xf32>
    %123 = vector.shape_cast %122 : vector<1x32x1xf32> to vector<32x1xf32>
    %124 = vector.broadcast %123 : vector<32x1xf32> to vector<32x256xf32>
    %125 = arith.addf %121, %124 : vector<32x256xf32>
    %c4_i32 = arith.constant 4 : i32
    %126 = vector.broadcast %c4_i32 : i32 to vector<1x256xi32>
    %127 = arith.cmpi sge, %18, %126 : vector<1x256xi32>
    %128 = vector.extract_strided_slice %120 {offsets = [0, 0], sizes = [32, 256], strides = [1, 1]} : vector<96x256xf32> to vector<32x256xf32>
    %c4_i32_57 = arith.constant 4 : i32
    %129 = tpu.dynamic_rotate %128 by %c4_i32_57 dim 1 : vector<32x256xf32>, i32 -> vector<32x256xf32>
    %cst_58 = arith.constant 0.000000e+00 : f32
    %130 = vector.shape_cast %127 : vector<1x256xi1> to vector<1x256xi1>
    %131 = vector.broadcast %130 : vector<1x256xi1> to vector<32x256xi1>
    %132 = vector.broadcast %cst_58 : f32 to vector<32x256xf32>
    %133 = arith.select %131, %129, %132 : vector<32x256xi1>, vector<32x256xf32>
    %134 = arith.addf %125, %133 : vector<32x256xf32>
    %c124_i32 = arith.constant 124 : i32
    %135 = vector.broadcast %c124_i32 : i32 to vector<1x256xi32>
    %136 = arith.cmpi slt, %18, %135 : vector<1x256xi32>
    %137 = vector.extract_strided_slice %120 {offsets = [64, 0], sizes = [32, 256], strides = [1, 1]} : vector<96x256xf32> to vector<32x256xf32>
    %c252_i32 = arith.constant 252 : i32
    %138 = tpu.dynamic_rotate %137 by %c252_i32 dim 1 : vector<32x256xf32>, i32 -> vector<32x256xf32>
    %cst_59 = arith.constant 0.000000e+00 : f32
    %139 = vector.shape_cast %136 : vector<1x256xi1> to vector<1x256xi1>
    %140 = vector.broadcast %139 : vector<1x256xi1> to vector<32x256xi1>
    %141 = vector.broadcast %cst_59 : f32 to vector<32x256xf32>
    %142 = arith.select %140, %138, %141 : vector<32x256xi1>, vector<32x256xf32>
    %143 = arith.addf %134, %142 : vector<32x256xf32>
    %cst_60 = arith.constant 0.000000e+00 : f32
    %144 = vector.broadcast %cst_60 : f32 to vector<32x256xf32>
    %145 = arith.maximumf %143, %144 : vector<32x256xf32>
    %c2_61 = arith.constant 2 : index
    %c0_62 = arith.constant 0 : index
    %c0_63 = arith.constant 0 : index
    %146 = vector.load %arg7[%c2_61, %c0_62, %c0_63] : memref<3x32x32xbf16, #tpu.memory_space<vmem>>, vector<1x32x32xbf16>
    %147 = vector.shape_cast %146 : vector<1x32x32xbf16> to vector<32x32xbf16>
    %148 = arith.truncf %145 : vector<32x256xf32> to vector<32x256xbf16>
    %cst_64 = arith.constant dense<0.000000e+00> : vector<32x256xf32>
    %149 = tpu.matmul %147, %148, %cst_64 {dimension_numbers = #tpu.dot_dimension_numbers<[1], [0], [0], [1], [0, 0, 1, 1], [], []>} : vector<32x32xbf16>, vector<32x256xbf16>, vector<32x256xf32> -> vector<32x256xf32>
    %c2_65 = arith.constant 2 : index
    %c0_66 = arith.constant 0 : index
    %c0_67 = arith.constant 0 : index
    %150 = vector.load %arg8[%c2_65, %c0_66, %c0_67] : memref<3x32x1xf32, #tpu.memory_space<vmem>>, vector<1x32x1xf32>
    %151 = vector.shape_cast %150 : vector<1x32x1xf32> to vector<32x1xf32>
    %152 = vector.broadcast %151 : vector<32x1xf32> to vector<32x256xf32>
    %153 = arith.addf %149, %152 : vector<32x256xf32>
    %154 = arith.addf %116, %153 : vector<32x256xf32>
    %155 = vector.broadcast %30 : vector<1x256xf32> to vector<32x256xf32>
    %156 = arith.mulf %154, %155 : vector<32x256xf32>
    %c0_68 = arith.constant 0 : index
    %c0_69 = arith.constant 0 : index
    %157 = vector.load %arg9[%c0_68, %c0_69] : memref<8x32xbf16, #tpu.memory_space<vmem>>, vector<8x32xbf16>
    %158 = arith.truncf %156 : vector<32x256xf32> to vector<32x256xbf16>
    %cst_70 = arith.constant dense<0.000000e+00> : vector<8x256xf32>
    %159 = tpu.matmul %157, %158, %cst_70 {dimension_numbers = #tpu.dot_dimension_numbers<[1], [0], [0], [1], [0, 0, 1, 1], [], []>} : vector<8x32xbf16>, vector<32x256xbf16>, vector<8x256xf32> -> vector<8x256xf32>
    %c0_71 = arith.constant 0 : index
    %c0_72 = arith.constant 0 : index
    %160 = vector.load %arg10[%c0_71, %c0_72] : memref<8x1xf32, #tpu.memory_space<vmem>>, vector<8x1xf32>
    %161 = vector.broadcast %160 : vector<8x1xf32> to vector<8x256xf32>
    %162 = arith.addf %159, %161 : vector<8x256xf32>
    %163 = vector.broadcast %30 : vector<1x256xf32> to vector<8x256xf32>
    %164 = arith.mulf %162, %163 : vector<8x256xf32>
    %c0_73 = arith.constant 0 : index
    %c0_74 = arith.constant 0 : index
    %c0_75 = arith.constant 0 : index
    %165 = vector.load %arg19[%c0_73, %c0_74, %c0_75] : memref<3x8x256xf32, #tpu.memory_space<vmem>>, vector<1x8x256xf32>
    %166 = vector.shape_cast %165 : vector<1x8x256xf32> to vector<8x256xf32>
    %167 = vector.shape_cast %164 : vector<8x256xf32> to vector<1x8x256xf32>
    tpu.vector_store %arg19[%c0_73, %c0_74, %c0_75], %167 {strides = array<i32>} : memref<3x8x256xf32, #tpu.memory_space<vmem>>, vector<1x8x256xf32>,
    %cst_76 = arith.constant dense<0xFF800000> : vector<256xf32>
    %168 = vector.multi_reduction <maximumf>, %164, %cst_76 [0] : vector<8x256xf32> to vector<256xf32>
    %169 = vector.shape_cast %168 : vector<256xf32> to vector<1x256xf32>
    %170 = vector.broadcast %169 : vector<1x256xf32> to vector<8x256xf32>
    %171 = arith.subf %164, %170 : vector<8x256xf32>
    %172 = math.exp %171 : vector<8x256xf32>
    %cst_77 = arith.constant dense<0.000000e+00> : vector<256xf32>
    %173 = vector.multi_reduction <add>, %172, %cst_77 [0] : vector<8x256xf32> to vector<256xf32>
    %174 = vector.shape_cast %173 : vector<256xf32> to vector<1x256xf32>
    %175 = tpu.reciprocal %174 {approx = true} : vector<1x256xf32> -> vector<1x256xf32>
    %176 = vector.broadcast %175 : vector<1x256xf32> to vector<8x256xf32>
    %177 = arith.mulf %172, %176 : vector<8x256xf32>
    %178 = vector.broadcast %30 : vector<1x256xf32> to vector<8x256xf32>
    %179 = arith.mulf %177, %178 : vector<8x256xf32>
    %c0_78 = arith.constant 0 : index
    %c0_79 = arith.constant 0 : index
    %c0_80 = arith.constant 0 : index
    %180 = vector.load %arg11[%c0_78, %c0_79, %c0_80] : memref<2x32x8xbf16, #tpu.memory_space<vmem>>, vector<1x32x8xbf16>
    %181 = vector.shape_cast %180 : vector<1x32x8xbf16> to vector<32x8xbf16>
    %182 = arith.truncf %179 : vector<8x256xf32> to vector<8x256xbf16>
    %cst_81 = arith.constant dense<0.000000e+00> : vector<32x256xf32>
    %183 = tpu.matmul %181, %182, %cst_81 {dimension_numbers = #tpu.dot_dimension_numbers<[1], [0], [0], [1], [0, 0, 1, 1], [], []>} : vector<32x8xbf16>, vector<8x256xbf16>, vector<32x256xf32> -> vector<32x256xf32>
    %c0_82 = arith.constant 0 : index
    %c0_83 = arith.constant 0 : index
    %c0_84 = arith.constant 0 : index
    %184 = vector.load %arg12[%c0_82, %c0_83, %c0_84] : memref<2x32x1xf32, #tpu.memory_space<vmem>>, vector<1x32x1xf32>
    %185 = vector.shape_cast %184 : vector<1x32x1xf32> to vector<32x1xf32>
    %186 = vector.broadcast %185 : vector<32x1xf32> to vector<32x256xf32>
    %187 = arith.addf %183, %186 : vector<32x256xf32>
    %c0_85 = arith.constant 0 : index
    %c0_86 = arith.constant 0 : index
    %c0_87 = arith.constant 0 : index
    %188 = vector.load %arg13[%c0_85, %c0_86, %c0_87] : memref<6x96x32xbf16, #tpu.memory_space<vmem>>, vector<1x96x32xbf16>
    %189 = vector.shape_cast %188 : vector<1x96x32xbf16> to vector<96x32xbf16>
    %190 = arith.truncf %187 : vector<32x256xf32> to vector<32x256xbf16>
    %cst_88 = arith.constant dense<0.000000e+00> : vector<96x256xf32>
    %191 = tpu.matmul %189, %190, %cst_88 {dimension_numbers = #tpu.dot_dimension_numbers<[1], [0], [0], [1], [0, 0, 1, 1], [], []>} : vector<96x32xbf16>, vector<32x256xbf16>, vector<96x256xf32> -> vector<96x256xf32>
    %192 = vector.extract_strided_slice %191 {offsets = [32, 0], sizes = [32, 256], strides = [1, 1]} : vector<96x256xf32> to vector<32x256xf32>
    %c0_89 = arith.constant 0 : index
    %c0_90 = arith.constant 0 : index
    %c0_91 = arith.constant 0 : index
    %193 = vector.load %arg14[%c0_89, %c0_90, %c0_91] : memref<6x32x1xf32, #tpu.memory_space<vmem>>, vector<1x32x1xf32>
    %194 = vector.shape_cast %193 : vector<1x32x1xf32> to vector<32x1xf32>
    %195 = vector.broadcast %194 : vector<32x1xf32> to vector<32x256xf32>
    %196 = arith.addf %192, %195 : vector<32x256xf32>
    %c1_i32_92 = arith.constant 1 : i32
    %197 = vector.broadcast %c1_i32_92 : i32 to vector<1x256xi32>
    %198 = arith.cmpi sge, %18, %197 : vector<1x256xi32>
    %199 = vector.extract_strided_slice %191 {offsets = [0, 0], sizes = [32, 256], strides = [1, 1]} : vector<96x256xf32> to vector<32x256xf32>
    %c1_i32_93 = arith.constant 1 : i32
    %200 = tpu.dynamic_rotate %199 by %c1_i32_93 dim 1 : vector<32x256xf32>, i32 -> vector<32x256xf32>
    %cst_94 = arith.constant 0.000000e+00 : f32
    %201 = vector.shape_cast %198 : vector<1x256xi1> to vector<1x256xi1>
    %202 = vector.broadcast %201 : vector<1x256xi1> to vector<32x256xi1>
    %203 = vector.broadcast %cst_94 : f32 to vector<32x256xf32>
    %204 = arith.select %202, %200, %203 : vector<32x256xi1>, vector<32x256xf32>
    %205 = arith.addf %196, %204 : vector<32x256xf32>
    %c127_i32_95 = arith.constant 127 : i32
    %206 = vector.broadcast %c127_i32_95 : i32 to vector<1x256xi32>
    %207 = arith.cmpi slt, %18, %206 : vector<1x256xi32>
    %208 = vector.extract_strided_slice %191 {offsets = [64, 0], sizes = [32, 256], strides = [1, 1]} : vector<96x256xf32> to vector<32x256xf32>
    %c255_i32_96 = arith.constant 255 : i32
    %209 = tpu.dynamic_rotate %208 by %c255_i32_96 dim 1 : vector<32x256xf32>, i32 -> vector<32x256xf32>
    %cst_97 = arith.constant 0.000000e+00 : f32
    %210 = vector.shape_cast %207 : vector<1x256xi1> to vector<1x256xi1>
    %211 = vector.broadcast %210 : vector<1x256xi1> to vector<32x256xi1>
    %212 = vector.broadcast %cst_97 : f32 to vector<32x256xf32>
    %213 = arith.select %211, %209, %212 : vector<32x256xi1>, vector<32x256xf32>
    %214 = arith.addf %205, %213 : vector<32x256xf32>
    %cst_98 = arith.constant 0.000000e+00 : f32
    %215 = vector.broadcast %cst_98 : f32 to vector<32x256xf32>
    %216 = arith.maximumf %214, %215 : vector<32x256xf32>
    %c0_99 = arith.constant 0 : index
    %c0_100 = arith.constant 0 : index
    %c0_101 = arith.constant 0 : index
    %217 = vector.load %arg15[%c0_99, %c0_100, %c0_101] : memref<6x32x32xbf16, #tpu.memory_space<vmem>>, vector<1x32x32xbf16>
    %218 = vector.shape_cast %217 : vector<1x32x32xbf16> to vector<32x32xbf16>
    %219 = arith.truncf %216 : vector<32x256xf32> to vector<32x256xbf16>
    %cst_102 = arith.constant dense<0.000000e+00> : vector<32x256xf32>
    %220 = tpu.matmul %218, %219, %cst_102 {dimension_numbers = #tpu.dot_dimension_numbers<[1], [0], [0], [1], [0, 0, 1, 1], [], []>} : vector<32x32xbf16>, vector<32x256xbf16>, vector<32x256xf32> -> vector<32x256xf32>
    %c0_103 = arith.constant 0 : index
    %c0_104 = arith.constant 0 : index
    %c0_105 = arith.constant 0 : index
    %221 = vector.load %arg16[%c0_103, %c0_104, %c0_105] : memref<6x32x1xf32, #tpu.memory_space<vmem>>, vector<1x32x1xf32>
    %222 = vector.shape_cast %221 : vector<1x32x1xf32> to vector<32x1xf32>
    %223 = vector.broadcast %222 : vector<32x1xf32> to vector<32x256xf32>
    %224 = arith.addf %220, %223 : vector<32x256xf32>
    %225 = arith.addf %187, %224 : vector<32x256xf32>
    %226 = vector.broadcast %30 : vector<1x256xf32> to vector<32x256xf32>
    %227 = arith.mulf %225, %226 : vector<32x256xf32>
    %c1_106 = arith.constant 1 : index
    %c0_107 = arith.constant 0 : index
    %c0_108 = arith.constant 0 : index
    %228 = vector.load %arg13[%c1_106, %c0_107, %c0_108] : memref<6x96x32xbf16, #tpu.memory_space<vmem>>, vector<1x96x32xbf16>
    %229 = vector.shape_cast %228 : vector<1x96x32xbf16> to vector<96x32xbf16>
    %230 = arith.truncf %227 : vector<32x256xf32> to vector<32x256xbf16>
    %cst_109 = arith.constant dense<0.000000e+00> : vector<96x256xf32>
    %231 = tpu.matmul %229, %230, %cst_109 {dimension_numbers = #tpu.dot_dimension_numbers<[1], [0], [0], [1], [0, 0, 1, 1], [], []>} : vector<96x32xbf16>, vector<32x256xbf16>, vector<96x256xf32> -> vector<96x256xf32>
    %232 = vector.extract_strided_slice %231 {offsets = [32, 0], sizes = [32, 256], strides = [1, 1]} : vector<96x256xf32> to vector<32x256xf32>
    %c1_110 = arith.constant 1 : index
    %c0_111 = arith.constant 0 : index
    %c0_112 = arith.constant 0 : index
    %233 = vector.load %arg14[%c1_110, %c0_111, %c0_112] : memref<6x32x1xf32, #tpu.memory_space<vmem>>, vector<1x32x1xf32>
    %234 = vector.shape_cast %233 : vector<1x32x1xf32> to vector<32x1xf32>
    %235 = vector.broadcast %234 : vector<32x1xf32> to vector<32x256xf32>
    %236 = arith.addf %232, %235 : vector<32x256xf32>
    %c2_i32_113 = arith.constant 2 : i32
    %237 = vector.broadcast %c2_i32_113 : i32 to vector<1x256xi32>
    %238 = arith.cmpi sge, %18, %237 : vector<1x256xi32>
    %239 = vector.extract_strided_slice %231 {offsets = [0, 0], sizes = [32, 256], strides = [1, 1]} : vector<96x256xf32> to vector<32x256xf32>
    %c2_i32_114 = arith.constant 2 : i32
    %240 = tpu.dynamic_rotate %239 by %c2_i32_114 dim 1 : vector<32x256xf32>, i32 -> vector<32x256xf32>
    %cst_115 = arith.constant 0.000000e+00 : f32
    %241 = vector.shape_cast %238 : vector<1x256xi1> to vector<1x256xi1>
    %242 = vector.broadcast %241 : vector<1x256xi1> to vector<32x256xi1>
    %243 = vector.broadcast %cst_115 : f32 to vector<32x256xf32>
    %244 = arith.select %242, %240, %243 : vector<32x256xi1>, vector<32x256xf32>
    %245 = arith.addf %236, %244 : vector<32x256xf32>
    %c126_i32_116 = arith.constant 126 : i32
    %246 = vector.broadcast %c126_i32_116 : i32 to vector<1x256xi32>
    %247 = arith.cmpi slt, %18, %246 : vector<1x256xi32>
    %248 = vector.extract_strided_slice %231 {offsets = [64, 0], sizes = [32, 256], strides = [1, 1]} : vector<96x256xf32> to vector<32x256xf32>
    %c254_i32_117 = arith.constant 254 : i32
    %249 = tpu.dynamic_rotate %248 by %c254_i32_117 dim 1 : vector<32x256xf32>, i32 -> vector<32x256xf32>
    %cst_118 = arith.constant 0.000000e+00 : f32
    %250 = vector.shape_cast %247 : vector<1x256xi1> to vector<1x256xi1>
    %251 = vector.broadcast %250 : vector<1x256xi1> to vector<32x256xi1>
    %252 = vector.broadcast %cst_118 : f32 to vector<32x256xf32>
    %253 = arith.select %251, %249, %252 : vector<32x256xi1>, vector<32x256xf32>
    %254 = arith.addf %245, %253 : vector<32x256xf32>
    %cst_119 = arith.constant 0.000000e+00 : f32
    %255 = vector.broadcast %cst_119 : f32 to vector<32x256xf32>
    %256 = arith.maximumf %254, %255 : vector<32x256xf32>
    %c1_120 = arith.constant 1 : index
    %c0_121 = arith.constant 0 : index
    %c0_122 = arith.constant 0 : index
    %257 = vector.load %arg15[%c1_120, %c0_121, %c0_122] : memref<6x32x32xbf16, #tpu.memory_space<vmem>>, vector<1x32x32xbf16>
    %258 = vector.shape_cast %257 : vector<1x32x32xbf16> to vector<32x32xbf16>
    %259 = arith.truncf %256 : vector<32x256xf32> to vector<32x256xbf16>
    %cst_123 = arith.constant dense<0.000000e+00> : vector<32x256xf32>
    %260 = tpu.matmul %258, %259, %cst_123 {dimension_numbers = #tpu.dot_dimension_numbers<[1], [0], [0], [1], [0, 0, 1, 1], [], []>} : vector<32x32xbf16>, vector<32x256xbf16>, vector<32x256xf32> -> vector<32x256xf32>
    %c1_124 = arith.constant 1 : index
    %c0_125 = arith.constant 0 : index
    %c0_126 = arith.constant 0 : index
    %261 = vector.load %arg16[%c1_124, %c0_125, %c0_126] : memref<6x32x1xf32, #tpu.memory_space<vmem>>, vector<1x32x1xf32>
    %262 = vector.shape_cast %261 : vector<1x32x1xf32> to vector<32x1xf32>
    %263 = vector.broadcast %262 : vector<32x1xf32> to vector<32x256xf32>
    %264 = arith.addf %260, %263 : vector<32x256xf32>
    %265 = arith.addf %227, %264 : vector<32x256xf32>
    %266 = vector.broadcast %30 : vector<1x256xf32> to vector<32x256xf32>
    %267 = arith.mulf %265, %266 : vector<32x256xf32>
    %c2_127 = arith.constant 2 : index
    %c0_128 = arith.constant 0 : index
    %c0_129 = arith.constant 0 : index
    %268 = vector.load %arg13[%c2_127, %c0_128, %c0_129] : memref<6x96x32xbf16, #tpu.memory_space<vmem>>, vector<1x96x32xbf16>
    %269 = vector.shape_cast %268 : vector<1x96x32xbf16> to vector<96x32xbf16>
    %270 = arith.truncf %267 : vector<32x256xf32> to vector<32x256xbf16>
    %cst_130 = arith.constant dense<0.000000e+00> : vector<96x256xf32>
    %271 = tpu.matmul %269, %270, %cst_130 {dimension_numbers = #tpu.dot_dimension_numbers<[1], [0], [0], [1], [0, 0, 1, 1], [], []>} : vector<96x32xbf16>, vector<32x256xbf16>, vector<96x256xf32> -> vector<96x256xf32>
    %272 = vector.extract_strided_slice %271 {offsets = [32, 0], sizes = [32, 256], strides = [1, 1]} : vector<96x256xf32> to vector<32x256xf32>
    %c2_131 = arith.constant 2 : index
    %c0_132 = arith.constant 0 : index
    %c0_133 = arith.constant 0 : index
    %273 = vector.load %arg14[%c2_131, %c0_132, %c0_133] : memref<6x32x1xf32, #tpu.memory_space<vmem>>, vector<1x32x1xf32>
    %274 = vector.shape_cast %273 : vector<1x32x1xf32> to vector<32x1xf32>
    %275 = vector.broadcast %274 : vector<32x1xf32> to vector<32x256xf32>
    %276 = arith.addf %272, %275 : vector<32x256xf32>
    %c4_i32_134 = arith.constant 4 : i32
    %277 = vector.broadcast %c4_i32_134 : i32 to vector<1x256xi32>
    %278 = arith.cmpi sge, %18, %277 : vector<1x256xi32>
    %279 = vector.extract_strided_slice %271 {offsets = [0, 0], sizes = [32, 256], strides = [1, 1]} : vector<96x256xf32> to vector<32x256xf32>
    %c4_i32_135 = arith.constant 4 : i32
    %280 = tpu.dynamic_rotate %279 by %c4_i32_135 dim 1 : vector<32x256xf32>, i32 -> vector<32x256xf32>
    %cst_136 = arith.constant 0.000000e+00 : f32
    %281 = vector.shape_cast %278 : vector<1x256xi1> to vector<1x256xi1>
    %282 = vector.broadcast %281 : vector<1x256xi1> to vector<32x256xi1>
    %283 = vector.broadcast %cst_136 : f32 to vector<32x256xf32>
    %284 = arith.select %282, %280, %283 : vector<32x256xi1>, vector<32x256xf32>
    %285 = arith.addf %276, %284 : vector<32x256xf32>
    %c124_i32_137 = arith.constant 124 : i32
    %286 = vector.broadcast %c124_i32_137 : i32 to vector<1x256xi32>
    %287 = arith.cmpi slt, %18, %286 : vector<1x256xi32>
    %288 = vector.extract_strided_slice %271 {offsets = [64, 0], sizes = [32, 256], strides = [1, 1]} : vector<96x256xf32> to vector<32x256xf32>
    %c252_i32_138 = arith.constant 252 : i32
    %289 = tpu.dynamic_rotate %288 by %c252_i32_138 dim 1 : vector<32x256xf32>, i32 -> vector<32x256xf32>
    %cst_139 = arith.constant 0.000000e+00 : f32
    %290 = vector.shape_cast %287 : vector<1x256xi1> to vector<1x256xi1>
    %291 = vector.broadcast %290 : vector<1x256xi1> to vector<32x256xi1>
    %292 = vector.broadcast %cst_139 : f32 to vector<32x256xf32>
    %293 = arith.select %291, %289, %292 : vector<32x256xi1>, vector<32x256xf32>
    %294 = arith.addf %285, %293 : vector<32x256xf32>
    %cst_140 = arith.constant 0.000000e+00 : f32
    %295 = vector.broadcast %cst_140 : f32 to vector<32x256xf32>
    %296 = arith.maximumf %294, %295 : vector<32x256xf32>
    %c2_141 = arith.constant 2 : index
    %c0_142 = arith.constant 0 : index
    %c0_143 = arith.constant 0 : index
    %297 = vector.load %arg15[%c2_141, %c0_142, %c0_143] : memref<6x32x32xbf16, #tpu.memory_space<vmem>>, vector<1x32x32xbf16>
    %298 = vector.shape_cast %297 : vector<1x32x32xbf16> to vector<32x32xbf16>
    %299 = arith.truncf %296 : vector<32x256xf32> to vector<32x256xbf16>
    %cst_144 = arith.constant dense<0.000000e+00> : vector<32x256xf32>
    %300 = tpu.matmul %298, %299, %cst_144 {dimension_numbers = #tpu.dot_dimension_numbers<[1], [0], [0], [1], [0, 0, 1, 1], [], []>} : vector<32x32xbf16>, vector<32x256xbf16>, vector<32x256xf32> -> vector<32x256xf32>
    %c2_145 = arith.constant 2 : index
    %c0_146 = arith.constant 0 : index
    %c0_147 = arith.constant 0 : index
    %301 = vector.load %arg16[%c2_145, %c0_146, %c0_147] : memref<6x32x1xf32, #tpu.memory_space<vmem>>, vector<1x32x1xf32>
    %302 = vector.shape_cast %301 : vector<1x32x1xf32> to vector<32x1xf32>
    %303 = vector.broadcast %302 : vector<32x1xf32> to vector<32x256xf32>
    %304 = arith.addf %300, %303 : vector<32x256xf32>
    %305 = arith.addf %267, %304 : vector<32x256xf32>
    %306 = vector.broadcast %30 : vector<1x256xf32> to vector<32x256xf32>
    %307 = arith.mulf %305, %306 : vector<32x256xf32>
    %c0_148 = arith.constant 0 : index
    %c0_149 = arith.constant 0 : index
    %c0_150 = arith.constant 0 : index
    %308 = vector.load %arg17[%c0_148, %c0_149, %c0_150] : memref<2x8x32xbf16, #tpu.memory_space<vmem>>, vector<1x8x32xbf16>
    %309 = vector.shape_cast %308 : vector<1x8x32xbf16> to vector<8x32xbf16>
    %310 = arith.truncf %307 : vector<32x256xf32> to vector<32x256xbf16>
    %cst_151 = arith.constant dense<0.000000e+00> : vector<8x256xf32>
    %311 = tpu.matmul %309, %310, %cst_151 {dimension_numbers = #tpu.dot_dimension_numbers<[1], [0], [0], [1], [0, 0, 1, 1], [], []>} : vector<8x32xbf16>, vector<32x256xbf16>, vector<8x256xf32> -> vector<8x256xf32>
    %c0_152 = arith.constant 0 : index
    %c0_153 = arith.constant 0 : index
    %c0_154 = arith.constant 0 : index
    %312 = vector.load %arg18[%c0_152, %c0_153, %c0_154] : memref<2x8x1xf32, #tpu.memory_space<vmem>>, vector<1x8x1xf32>
    %313 = vector.shape_cast %312 : vector<1x8x1xf32> to vector<8x1xf32>
    %314 = vector.broadcast %313 : vector<8x1xf32> to vector<8x256xf32>
    %315 = arith.addf %311, %314 : vector<8x256xf32>
    %316 = vector.broadcast %30 : vector<1x256xf32> to vector<8x256xf32>
    %317 = arith.mulf %315, %316 : vector<8x256xf32>
    %c1_155 = arith.constant 1 : index
    %c0_156 = arith.constant 0 : index
    %c0_157 = arith.constant 0 : index
    %318 = vector.load %arg19[%c1_155, %c0_156, %c0_157] : memref<3x8x256xf32, #tpu.memory_space<vmem>>, vector<1x8x256xf32>
    %319 = vector.shape_cast %318 : vector<1x8x256xf32> to vector<8x256xf32>
    %320 = vector.shape_cast %317 : vector<8x256xf32> to vector<1x8x256xf32>
    tpu.vector_store %arg19[%c1_155, %c0_156, %c0_157], %320 {strides = array<i32>} : memref<3x8x256xf32, #tpu.memory_space<vmem>>, vector<1x8x256xf32>,
    %cst_158 = arith.constant dense<0xFF800000> : vector<256xf32>
    %321 = vector.multi_reduction <maximumf>, %317, %cst_158 [0] : vector<8x256xf32> to vector<256xf32>
    %322 = vector.shape_cast %321 : vector<256xf32> to vector<1x256xf32>
    %323 = vector.broadcast %322 : vector<1x256xf32> to vector<8x256xf32>
    %324 = arith.subf %317, %323 : vector<8x256xf32>
    %325 = math.exp %324 : vector<8x256xf32>
    %cst_159 = arith.constant dense<0.000000e+00> : vector<256xf32>
    %326 = vector.multi_reduction <add>, %325, %cst_159 [0] : vector<8x256xf32> to vector<256xf32>
    %327 = vector.shape_cast %326 : vector<256xf32> to vector<1x256xf32>
    %328 = tpu.reciprocal %327 {approx = true} : vector<1x256xf32> -> vector<1x256xf32>
    %329 = vector.broadcast %328 : vector<1x256xf32> to vector<8x256xf32>
    %330 = arith.mulf %325, %329 : vector<8x256xf32>
    %331 = vector.broadcast %30 : vector<1x256xf32> to vector<8x256xf32>
    %332 = arith.mulf %330, %331 : vector<8x256xf32>
    %c1_160 = arith.constant 1 : index
    %c0_161 = arith.constant 0 : index
    %c0_162 = arith.constant 0 : index
    %333 = vector.load %arg11[%c1_160, %c0_161, %c0_162] : memref<2x32x8xbf16, #tpu.memory_space<vmem>>, vector<1x32x8xbf16>
    %334 = vector.shape_cast %333 : vector<1x32x8xbf16> to vector<32x8xbf16>
    %335 = arith.truncf %332 : vector<8x256xf32> to vector<8x256xbf16>
    %cst_163 = arith.constant dense<0.000000e+00> : vector<32x256xf32>
    %336 = tpu.matmul %334, %335, %cst_163 {dimension_numbers = #tpu.dot_dimension_numbers<[1], [0], [0], [1], [0, 0, 1, 1], [], []>} : vector<32x8xbf16>, vector<8x256xbf16>, vector<32x256xf32> -> vector<32x256xf32>
    %c1_164 = arith.constant 1 : index
    %c0_165 = arith.constant 0 : index
    %c0_166 = arith.constant 0 : index
    %337 = vector.load %arg12[%c1_164, %c0_165, %c0_166] : memref<2x32x1xf32, #tpu.memory_space<vmem>>, vector<1x32x1xf32>
    %338 = vector.shape_cast %337 : vector<1x32x1xf32> to vector<32x1xf32>
    %339 = vector.broadcast %338 : vector<32x1xf32> to vector<32x256xf32>
    %340 = arith.addf %336, %339 : vector<32x256xf32>
    %c3 = arith.constant 3 : index
    %c0_167 = arith.constant 0 : index
    %c0_168 = arith.constant 0 : index
    %341 = vector.load %arg13[%c3, %c0_167, %c0_168] : memref<6x96x32xbf16, #tpu.memory_space<vmem>>, vector<1x96x32xbf16>
    %342 = vector.shape_cast %341 : vector<1x96x32xbf16> to vector<96x32xbf16>
    %343 = arith.truncf %340 : vector<32x256xf32> to vector<32x256xbf16>
    %cst_169 = arith.constant dense<0.000000e+00> : vector<96x256xf32>
    %344 = tpu.matmul %342, %343, %cst_169 {dimension_numbers = #tpu.dot_dimension_numbers<[1], [0], [0], [1], [0, 0, 1, 1], [], []>} : vector<96x32xbf16>, vector<32x256xbf16>, vector<96x256xf32> -> vector<96x256xf32>
    %345 = vector.extract_strided_slice %344 {offsets = [32, 0], sizes = [32, 256], strides = [1, 1]} : vector<96x256xf32> to vector<32x256xf32>
    %c3_170 = arith.constant 3 : index
    %c0_171 = arith.constant 0 : index
    %c0_172 = arith.constant 0 : index
    %346 = vector.load %arg14[%c3_170, %c0_171, %c0_172] : memref<6x32x1xf32, #tpu.memory_space<vmem>>, vector<1x32x1xf32>
    %347 = vector.shape_cast %346 : vector<1x32x1xf32> to vector<32x1xf32>
    %348 = vector.broadcast %347 : vector<32x1xf32> to vector<32x256xf32>
    %349 = arith.addf %345, %348 : vector<32x256xf32>
    %c1_i32_173 = arith.constant 1 : i32
    %350 = vector.broadcast %c1_i32_173 : i32 to vector<1x256xi32>
    %351 = arith.cmpi sge, %18, %350 : vector<1x256xi32>
    %352 = vector.extract_strided_slice %344 {offsets = [0, 0], sizes = [32, 256], strides = [1, 1]} : vector<96x256xf32> to vector<32x256xf32>
    %c1_i32_174 = arith.constant 1 : i32
    %353 = tpu.dynamic_rotate %352 by %c1_i32_174 dim 1 : vector<32x256xf32>, i32 -> vector<32x256xf32>
    %cst_175 = arith.constant 0.000000e+00 : f32
    %354 = vector.shape_cast %351 : vector<1x256xi1> to vector<1x256xi1>
    %355 = vector.broadcast %354 : vector<1x256xi1> to vector<32x256xi1>
    %356 = vector.broadcast %cst_175 : f32 to vector<32x256xf32>
    %357 = arith.select %355, %353, %356 : vector<32x256xi1>, vector<32x256xf32>
    %358 = arith.addf %349, %357 : vector<32x256xf32>
    %c127_i32_176 = arith.constant 127 : i32
    %359 = vector.broadcast %c127_i32_176 : i32 to vector<1x256xi32>
    %360 = arith.cmpi slt, %18, %359 : vector<1x256xi32>
    %361 = vector.extract_strided_slice %344 {offsets = [64, 0], sizes = [32, 256], strides = [1, 1]} : vector<96x256xf32> to vector<32x256xf32>
    %c255_i32_177 = arith.constant 255 : i32
    %362 = tpu.dynamic_rotate %361 by %c255_i32_177 dim 1 : vector<32x256xf32>, i32 -> vector<32x256xf32>
    %cst_178 = arith.constant 0.000000e+00 : f32
    %363 = vector.shape_cast %360 : vector<1x256xi1> to vector<1x256xi1>
    %364 = vector.broadcast %363 : vector<1x256xi1> to vector<32x256xi1>
    %365 = vector.broadcast %cst_178 : f32 to vector<32x256xf32>
    %366 = arith.select %364, %362, %365 : vector<32x256xi1>, vector<32x256xf32>
    %367 = arith.addf %358, %366 : vector<32x256xf32>
    %cst_179 = arith.constant 0.000000e+00 : f32
    %368 = vector.broadcast %cst_179 : f32 to vector<32x256xf32>
    %369 = arith.maximumf %367, %368 : vector<32x256xf32>
    %c3_180 = arith.constant 3 : index
    %c0_181 = arith.constant 0 : index
    %c0_182 = arith.constant 0 : index
    %370 = vector.load %arg15[%c3_180, %c0_181, %c0_182] : memref<6x32x32xbf16, #tpu.memory_space<vmem>>, vector<1x32x32xbf16>
    %371 = vector.shape_cast %370 : vector<1x32x32xbf16> to vector<32x32xbf16>
    %372 = arith.truncf %369 : vector<32x256xf32> to vector<32x256xbf16>
    %cst_183 = arith.constant dense<0.000000e+00> : vector<32x256xf32>
    %373 = tpu.matmul %371, %372, %cst_183 {dimension_numbers = #tpu.dot_dimension_numbers<[1], [0], [0], [1], [0, 0, 1, 1], [], []>} : vector<32x32xbf16>, vector<32x256xbf16>, vector<32x256xf32> -> vector<32x256xf32>
    %c3_184 = arith.constant 3 : index
    %c0_185 = arith.constant 0 : index
    %c0_186 = arith.constant 0 : index
    %374 = vector.load %arg16[%c3_184, %c0_185, %c0_186] : memref<6x32x1xf32, #tpu.memory_space<vmem>>, vector<1x32x1xf32>
    %375 = vector.shape_cast %374 : vector<1x32x1xf32> to vector<32x1xf32>
    %376 = vector.broadcast %375 : vector<32x1xf32> to vector<32x256xf32>
    %377 = arith.addf %373, %376 : vector<32x256xf32>
    %378 = arith.addf %340, %377 : vector<32x256xf32>
    %379 = vector.broadcast %30 : vector<1x256xf32> to vector<32x256xf32>
    %380 = arith.mulf %378, %379 : vector<32x256xf32>
    %c4 = arith.constant 4 : index
    %c0_187 = arith.constant 0 : index
    %c0_188 = arith.constant 0 : index
    %381 = vector.load %arg13[%c4, %c0_187, %c0_188] : memref<6x96x32xbf16, #tpu.memory_space<vmem>>, vector<1x96x32xbf16>
    %382 = vector.shape_cast %381 : vector<1x96x32xbf16> to vector<96x32xbf16>
    %383 = arith.truncf %380 : vector<32x256xf32> to vector<32x256xbf16>
    %cst_189 = arith.constant dense<0.000000e+00> : vector<96x256xf32>
    %384 = tpu.matmul %382, %383, %cst_189 {dimension_numbers = #tpu.dot_dimension_numbers<[1], [0], [0], [1], [0, 0, 1, 1], [], []>} : vector<96x32xbf16>, vector<32x256xbf16>, vector<96x256xf32> -> vector<96x256xf32>
    %385 = vector.extract_strided_slice %384 {offsets = [32, 0], sizes = [32, 256], strides = [1, 1]} : vector<96x256xf32> to vector<32x256xf32>
    %c4_190 = arith.constant 4 : index
    %c0_191 = arith.constant 0 : index
    %c0_192 = arith.constant 0 : index
    %386 = vector.load %arg14[%c4_190, %c0_191, %c0_192] : memref<6x32x1xf32, #tpu.memory_space<vmem>>, vector<1x32x1xf32>
    %387 = vector.shape_cast %386 : vector<1x32x1xf32> to vector<32x1xf32>
    %388 = vector.broadcast %387 : vector<32x1xf32> to vector<32x256xf32>
    %389 = arith.addf %385, %388 : vector<32x256xf32>
    %c2_i32_193 = arith.constant 2 : i32
    %390 = vector.broadcast %c2_i32_193 : i32 to vector<1x256xi32>
    %391 = arith.cmpi sge, %18, %390 : vector<1x256xi32>
    %392 = vector.extract_strided_slice %384 {offsets = [0, 0], sizes = [32, 256], strides = [1, 1]} : vector<96x256xf32> to vector<32x256xf32>
    %c2_i32_194 = arith.constant 2 : i32
    %393 = tpu.dynamic_rotate %392 by %c2_i32_194 dim 1 : vector<32x256xf32>, i32 -> vector<32x256xf32>
    %cst_195 = arith.constant 0.000000e+00 : f32
    %394 = vector.shape_cast %391 : vector<1x256xi1> to vector<1x256xi1>
    %395 = vector.broadcast %394 : vector<1x256xi1> to vector<32x256xi1>
    %396 = vector.broadcast %cst_195 : f32 to vector<32x256xf32>
    %397 = arith.select %395, %393, %396 : vector<32x256xi1>, vector<32x256xf32>
    %398 = arith.addf %389, %397 : vector<32x256xf32>
    %c126_i32_196 = arith.constant 126 : i32
    %399 = vector.broadcast %c126_i32_196 : i32 to vector<1x256xi32>
    %400 = arith.cmpi slt, %18, %399 : vector<1x256xi32>
    %401 = vector.extract_strided_slice %384 {offsets = [64, 0], sizes = [32, 256], strides = [1, 1]} : vector<96x256xf32> to vector<32x256xf32>
    %c254_i32_197 = arith.constant 254 : i32
    %402 = tpu.dynamic_rotate %401 by %c254_i32_197 dim 1 : vector<32x256xf32>, i32 -> vector<32x256xf32>
    %cst_198 = arith.constant 0.000000e+00 : f32
    %403 = vector.shape_cast %400 : vector<1x256xi1> to vector<1x256xi1>
    %404 = vector.broadcast %403 : vector<1x256xi1> to vector<32x256xi1>
    %405 = vector.broadcast %cst_198 : f32 to vector<32x256xf32>
    %406 = arith.select %404, %402, %405 : vector<32x256xi1>, vector<32x256xf32>
    %407 = arith.addf %398, %406 : vector<32x256xf32>
    %cst_199 = arith.constant 0.000000e+00 : f32
    %408 = vector.broadcast %cst_199 : f32 to vector<32x256xf32>
    %409 = arith.maximumf %407, %408 : vector<32x256xf32>
    %c4_200 = arith.constant 4 : index
    %c0_201 = arith.constant 0 : index
    %c0_202 = arith.constant 0 : index
    %410 = vector.load %arg15[%c4_200, %c0_201, %c0_202] : memref<6x32x32xbf16, #tpu.memory_space<vmem>>, vector<1x32x32xbf16>
    %411 = vector.shape_cast %410 : vector<1x32x32xbf16> to vector<32x32xbf16>
    %412 = arith.truncf %409 : vector<32x256xf32> to vector<32x256xbf16>
    %cst_203 = arith.constant dense<0.000000e+00> : vector<32x256xf32>
    %413 = tpu.matmul %411, %412, %cst_203 {dimension_numbers = #tpu.dot_dimension_numbers<[1], [0], [0], [1], [0, 0, 1, 1], [], []>} : vector<32x32xbf16>, vector<32x256xbf16>, vector<32x256xf32> -> vector<32x256xf32>
    %c4_204 = arith.constant 4 : index
    %c0_205 = arith.constant 0 : index
    %c0_206 = arith.constant 0 : index
    %414 = vector.load %arg16[%c4_204, %c0_205, %c0_206] : memref<6x32x1xf32, #tpu.memory_space<vmem>>, vector<1x32x1xf32>
    %415 = vector.shape_cast %414 : vector<1x32x1xf32> to vector<32x1xf32>
    %416 = vector.broadcast %415 : vector<32x1xf32> to vector<32x256xf32>
    %417 = arith.addf %413, %416 : vector<32x256xf32>
    %418 = arith.addf %380, %417 : vector<32x256xf32>
    %419 = vector.broadcast %30 : vector<1x256xf32> to vector<32x256xf32>
    %420 = arith.mulf %418, %419 : vector<32x256xf32>
    %c5 = arith.constant 5 : index
    %c0_207 = arith.constant 0 : index
    %c0_208 = arith.constant 0 : index
    %421 = vector.load %arg13[%c5, %c0_207, %c0_208] : memref<6x96x32xbf16, #tpu.memory_space<vmem>>, vector<1x96x32xbf16>
    %422 = vector.shape_cast %421 : vector<1x96x32xbf16> to vector<96x32xbf16>
    %423 = arith.truncf %420 : vector<32x256xf32> to vector<32x256xbf16>
    %cst_209 = arith.constant dense<0.000000e+00> : vector<96x256xf32>
    %424 = tpu.matmul %422, %423, %cst_209 {dimension_numbers = #tpu.dot_dimension_numbers<[1], [0], [0], [1], [0, 0, 1, 1], [], []>} : vector<96x32xbf16>, vector<32x256xbf16>, vector<96x256xf32> -> vector<96x256xf32>
    %425 = vector.extract_strided_slice %424 {offsets = [32, 0], sizes = [32, 256], strides = [1, 1]} : vector<96x256xf32> to vector<32x256xf32>
    %c5_210 = arith.constant 5 : index
    %c0_211 = arith.constant 0 : index
    %c0_212 = arith.constant 0 : index
    %426 = vector.load %arg14[%c5_210, %c0_211, %c0_212] : memref<6x32x1xf32, #tpu.memory_space<vmem>>, vector<1x32x1xf32>
    %427 = vector.shape_cast %426 : vector<1x32x1xf32> to vector<32x1xf32>
    %428 = vector.broadcast %427 : vector<32x1xf32> to vector<32x256xf32>
    %429 = arith.addf %425, %428 : vector<32x256xf32>
    %c4_i32_213 = arith.constant 4 : i32
    %430 = vector.broadcast %c4_i32_213 : i32 to vector<1x256xi32>
    %431 = arith.cmpi sge, %18, %430 : vector<1x256xi32>
    %432 = vector.extract_strided_slice %424 {offsets = [0, 0], sizes = [32, 256], strides = [1, 1]} : vector<96x256xf32> to vector<32x256xf32>
    %c4_i32_214 = arith.constant 4 : i32
    %433 = tpu.dynamic_rotate %432 by %c4_i32_214 dim 1 : vector<32x256xf32>, i32 -> vector<32x256xf32>
    %cst_215 = arith.constant 0.000000e+00 : f32
    %434 = vector.shape_cast %431 : vector<1x256xi1> to vector<1x256xi1>
    %435 = vector.broadcast %434 : vector<1x256xi1> to vector<32x256xi1>
    %436 = vector.broadcast %cst_215 : f32 to vector<32x256xf32>
    %437 = arith.select %435, %433, %436 : vector<32x256xi1>, vector<32x256xf32>
    %438 = arith.addf %429, %437 : vector<32x256xf32>
    %c124_i32_216 = arith.constant 124 : i32
    %439 = vector.broadcast %c124_i32_216 : i32 to vector<1x256xi32>
    %440 = arith.cmpi slt, %18, %439 : vector<1x256xi32>
    %441 = vector.extract_strided_slice %424 {offsets = [64, 0], sizes = [32, 256], strides = [1, 1]} : vector<96x256xf32> to vector<32x256xf32>
    %c252_i32_217 = arith.constant 252 : i32
    %442 = tpu.dynamic_rotate %441 by %c252_i32_217 dim 1 : vector<32x256xf32>, i32 -> vector<32x256xf32>
    %cst_218 = arith.constant 0.000000e+00 : f32
    %443 = vector.shape_cast %440 : vector<1x256xi1> to vector<1x256xi1>
    %444 = vector.broadcast %443 : vector<1x256xi1> to vector<32x256xi1>
    %445 = vector.broadcast %cst_218 : f32 to vector<32x256xf32>
    %446 = arith.select %444, %442, %445 : vector<32x256xi1>, vector<32x256xf32>
    %447 = arith.addf %438, %446 : vector<32x256xf32>
    %cst_219 = arith.constant 0.000000e+00 : f32
    %448 = vector.broadcast %cst_219 : f32 to vector<32x256xf32>
    %449 = arith.maximumf %447, %448 : vector<32x256xf32>
    %c5_220 = arith.constant 5 : index
    %c0_221 = arith.constant 0 : index
    %c0_222 = arith.constant 0 : index
    %450 = vector.load %arg15[%c5_220, %c0_221, %c0_222] : memref<6x32x32xbf16, #tpu.memory_space<vmem>>, vector<1x32x32xbf16>
    %451 = vector.shape_cast %450 : vector<1x32x32xbf16> to vector<32x32xbf16>
    %452 = arith.truncf %449 : vector<32x256xf32> to vector<32x256xbf16>
    %cst_223 = arith.constant dense<0.000000e+00> : vector<32x256xf32>
    %453 = tpu.matmul %451, %452, %cst_223 {dimension_numbers = #tpu.dot_dimension_numbers<[1], [0], [0], [1], [0, 0, 1, 1], [], []>} : vector<32x32xbf16>, vector<32x256xbf16>, vector<32x256xf32> -> vector<32x256xf32>
    %c5_224 = arith.constant 5 : index
    %c0_225 = arith.constant 0 : index
    %c0_226 = arith.constant 0 : index
    %454 = vector.load %arg16[%c5_224, %c0_225, %c0_226] : memref<6x32x1xf32, #tpu.memory_space<vmem>>, vector<1x32x1xf32>
    %455 = vector.shape_cast %454 : vector<1x32x1xf32> to vector<32x1xf32>
    %456 = vector.broadcast %455 : vector<32x1xf32> to vector<32x256xf32>
    %457 = arith.addf %453, %456 : vector<32x256xf32>
    %458 = arith.addf %420, %457 : vector<32x256xf32>
    %459 = vector.broadcast %30 : vector<1x256xf32> to vector<32x256xf32>
    %460 = arith.mulf %458, %459 : vector<32x256xf32>
    %c1_227 = arith.constant 1 : index
    %c0_228 = arith.constant 0 : index
    %c0_229 = arith.constant 0 : index
    %461 = vector.load %arg17[%c1_227, %c0_228, %c0_229] : memref<2x8x32xbf16, #tpu.memory_space<vmem>>, vector<1x8x32xbf16>
    %462 = vector.shape_cast %461 : vector<1x8x32xbf16> to vector<8x32xbf16>
    %463 = arith.truncf %460 : vector<32x256xf32> to vector<32x256xbf16>
    %cst_230 = arith.constant dense<0.000000e+00> : vector<8x256xf32>
    %464 = tpu.matmul %462, %463, %cst_230 {dimension_numbers = #tpu.dot_dimension_numbers<[1], [0], [0], [1], [0, 0, 1, 1], [], []>} : vector<8x32xbf16>, vector<32x256xbf16>, vector<8x256xf32> -> vector<8x256xf32>
    %c1_231 = arith.constant 1 : index
    %c0_232 = arith.constant 0 : index
    %c0_233 = arith.constant 0 : index
    %465 = vector.load %arg18[%c1_231, %c0_232, %c0_233] : memref<2x8x1xf32, #tpu.memory_space<vmem>>, vector<1x8x1xf32>
    %466 = vector.shape_cast %465 : vector<1x8x1xf32> to vector<8x1xf32>
    %467 = vector.broadcast %466 : vector<8x1xf32> to vector<8x256xf32>
    %468 = arith.addf %464, %467 : vector<8x256xf32>
    %469 = vector.broadcast %30 : vector<1x256xf32> to vector<8x256xf32>
    %470 = arith.mulf %468, %469 : vector<8x256xf32>
    %c2_234 = arith.constant 2 : index
    %c0_235 = arith.constant 0 : index
    %c0_236 = arith.constant 0 : index
    %471 = vector.load %arg19[%c2_234, %c0_235, %c0_236] : memref<3x8x256xf32, #tpu.memory_space<vmem>>, vector<1x8x256xf32>
    %472 = vector.shape_cast %471 : vector<1x8x256xf32> to vector<8x256xf32>
    %473 = vector.shape_cast %470 : vector<8x256xf32> to vector<1x8x256xf32>
    tpu.vector_store %arg19[%c2_234, %c0_235, %c0_236], %473 {strides = array<i32>} : memref<3x8x256xf32, #tpu.memory_space<vmem>>, vector<1x8x256xf32>,
    return
  }
  func.func @transform_0(%arg0: i32, %arg1: memref<4xi32, #tpu.memory_space<smem>>) -> (i32, i32) {
    %c0_i32 = arith.constant 0 : i32
    %c0_i32_0 = arith.constant 0 : i32
    return %c0_i32, %arg0 : i32, i32
  }
  func.func @transform_1(%arg0: i32, %arg1: memref<4xi32, #tpu.memory_space<smem>>) -> (i32, i32) {
    %c0_i32 = arith.constant 0 : i32
    %c0_i32_0 = arith.constant 0 : i32
    %c0_i32_1 = arith.constant 0 : i32
    return %c0_i32, %c0_i32_0 : i32, i32
  }
  func.func @transform_2(%arg0: i32, %arg1: memref<4xi32, #tpu.memory_space<smem>>) -> (i32, i32) {
    %c0_i32 = arith.constant 0 : i32
    %c0_i32_0 = arith.constant 0 : i32
    %c0_i32_1 = arith.constant 0 : i32
    return %c0_i32, %c0_i32_0 : i32, i32
  }
  func.func @transform_3(%arg0: i32, %arg1: memref<4xi32, #tpu.memory_space<smem>>) -> (i32, i32, i32) {
    %c0_i32 = arith.constant 0 : i32
    %c0_i32_0 = arith.constant 0 : i32
    %c0_i32_1 = arith.constant 0 : i32
    %c0_i32_2 = arith.constant 0 : i32
    return %c0_i32, %c0_i32_0, %c0_i32_1 : i32, i32, i32
  }
  func.func @transform_4(%arg0: i32, %arg1: memref<4xi32, #tpu.memory_space<smem>>) -> (i32, i32, i32) {
    %c0_i32 = arith.constant 0 : i32
    %c0_i32_0 = arith.constant 0 : i32
    %c0_i32_1 = arith.constant 0 : i32
    %c0_i32_2 = arith.constant 0 : i32
    return %c0_i32, %c0_i32_0, %c0_i32_1 : i32, i32, i32
  }
  func.func @transform_5(%arg0: i32, %arg1: memref<4xi32, #tpu.memory_space<smem>>) -> (i32, i32, i32) {
    %c0_i32 = arith.constant 0 : i32
    %c0_i32_0 = arith.constant 0 : i32
    %c0_i32_1 = arith.constant 0 : i32
    %c0_i32_2 = arith.constant 0 : i32
    return %c0_i32, %c0_i32_0, %c0_i32_1 : i32, i32, i32
  }
  func.func @transform_6(%arg0: i32, %arg1: memref<4xi32, #tpu.memory_space<smem>>) -> (i32, i32, i32) {
    %c0_i32 = arith.constant 0 : i32
    %c0_i32_0 = arith.constant 0 : i32
    %c0_i32_1 = arith.constant 0 : i32
    %c0_i32_2 = arith.constant 0 : i32
    return %c0_i32, %c0_i32_0, %c0_i32_1 : i32, i32, i32
  }
  func.func @transform_7(%arg0: i32, %arg1: memref<4xi32, #tpu.memory_space<smem>>) -> (i32, i32) {
    %c0_i32 = arith.constant 0 : i32
    %c0_i32_0 = arith.constant 0 : i32
    %c0_i32_1 = arith.constant 0 : i32
    return %c0_i32, %c0_i32_0 : i32, i32
  }
  func.func @transform_8(%arg0: i32, %arg1: memref<4xi32, #tpu.memory_space<smem>>) -> (i32, i32) {
    %c0_i32 = arith.constant 0 : i32
    %c0_i32_0 = arith.constant 0 : i32
    %c0_i32_1 = arith.constant 0 : i32
    return %c0_i32, %c0_i32_0 : i32, i32
  }
  func.func @transform_9(%arg0: i32, %arg1: memref<4xi32, #tpu.memory_space<smem>>) -> (i32, i32, i32) {
    %c0_i32 = arith.constant 0 : i32
    %c0_i32_0 = arith.constant 0 : i32
    %c0_i32_1 = arith.constant 0 : i32
    %c0_i32_2 = arith.constant 0 : i32
    return %c0_i32, %c0_i32_0, %c0_i32_1 : i32, i32, i32
  }
  func.func @transform_10(%arg0: i32, %arg1: memref<4xi32, #tpu.memory_space<smem>>) -> (i32, i32, i32) {
    %c0_i32 = arith.constant 0 : i32
    %c0_i32_0 = arith.constant 0 : i32
    %c0_i32_1 = arith.constant 0 : i32
    %c0_i32_2 = arith.constant 0 : i32
    return %c0_i32, %c0_i32_0, %c0_i32_1 : i32, i32, i32
  }
  func.func @transform_11(%arg0: i32, %arg1: memref<4xi32, #tpu.memory_space<smem>>) -> (i32, i32, i32) {
    %c0_i32 = arith.constant 0 : i32
    %c0_i32_0 = arith.constant 0 : i32
    %c0_i32_1 = arith.constant 0 : i32
    %c0_i32_2 = arith.constant 0 : i32
    return %c0_i32, %c0_i32_0, %c0_i32_1 : i32, i32, i32
  }
  func.func @transform_12(%arg0: i32, %arg1: memref<4xi32, #tpu.memory_space<smem>>) -> (i32, i32, i32) {
    %c0_i32 = arith.constant 0 : i32
    %c0_i32_0 = arith.constant 0 : i32
    %c0_i32_1 = arith.constant 0 : i32
    %c0_i32_2 = arith.constant 0 : i32
    return %c0_i32, %c0_i32_0, %c0_i32_1 : i32, i32, i32
  }
  func.func @transform_13(%arg0: i32, %arg1: memref<4xi32, #tpu.memory_space<smem>>) -> (i32, i32, i32) {
    %c0_i32 = arith.constant 0 : i32
    %c0_i32_0 = arith.constant 0 : i32
    %c0_i32_1 = arith.constant 0 : i32
    %c0_i32_2 = arith.constant 0 : i32
    return %c0_i32, %c0_i32_0, %c0_i32_1 : i32, i32, i32
  }
  func.func @transform_14(%arg0: i32, %arg1: memref<4xi32, #tpu.memory_space<smem>>) -> (i32, i32, i32) {
    %c0_i32 = arith.constant 0 : i32
    %c0_i32_0 = arith.constant 0 : i32
    %c0_i32_1 = arith.constant 0 : i32
    %c0_i32_2 = arith.constant 0 : i32
    return %c0_i32, %c0_i32_0, %c0_i32_1 : i32, i32, i32
  }
  func.func @transform_15(%arg0: i32, %arg1: memref<4xi32, #tpu.memory_space<smem>>) -> (i32, i32, i32) {
    %c0_i32 = arith.constant 0 : i32
    %c0_i32_0 = arith.constant 0 : i32
    %c0_i32_1 = arith.constant 0 : i32
    %c0_i32_2 = arith.constant 0 : i32
    return %c0_i32, %c0_i32_0, %c0_i32_1 : i32, i32, i32
  }
  func.func @transform_16(%arg0: i32, %arg1: memref<4xi32, #tpu.memory_space<smem>>) -> (i32, i32, i32) {
    %c0_i32 = arith.constant 0 : i32
    %c0_i32_0 = arith.constant 0 : i32
    %c0_i32_1 = arith.constant 0 : i32
    %c0_i32_2 = arith.constant 0 : i32
    return %c0_i32, %c0_i32_0, %c0_i32_1 : i32, i32, i32
  }
  func.func @transform_17(%arg0: i32, %arg1: memref<4xi32, #tpu.memory_space<smem>>) -> (i32, i32, i32) {
    %c0_i32 = arith.constant 0 : i32
    %c0_i32_0 = arith.constant 0 : i32
    %c0_i32_1 = arith.constant 0 : i32
    return %c0_i32, %c0_i32_0, %arg0 : i32, i32, i32
  }
}

</mosaic_0001>

<bundles_post_ra>
// kernel: multi_stage_forward.1
= control target key start
LH: loop header
LB: loop body
LE: loop exit
PB: predicated region body
PF: predicated region fallthrough
CT: control target
= control target key end

     0   :  { %s7592_s0 = inlined_call_operand.vmem [shape: s32[4], index: 0, kind: input, shape index: {}]   ;;  %s7593_s1 = inlined_call_operand.vmem [shape: bf16[16,512], index: 1, kind: input, shape index: {}]   ;;  %s7594_s2 = inlined_call_operand.vmem [shape: bf16[32,16], index: 2, kind: input, shape index: {}]   ;;  %s7595_s3 = inlined_call_operand.vmem [shape: f32[32,1], index: 3, kind: input, shape index: {}]   ;;  %s7596_s4 = inlined_call_operand.vmem [shape: bf16[3,96,32], index: 4, kind: input, shape index: {}]   ;;  %s7597_s5 = inlined_call_operand.vmem [shape: f32[3,32,1], index: 5, kind: input, shape index: {}]   ;;  %s7598_s6 = inlined_call_operand.vmem [shape: bf16[3,32,32], index: 6, kind: input, shape index: {}]   ;;  %s7599_s7 = inlined_call_operand.vmem [shape: f32[3,32,1], index: 7, kind: input, shape index: {}]   ;;  %s7600_s8 = inlined_call_operand.vmem [shape: bf16[8,32], index: 8, kind: input, shape index: {}]   ;;  %s7601_s9 = inlined_call_operand.vmem [shape: f32[8,1], index: 9, kind: input, shape index: {}]   ;;  %s7602_s10 = inlined_call_operand.vmem [shape: bf16[2,32,8], index: 10, kind: input, shape index: {}]   ;;  %s7603_s11 = inlined_call_operand.vmem [shape: f32[2,32,1], index: 11, kind: input, shape index: {}]   ;;  %s7604_s12 = inlined_call_operand.vmem [shape: bf16[6,96,32], index: 12, kind: input, shape index: {}]   ;;  %s7605_s13 = inlined_call_operand.vmem [shape: f32[6,32,1], index: 13, kind: input, shape index: {}]   ;;  %s7606_s14 = inlined_call_operand.vmem [shape: bf16[6,32,32], index: 14, kind: input, shape index: {}]   ;;  %s7607_s15 = inlined_call_operand.vmem [shape: f32[6,32,1], index: 15, kind: input, shape index: {}]   ;;  %s7608_s16 = inlined_call_operand.vmem [shape: bf16[2,8,32], index: 16, kind: input, shape index: {}]   ;;  %s7609_s17 = inlined_call_operand.vmem [shape: f32[2,8,1], index: 17, kind: input, shape index: {}]   ;;  %s7610_s18 = inlined_call_operand.hbm [shape: f32[3,8,512], index: 18, kind: output, shape index: {}]  }
   0x1   :  { %7631 = sst [smem:[#allocation14_spill]] %s7592_s0 }
   0x2   :  { %7632 = sst [smem:[#allocation15_spill]] %s7593_s1 }
   0x3   :  { %7633 = sst [smem:[#allocation16_spill]] %s7594_s2 }
   0x4   :  { %7634 = sst [smem:[#allocation17_spill]] %s7595_s3 }
   0x5   :  { %7635 = sst [smem:[#allocation18_spill]] %s7596_s4 }
   0x6   :  { %7636 = sst [smem:[#allocation19_spill]] %s7597_s5 }
   0x7   :  { %7637 = sst [smem:[#allocation20_spill]] %s7598_s6 }
   0x8   :  { %7638 = sst [smem:[#allocation21_spill]] %s7599_s7 }
   0x9   :  { %7639 = sst [smem:[#allocation22_spill]] %s7600_s8 }
   0xa   :  { %7640 = sst [smem:[#allocation23_spill]] %s7601_s9 }
   0xb   :  { %7641 = sst [smem:[#allocation24_spill]] %s7604_s12 }
   0xc   :  { %s7642_s29 = sld [smem:[#allocation14_spill]] }
  0x12   :  { %s23_s12 = sshll.u32 %s7642_s29, 4  ;;  %s24_s12 = int_to_ptr.vmem [resolvable:$true] %s23_s12 }
  0x13   :  { %s5414_s30 = scalar_lea.vmem %s24_s12, 16  ;;  %p5419_p1 = scmp.lt.s32.totalorder %s24_s12, %s24_s12 }
  0x14   :  { %p5415_p0 = scmp.ne.s32.totalorder %s24_s12, %s5414_s30  ;;  %p5420_p2 = scmp.lt.s32.totalorder %s5414_s30, %s5414_s30 }
  0x16   :  { %p5421_p3 = por %p5420_p2, %p5419_p1 }
  0x18   :  { %p5422_p4 = pnand %p5421_p3, %p5415_p0 }
  0x1a   :  { %5425 = shalt.err (!%p5422_p4)  }
  0x1b   :  { %s5490_s0 = smov [#allocation3]  }
  0x1c   :  { %26 = dma.vmem_to_smem %s24_s12, 16, %s5490_s0, [#allocation2] }
  0x1d   :  { %5468 = dma.done.wait [#allocation2], 16 }
  0x1e   :  { %5469 = vsyncadd [#allocation2], 4294967280 }
  0x1f   :  { %28 = sfence }
  0x20   :  { %29 = vsyncpa [#allocation6], 0 }
  0x21   :  { %31 = vsyncpa [#allocation6 + $0x1], 0  ;;  %s5601_s19 = smov 0   ;;  %s5603_s1 = smov 0  }
  0x22   :  { %s5605_s20 = smov 0   ;;  %s5607_s21 = smov 0  }
  0x23 LB: > { %7643 = sst [smem:[#allocation9_spill]] %s5480_s1  ;;  %s5622_s12 = sadd.s32 4294967295, %s5488_s21   ;;  %s5488_s21 = sphi %s5607_s21, %s7667_s21   ;;  %s5484_s20 = sphi %s5605_s20, %s7670_s20   ;;  %s5480_s1 = sphi %s5603_s1, %s7669_s1   ;;  %s5476_s19 = sphi %s5601_s19, %s7668_s19  }
  0x24   : > { %7644 = sst [smem:[#allocation10_spill]] %s5484_s20  ;;  %s4902_s22 = sadd.s32 4294967294, %s5488_s21  }
  0x25   : > { %7645 = sst [smem:[#allocation11_spill]] %s5488_s21  ;;  %s5626_s2 = sadd.s32 1, %s5488_s21  }
  0x26   : > { %7646 = sst [smem:[#allocation12_spill]] %s5626_s2  ;;  %s44_s23 = sadd.s32 1, %s5484_s20 }
  0x27   : > { %s41_s24 = ssub.s32 %s5488_s21, %s5626_s2  ;;  %p51_p5 = scmp.ne.s32.totalorder %s5484_s20, %s5480_s1 }
  0x28   : > { %p42_p6 = scmp.eq.s32.totalorder %s41_s24, 0  ;;  %p52_p7 = scmp.eq.s32.totalorder %s5488_s21, 0 }
  0x29   : > { %p417_p8 = scmp.eq.s32.totalorder %s5622_s12, 1  ;;  %p422_p9 = scmp.ne.s32.totalorder %s5480_s1, %s5476_s19 }
  0x2a   : > { %s5638_s25 = scalar_select %p42_p6, %s5484_s20, %s44_s23  }
  0x2b   : > { %p53_p10 = por %p52_p7, %p51_p5  ;;  %p5640_p11 = por %p417_p8, %p51_p5 }
  0x2c   : > { %7647 = sst [smem:[#allocation13_spill]] %s5638_s25  ;;  %p423_p12 = scmp.eq.s32.totalorder %s4902_s22, 1 }
  0x2d   : > { %p4904_p0 = scmp.ge.s32.totalorder %s5488_s21, 2 }
  0x2e   : > { %p5644_p13 = por %p423_p12, %p422_p9 }
  0x2f   : > { %487 = sbr.rel (%p4904_p0) target bundleno = 63 (0x3f), region = 80 }
  0x34   : > { %490 = sbr.rel (!%p53_p10) target bundleno = 63 (0x3f), region = 84  ;;  %s492_s28 = sand.u32 (%p53_p10), 1, %s5484_s20  }
  0x35   : > { %s5261_s29 = sshll.u32 (%p53_p10), %s5488_s21, 3  ;;  %s4905_s30 = sshll.u32 (%p53_p10), %s492_s28, 4 }
  0x36   : > { %s7650_s24 = sld [smem:[#allocation15_spill]] (%p53_p10)  ;;  %s494_s22 = scalar_lea.vmem (%p53_p10), [#allocation4], %s4905_s30 }
  0x3c   : > { %s497_s25 = scalar_lea.vmem %s7650_s24, %s5261_s29 }
  0x3d   : > { %v528_v0 = vld [vmem:[%s497_s25] sm:$0xff]  ;;  %v530_v1 = vld [vmem:[%s497_s25 + $0x10] sm:$0xff] }
  0x3e   : > { %529 = vst [vmem:[%s494_s22] sm:$0xff] %v528_v0  ;;  %531 = vst [vmem:[%s494_s22 + $0x8] sm:$0xff] %v530_v1 }
  0x3f PF: > { %p4908_p1 = scmp.ge.s32.totalorder %s5488_s21, 1  ;;  %p536_p2 = scmp.lt.s32.totalorder %s5488_s21, 3 }
  0x41   : > { %p537_p3 = pnand %p4908_p1, %p536_p2 }
  0x42   : > { %s5659_s20 = sand.u32 (!%p537_p3), 1, %s5480_s1   ;;  %s7651_s3 = sld [smem:[#allocation17_spill]] (!%p537_p3) }
  0x43   : > { %540 = sbr.rel (%p537_p3) target bundleno = 6835 (0x1ab3), region = 122  ;;  %s4909_s28 = sshll.u32 (!%p537_p3), %s5659_s20, 4 }
  0x44   : > { %s545_s30 = scalar_lea.vmem (!%p537_p3), [#allocation4], %s4909_s28  ;;  %s7652_s29 = sld [smem:[#allocation16_spill]] (!%p537_p3) }
  0x45   : > { %s7653_s5 = sld [smem:[#allocation19_spill]] (!%p537_p3)  ;;  %s7618_s0 = smov (!%p537_p3), 1  }
  0x46   : > { %s7654_s4 = sld [smem:[#allocation18_spill]] (!%p537_p3)  ;;  %s7620_s23 = smov (!%p537_p3), 127  }
  0x47   : > { %s7655_s7 = sld [smem:[#allocation21_spill]] (!%p537_p3)  ;;  %s4910_s1 = sshll.u32 (!%p537_p3), %s5622_s12, 1 }
  0x48   : > { %v5491_v2 = vmov 0   ;;  %v634_v3 = vld [vmem:[%s7651_s3 + $0x10] sm:$0xff]  ;;  %v632_v6 = vld [vmem:[%s7651_s3] sm:$0xff]  ;;  %v635_v7 = vld [vmem:[%s7651_s3 + $0x18] sm:$0xff]  ;;  %vm676_vm0 = vcmask 130048   ;;  %vm782_vm1 = vcmask 261120  }
  0x49   : > { %715 = vmatprep.mubr.bf16.mxu1 %v5491_v2  ;;  %5315 = vset.pattern.permute.xlu0 %v5491_v2  ;;  %v5317_v4 = vld [vmem:[%s545_s30 + $0x4] ss:$8 sps:$4 sm:$0xff]   ;;  %v5319_v5 = vld [vmem:[%s545_s30] ss:$8 sps:$4 sm:$0xff]   ;;  %s7656_s6 = sld [smem:[#allocation20_spill]]  ;;  %s616_s24 = sadd.s32 1, %s4910_s1 }
  0x4a   : > { %5316 = vset.pattern.permute.xlu1 %v5491_v2  ;;  %1108 = vmatprep.mubr.bf16.mxu0 %v5491_v2  ;;  %v5320_v8 = vld [vmem:[%s7652_s29] sm:$0xff]   ;;  %v633_v9 = vld [vmem:[%s7651_s3 + $0x8] sm:$0xff]  ;;  %s601_s22 = sld [smem:[#allocation3 + %s4910_s1]]  ;;  %s7624_s28 = smov 126   ;;  %vm2111_vm14 = vcmask 1043456   ;;  %vm2104_vm15 = vcmask 64512  }
  0x4b   : > { %648 = vperm.xlu0 %5315, %v634_v3   ;;  %697 = vmatprep.subr.bf16.mxu1 %v5317_v4  ;;  %v896_v10 = vld [vmem:[%s7653_s5 + $0x10] sm:$0xff]  ;;  %v897_v11 = vld [vmem:[%s7653_s5 + $0x18] sm:$0xff]  ;;  %v894_v12 = vld [vmem:[%s7653_s5] sm:$0xff]  ;;  %s617_s2 = sld [smem:[#allocation3 + %s616_s24]]  ;;  %s7626_s24 = smov 4  }
  0x4c   : > { %638 = vperm.xlu1 %5316, %v632_v6   ;;  %698 = vmatpush1.bf16.msra.mxu1 %v5319_v5  ;;  %v5321_v13 = vld [vmem:[%s7652_s29 + $0x8] sm:$0xff]   ;;  %v5322_v39 = vld [vmem:[%s7654_s4] sm:$0xff]   ;;  %v5324_v41 = vld [vmem:[%s7654_s4 + $0x10] sm:$0xff]   ;;  %s7657_s9 = sld [smem:[#allocation23_spill]]  ;;  %s7660_s25 = smov 1  }
  0x4d   : > { %v895_v14 = vld [vmem:[%s7653_s5 + $0x8] sm:$0xff]  ;;  %v5325_v42 = vld [vmem:[%s7654_s4 + $0x18] sm:$0xff]   ;;  %v5326_v43 = vld [vmem:[%s7654_s4 + $0x20] sm:$0xff]   ;;  %s7658_s8 = sld [smem:[#allocation22_spill]]  ;;  %s7664_s3 = smov 4  }
  0x4e   : > { %v5323_v40 = vld [vmem:[%s7654_s4 + $0x8] sm:$0xff]   ;;  %v1038_v6 = vld [vmem:[%s7655_s7 + $0x10] sm:$0xff] }
  0x4f   : > { %653 = vperm.xlu0 %5315, %v635_v7   ;;  %4916 = vmatmul.mubr.msk.bf16.vlgmr.msra.gmra.mxu1 %vm676_vm0, %v5320_v8  ;;  %v5327_v44 = vld [vmem:[%s7654_s4 + $0x28] sm:$0xff]   ;;  %v1036_v7 = vld [vmem:[%s7655_s7] sm:$0xff]  ;;  %v1039_v8 = vld [vmem:[%s7655_s7 + $0x18] sm:$0xff] }
  0x50   : > { %643 = vperm.xlu1 %5316, %v633_v9   ;;  %725 = vmatprep.mubr.bf16.mxu1 %v5491_v2  ;;  %v4960_v9 = vld [vmem:[%s7653_s5 + $0x30] sm:$0xff] }
  0x51   : > { %s618_s21 = sadd.s32 128, %s617_s2  ;;  %s7663_s2 = smov 126  }
  0x53   : > { %910 = vperm.xlu0 %5315, %v896_v10   ;;  %v1037_v10 = vld [vmem:[%s7655_s7 + $0x8] sm:$0xff] }
  0x54   : > { %915 = vperm.xlu1 %5316, %v897_v11   ;;  %v4958_v11 = vld [vmem:[%s7653_s5 + $0x20] sm:$0xff] }
  0x57   : > { %900 = vperm.xlu0 %5315, %v894_v12   ;;  %4917 = vmatmul.mubr.msk.bf16.gmra.mxu1 %vm676_vm0, %v5321_v13  ;;  %v4961_v12 = vld [vmem:[%s7653_s5 + $0x38] sm:$0xff]  ;;  %v4959_v13 = vld [vmem:[%s7653_s5 + $0x28] sm:$0xff] }
  0x58   : > { %905 = vperm.xlu1 %5316, %v895_v14   ;;  %833 = vmatprep.mubr.bf16.mxu1 %v5491_v2 }
  0xc6   : > { %v649_v19 = vpop.permute.xlu0 %648 }
  0xc7   : > { %v639_v20 = vpop.permute.xlu1 %638 }
  0xca   : > { %v654_v24 = vpop.permute.xlu0 %653 }
  0xcb   : > { %v644_v25 = vpop.permute.xlu1 %643 }
  0xce   : > { %v911_v14 = vpop.permute.xlu0 %910 }
 0x10f   : > { %v717_v15 = vpop.f32.mrf.mxu1 }
 0x110   : > { %v5718_v37 = vadd.f32 %v717_v15, %v639_v20  ;;  %v916_v15 = vpop.permute.xlu1 %915 }
 0x111   : > { %v719_v16 = vpop.f32.mrf.mxu1 }
 0x112   : > { %v5708_v32 = vadd.f32 %v719_v16, %v639_v20  ;;  %v901_v16 = vpop.permute.xlu0 %900 }
 0x113   : > { %v721_v17 = vpop.f32.mrf.mxu1 }
 0x114   : > { %v5712_v34 = vadd.f32 %v721_v17, %v644_v25  ;;  %v906_v17 = vpop.permute.xlu1 %905 }
 0x115   : > { %v723_v18 = vpop.f32.mrf.mxu1 }
 0x116   : > { %v5700_v28 = vadd.f32 %v723_v18, %v644_v25  ;;  %v748_v38 = vpack.c.bf16 %v5712_v34, %v5718_v37 }
 0x117   : > { %v727_v21 = vpop.f32.mrf.mxu1 }
 0x118   : > { %v5706_v31 = vadd.f32 %v727_v21, %v649_v19  ;;  %v749_v36 = vpack.c.bf16 %v5700_v28, %v5708_v32 }
 0x119   : > { %v729_v22 = vpop.f32.mrf.mxu1 }
 0x11a   : > { %v5702_v29 = vadd.f32 %v729_v22, %v649_v19 }
 0x11b   : > { %v731_v23 = vpop.f32.mrf.mxu1 }
 0x11c   : > { %v5698_v26 = vadd.f32 %v731_v23, %v654_v24  ;;  %v597_v23 = vlaneseq }
 0x11d   : > { %v733_v27 = vpop.f32.mrf.mxu1 }
 0x11e   : > { %v5704_v30 = vadd.f32 %v733_v27, %v654_v24  ;;  %v750_v35 = vpack.c.bf16 %v5698_v26, %v5706_v31  ;;  %v5798_v27 = vand.u32 127, %v597_v23 }
 0x120   : > { %v751_v33 = vpack.c.bf16 %v5704_v30, %v5702_v29  ;;  %vm944_vm2 = vcmp.lt.s32.totalorder %v5798_v27, 1  ;;  %vm926_vm3 = vcmp.ge.s32.totalorder %v5798_v27, 1  ;;  %vm973_vm4 = vcmp.lt.s32.totalorder %v5798_v27, 127 }
 0x121   : > { %vm1354_vm8 = vcmp.lt.s32.totalorder %v5798_v27, 2  ;;  %vm1383_vm9 = vcmp.lt.s32.totalorder %v5798_v27, 126  ;;  %vm1336_vm10 = vcmp.ge.s32.totalorder %v5798_v27, 2  ;;  %vm1766_vm11 = vcmp.lt.s32.totalorder %v5798_v27, 4 }
 0x122   : > { %813 = vmatprep.subr.bf16.mxu1 %v751_v33  ;;  %vm1795_vm12 = vcmp.lt.s32.totalorder %v5798_v27, 124  ;;  %vm1748_vm13 = vcmp.ge.s32.totalorder %v5798_v27, 4 }
 0x123   : > { %814 = vmatpush1.bf16.msra.mxu1 %v750_v35 }
 0x124   : > { %815 = vmatprep.subr.bf16.mxu1 %v749_v36 }
 0x127   : > { %816 = vmatpush1.bf16.msra.mxu1 %v748_v38 }
 0x12a   : > { %4924 = vmatmul.mubr.msk.bf16.vlgmr.msra.gmra.mxu1 %vm782_vm1, %v5322_v39 }
 0x12b   : > { %843 = vmatprep.mubr.bf16.mxu1 %v5491_v2 }
 0x132   : > { %4925 = vmatmul.mubr.msk.bf16.gmra.mxu1 %vm782_vm1, %v5323_v40 }
 0x133   : > { %853 = vmatprep.mubr.bf16.mxu1 %v5491_v2 }
 0x13a   : > { %4926 = vmatmul.mubr.msk.bf16.gmra.mxu1 %vm782_vm1, %v5324_v41 }
 0x13b   : > { %863 = vmatprep.mubr.bf16.mxu1 %v5491_v2 }
 0x142   : > { %4927 = vmatmul.mubr.msk.bf16.gmra.mxu1 %vm782_vm1, %v5325_v42 }
 0x143   : > { %873 = vmatprep.mubr.bf16.mxu1 %v5491_v2 }
 0x14a   : > { %4928 = vmatmul.mubr.msk.bf16.gmra.mxu1 %vm782_vm1, %v5326_v43 }
 0x14b   : > { %883 = vmatprep.mubr.bf16.mxu1 %v5491_v2 }
 0x152   : > { %4929 = vmatmul.mubr.msk.bf16.gmra.mxu1 %vm782_vm1, %v5327_v44 }
 0x153   : > { %1520 = vmatprep.mubr.bf16.mxu1 %v5491_v2 }
 0x1ea   : > { %v835_v45 = vpop.f32.mrf.mxu1 }
 0x1eb   : > { %928 = vrot.lane.b32.xlu0 %v835_v45, %s7618_s0 }
 0x1ec   : > { %v837_v46 = vpop.f32.mrf.mxu1 }
 0x1ee   : > { %v839_v47 = vpop.f32.mrf.mxu1 }
 0x1ef   : > { %936 = vrot.lane.b32.xlu0 %v837_v46, %s7618_s0  ;;  %930 = vrot.lane.b32.xlu1 %v839_v47, %s7618_s0 }
 0x1f0   : > { %v841_v48 = vpop.f32.mrf.mxu1 }
 0x1f2   : > { %v845_v49 = vpop.f32.mrf.mxu1 }
 0x1f3   : > { %938 = vrot.lane.b32.xlu1 %v841_v48, %s7618_s0  ;;  %932 = vrot.lane.b32.xlu0 %v845_v49, %s7618_s0 }
 0x1f4   : > { %v847_v50 = vpop.f32.mrf.mxu1 }
 0x1f6   : > { %v849_v51 = vpop.f32.mrf.mxu1 }
 0x1f7   : > { %940 = vrot.lane.b32.xlu0 %v847_v50, %s7618_s0  ;;  %934 = vrot.lane.b32.xlu1 %v849_v51, %s7618_s0 }
 0x1f8   : > { %v851_v52 = vpop.f32.mrf.mxu1 }
 0x1fa   : > { %v855_v53 = vpop.f32.mrf.mxu1 }
 0x1fb   : > { %942 = vrot.lane.b32.xlu1 %v851_v52, %s7618_s0  ;;  %v918_v36 = vadd.f32 %v901_v16, %v855_v53  ;;  %s7661_s0 = smov 127  }
 0x1fc   : > { %v857_v54 = vpop.f32.mrf.mxu1 }
 0x1fd   : > { %v919_v38 = vadd.f32 %v901_v16, %v857_v54 }
 0x1fe   : > { %v859_v55 = vpop.f32.mrf.mxu1 }
 0x1ff   : > { %v920_v39 = vadd.f32 %v906_v17, %v859_v55 }
 0x200   : > { %v861_v56 = vpop.f32.mrf.mxu1 }
 0x201   : > { %v921_v44 = vadd.f32 %v906_v17, %v861_v56 }
 0x202   : > { %v865_v57 = vpop.f32.mrf.mxu1 }
 0x203   : > { %v922_v45 = vadd.f32 %v911_v14, %v865_v57 }
 0x204   : > { %v5760_v58 = vpop.f32.mrf.mxu1 }
 0x205   : > { %v923_v48 = vadd.f32 %v911_v14, %v5760_v58 }
 0x206   : > { %v5762_v59 = vpop.f32.mrf.mxu1 }
 0x207   : > { %v924_v51 = vadd.f32 %v916_v15, %v5762_v59 }
 0x208   : > { %v5764_v60 = vpop.f32.mrf.mxu1 }
 0x209   : > { %v925_v52 = vadd.f32 %v916_v15, %v5764_v60 }
 0x20a   : > { %v875_v61 = vpop.f32.mrf.mxu1 }
 0x20b   : > { %975 = vrot.lane.b32.xlu0 %v875_v61, %s7620_s23 }
 0x20c   : > { %v877_v62 = vpop.f32.mrf.mxu1 }
 0x20e   : > { %v879_v63 = vpop.f32.mrf.mxu1 }
 0x20f   : > { %977 = vrot.lane.b32.xlu1 %v879_v63, %s7620_s23 }
 0x210   : > { %v881_v0 = vpop.f32.mrf.mxu1 }
 0x212   : > { %v885_v1 = vpop.f32.mrf.mxu1 }
 0x213   : > { %979 = vrot.lane.b32.xlu0 %v885_v1, %s7620_s23 }
 0x214   : > { %v887_v3 = vpop.f32.mrf.mxu1 }
 0x216   : > { %v889_v4 = vpop.f32.mrf.mxu1 }
 0x217   : > { %987 = vrot.lane.b32.xlu0 %v887_v3, %s7620_s23  ;;  %981 = vrot.lane.b32.xlu1 %v889_v4, %s7620_s23 }
 0x218   : > { %v891_v5 = vpop.f32.mrf.mxu1 }
 0x21b   : > { %983 = vrot.lane.b32.xlu0 %v877_v62, %s7620_s23  ;;  %989 = vrot.lane.b32.xlu1 %v891_v5, %s7620_s23 }
 0x21f   : > { %1052 = vperm.xlu0 %5315, %v1038_v6   ;;  %985 = vrot.lane.b32.xlu1 %v881_v0, %s7620_s23  ;;  %s7622_s23 = smov 2  }
 0x223   : > { %1042 = vperm.xlu0 %5315, %v1036_v7   ;;  %1057 = vperm.xlu1 %5316, %v1039_v8  }
 0x227   : > { %1320 = vperm.xlu0 %5315, %v4960_v9   ;;  %1047 = vperm.xlu1 %5316, %v1037_v10  }
 0x22b   : > { %1310 = vperm.xlu0 %5315, %v4958_v11   ;;  %1325 = vperm.xlu1 %5316, %v4961_v12  }
 0x22f   : > { %1315 = vperm.xlu1 %5316, %v4959_v13  }
 0x25d   : > { %v929_v18 = vpop.permute.xlu0 %928 }
 0x261   : > { %v931_v19 = vpop.permute.xlu1 %930  ;;  %v937_v20 = vpop.permute.xlu0 %936 }
 0x262   : > { %v945_v46 = vsel %vm944_vm2, %v929_v18, %v937_v20  ;;  %v949_v47 = vsel %vm944_vm2, %v937_v20, %v929_v18 }
 0x263   : > { %v957_v55 = vsel %vm926_vm3, %v949_v47, 0.0  ;;  %v958_v56 = vsel %vm926_vm3, %v945_v46, 0.0 }
 0x264   : > { %v965_v6 = vadd.f32 %v957_v55, %v918_v36  ;;  %v966_v7 = vadd.f32 %v958_v56, %v919_v38 }
 0x265   : > { %v939_v21 = vpop.permute.xlu1 %938  ;;  %v933_v22 = vpop.permute.xlu0 %932 }
 0x266   : > { %v946_v57 = vsel %vm944_vm2, %v931_v19, %v939_v21  ;;  %v950_v58 = vsel %vm944_vm2, %v939_v21, %v931_v19 }
 0x267   : > { %v959_v8 = vsel %vm926_vm3, %v950_v58, 0.0  ;;  %v960_v9 = vsel %vm926_vm3, %v946_v57, 0.0  ;;  %v5328_v58 = vld [vmem:[%s7656_s6] sm:$0xff]  }
 0x269   : > { %v935_v24 = vpop.permute.xlu1 %934  ;;  %v941_v25 = vpop.permute.xlu0 %940 }
 0x26a   : > { %v947_v40 = vsel %vm944_vm2, %v933_v22, %v941_v25  ;;  %v951_v41 = vsel %vm944_vm2, %v941_v25, %v933_v22 }
 0x26b   : > { %v961_v53 = vsel %vm926_vm3, %v951_v41, 0.0  ;;  %v962_v54 = vsel %vm926_vm3, %v947_v40, 0.0 }
 0x26c   : > { %v969_v1 = vadd.f32 %v961_v53, %v922_v45  ;;  %v970_v4 = vadd.f32 %v962_v54, %v923_v48 }
 0x26d   : > { %v943_v33 = vpop.permute.xlu1 %942 }
 0x26e   : > { %v948_v49 = vsel %vm944_vm2, %v935_v24, %v943_v33  ;;  %v952_v50 = vsel %vm944_vm2, %v943_v33, %v935_v24  ;;  %v967_v24 = vadd.f32 %v959_v8, %v920_v39  ;;  %v968_v33 = vadd.f32 %v960_v9, %v921_v44 }
 0x26f   : > { %v963_v61 = vsel %vm926_vm3, %v952_v50, 0.0  ;;  %v964_v62 = vsel %vm926_vm3, %v948_v49, 0.0  ;;  %v619_v8 = vstv %s618_s21 }
 0x270   : > { %v971_v10 = vadd.f32 %v963_v61, %v924_v51  ;;  %v972_v13 = vadd.f32 %v964_v62, %v925_v52 }
 0x27d   : > { %v976_v35 = vpop.permute.xlu0 %975 }
 0x281   : > { %v978_v42 = vpop.permute.xlu1 %977 }
 0x285   : > { %v980_v43 = vpop.permute.xlu0 %979 }
 0x289   : > { %v988_v59 = vpop.permute.xlu0 %987  ;;  %v982_v60 = vpop.permute.xlu1 %981 }
 0x28a   : > { %v994_v63 = vsel %vm973_vm4, %v980_v43, %v988_v59  ;;  %v998_v0 = vsel %vm973_vm4, %v988_v59, %v980_v43  ;;  %v5329_v59 = vld [vmem:[%s7656_s6 + $0x8] sm:$0xff]  }
 0x28b   : > { %v1008_v3 = vsel %vm973_vm4, %v994_v63, 0.0  ;;  %v1009_v5 = vsel %vm973_vm4, %v998_v0, 0.0 }
 0x28c   : > { %v1017_v14 = vadd.f32 %v1009_v5, %v970_v4  ;;  %v1016_v15 = vadd.f32 %v1008_v3, %v969_v1  ;;  %v599_v3 = vadd.s32 128, %v5798_v27  ;;  %v604_v4 = vstv %s601_s22  ;;  %s7628_s22 = smov 124  }
 0x28d   : > { %v984_v11 = vpop.permute.xlu0 %983  ;;  %v990_v12 = vpop.permute.xlu1 %989  ;;  %vm605_vm6 = vcmp.lt.s32.totalorder %v5798_v27, %v604_v4  ;;  %v5397_v27 = vld [vmem:[%s7606_s14 + $0x58] sm:$0xff]  }
 0x28e   : > { %v992_v16 = vsel %vm973_vm4, %v976_v35, %v984_v11  ;;  %v996_v17 = vsel %vm973_vm4, %v984_v11, %v976_v35  ;;  %v995_v18 = vsel %vm973_vm4, %v982_v60, %v990_v12  ;;  %v999_v19 = vsel %vm973_vm4, %v990_v12, %v982_v60 }
 0x28f   : > { %v1004_v20 = vsel %vm973_vm4, %v992_v16, 0.0  ;;  %v1005_v21 = vsel %vm973_vm4, %v996_v17, 0.0  ;;  %v1010_v22 = vsel %vm973_vm4, %v995_v18, 0.0  ;;  %v1011_v23 = vsel %vm973_vm4, %v999_v19, 0.0 }
 0x290   : > { %v1019_v25 = vadd.f32 %v1011_v23, %v972_v13  ;;  %v1012_v35 = vadd.f32 %v1004_v20, %v965_v6  ;;  %v1013_v36 = vadd.f32 %v1005_v21, %v966_v7  ;;  %v1018_v40 = vadd.f32 %v1010_v22, %v971_v10 }
 0x291   : > { %v986_v38 = vpop.permute.xlu1 %985  ;;  %v1025_v45 = vmax.f32 %v1017_v14, 0.0  ;;  %v1024_v48 = vmax.f32 %v1016_v15, 0.0  ;;  %vm606_vm5 = vcmp.lt.s32.totalorder %v599_v3, %v604_v4  ;;  %v5494_v16 = vmov 0.0  }
 0x292   : > { %v993_v41 = vsel %vm973_vm4, %v978_v42, %v986_v38  ;;  %v997_v43 = vsel %vm973_vm4, %v986_v38, %v978_v42  ;;  %v1027_v46 = vmax.f32 %v1019_v25, 0.0  ;;  %v1026_v44 = vmax.f32 %v1018_v40, 0.0 }
 0x293   : > { %v1006_v47 = vsel %vm973_vm4, %v993_v41, 0.0  ;;  %v1007_v39 = vsel %vm973_vm4, %v997_v43, 0.0  ;;  %v1021_v53 = vmax.f32 %v1013_v36, 0.0  ;;  %v1020_v55 = vmax.f32 %v1012_v35, 0.0 }
 0x294   : > { %v1014_v49 = vadd.f32 %v1006_v47, %v967_v24  ;;  %v1015_v50 = vadd.f32 %v1007_v39, %v968_v33  ;;  %v1035_v51 = vpack.c.bf16 %v1027_v46, %v1025_v45  ;;  %v1034_v52 = vpack.c.bf16 %v1026_v44, %v1024_v48  ;;  %v5330_v39 = vld [vmem:[%s7654_s4 + $0x30] sm:$0xff]   ;;  %v5331_v48 = vld [vmem:[%s7654_s4 + $0x38] sm:$0xff]   ;;  %v5332_v44 = vld [vmem:[%s7654_s4 + $0x40] sm:$0xff]  }
 0x295   : > { %v610_v17 = vsel %vm606_vm5, 1.0, %v5494_v16  ;;  %vm621_vm7 = vcmp.lt.s32.totalorder %v599_v3, %v619_v8  ;;  %v5887_v33 = vsel %vm605_vm6, 1.0, %v5494_v16  ;;  %v4967_v16 = vld [vmem:[%s7655_s7 + $0x28] sm:$0xff] }
 0x296   : > { %1088 = vmatprep.subr.bf16.mxu0 %v1035_v51  ;;  %v1023_v54 = vmax.f32 %v1015_v50, 0.0  ;;  %v1022_v42 = vmax.f32 %v1014_v49, 0.0  ;;  %v5891_v38 = vsel %vm621_vm7, 1.0, %v610_v17  ;;  %v5333_v49 = vld [vmem:[%s7654_s4 + $0x48] sm:$0xff]   ;;  %v5334_v50 = vld [vmem:[%s7654_s4 + $0x50] sm:$0xff]   ;;  %v5335_v51 = vld [vmem:[%s7654_s4 + $0x58] sm:$0xff]  }
 0x297   : > { %1089 = vmatpush1.bf16.msra.mxu0 %v1034_v52  ;;  %v4998_v17 = vld [vmem:[%s7653_s5 + $0x40] sm:$0xff] }
 0x298   : > { %v1033_v56 = vpack.c.bf16 %v1023_v54, %v1021_v53  ;;  %v1032_v57 = vpack.c.bf16 %v1022_v42, %v1020_v55 }
 0x29a   : > { %1090 = vmatprep.subr.bf16.mxu0 %v1033_v56  ;;  %v1053_v0 = vpop.permute.xlu0 %1052 }
 0x29b   : > { %1091 = vmatpush1.bf16.msra.mxu0 %v1032_v57 }
 0x29e   : > { %4932 = vmatmul.mubr.msk.bf16.vlgmr.msra.gmra.mxu0 %vm782_vm1, %v5328_v58  ;;  %v1058_v62 = vpop.permute.xlu1 %1057  ;;  %v1043_v11 = vpop.permute.xlu0 %1042 }
 0x29f   : > { %1118 = vmatprep.mubr.bf16.mxu0 %v5491_v2 }
 0x2a2   : > { %v1048_v6 = vpop.permute.xlu1 %1047 }
 0x2a6   : > { %4933 = vmatmul.mubr.msk.bf16.gmra.mxu0 %vm782_vm1, %v5329_v59 }
 0x2a7   : > { %1242 = vmatprep.mubr.bf16.mxu0 %v5491_v2 }
 0x35e   : > { %v1110_v60 = vpop.f32.mrf.mxu0 }
 0x35f   : > { %v1111_v24 = vadd.f32 %v1110_v60, %v1043_v11 }
 0x360   : > { %v1112_v61 = vpop.f32.mrf.mxu0 }
 0x361   : > { %v1113_v14 = vadd.f32 %v1112_v61, %v1043_v11 }
 0x362   : > { %v1114_v63 = vpop.f32.mrf.mxu0 }
 0x363   : > { %v1115_v18 = vadd.f32 %v1114_v63, %v1048_v6  ;;  %v1130_v35 = vadd.f32 %v1113_v14, %v5708_v32  ;;  %v1129_v32 = vadd.f32 %v1111_v24, %v5718_v37  ;;  %v4969_v14 = vld [vmem:[%s7655_s7 + $0x38] sm:$0xff] }
 0x364   : > { %v1116_v1 = vpop.f32.mrf.mxu0 }
 0x365   : > { %v1117_v9 = vadd.f32 %v1116_v1, %v1048_v6  ;;  %v1131_v40 = vadd.f32 %v1115_v18, %v5712_v34  ;;  %v5911_v41 = vmul.f32 %v1130_v35, %v5891_v38  ;;  %v5923_v37 = vmul.f32 %v1129_v32, %v5887_v33  ;;  %v5001_v18 = vld [vmem:[%s7653_s5 + $0x58] sm:$0xff] }
 0x366   : > { %v1120_v5 = vpop.f32.mrf.mxu0 }
 0x367   : > { %v1121_v12 = vadd.f32 %v1120_v5, %v1053_v0  ;;  %v1132_v20 = vadd.f32 %v1117_v9, %v5700_v28  ;;  %v5916_v43 = vmul.f32 %v1131_v40, %v5887_v33 }
 0x368   : > { %v1122_v7 = vpop.f32.mrf.mxu0 }
 0x369   : > { %v1123_v10 = vadd.f32 %v1122_v7, %v1053_v0  ;;  %v1133_v25 = vadd.f32 %v1121_v12, %v5706_v31  ;;  %v1158_v47 = vpack.c.bf16 %v5916_v43, %v5923_v37  ;;  %v4968_v12 = vld [vmem:[%s7655_s7 + $0x30] sm:$0xff] }
 0x36a   : > { %v1124_v13 = vpop.f32.mrf.mxu0 }
 0x36b   : > { %v1125_v15 = vadd.f32 %v1124_v13, %v1058_v62  ;;  %v1134_v21 = vadd.f32 %v1123_v10, %v5702_v29  ;;  %v5898_v29 = vmul.f32 %v1132_v20, %v5891_v38  ;;  %v4966_v13 = vld [vmem:[%s7655_s7 + $0x20] sm:$0xff]  ;;  %v1321_v20 = vpop.permute.xlu0 %1320 }
 0x36c   : > { %v1126_v19 = vpop.f32.mrf.mxu0 }
 0x36d   : > { %v1135_v22 = vadd.f32 %v1125_v15, %v5698_v26  ;;  %v1127_v23 = vadd.f32 %v1126_v19, %v1058_v62  ;;  %v5901_v26 = vmul.f32 %v1134_v21, %v5891_v38  ;;  %v1159_v46 = vpack.c.bf16 %v5898_v29, %v5911_v41  ;;  %v5000_v15 = vld [vmem:[%s7653_s5 + $0x50] sm:$0xff]  ;;  %v4999_v19 = vld [vmem:[%s7653_s5 + $0x48] sm:$0xff]  ;;  %v1326_v21 = vpop.permute.xlu1 %1325 }
 0x36f   : > { %v1136_v36 = vadd.f32 %v1127_v23, %v5704_v30  ;;  %v5895_v28 = vmul.f32 %v1135_v22, %v5887_v33  ;;  %v5908_v30 = vmul.f32 %v1133_v25, %v5887_v33  ;;  %v1311_v22 = vpop.permute.xlu0 %1310 }
 0x371   : > { %v5904_v31 = vmul.f32 %v1136_v36, %v5891_v38  ;;  %v1160_v45 = vpack.c.bf16 %v5895_v28, %v5908_v30  ;;  %v1316_v23 = vpop.permute.xlu1 %1315 }
 0x373   : > { %v1161_v34 = vpack.c.bf16 %v5904_v31, %v5901_v26 }
 0x375   : > { %1222 = vmatprep.subr.bf16.mxu0 %v1161_v34 }
 0x376   : > { %1223 = vmatpush1.bf16.msra.mxu0 %v1160_v45 }
 0x377   : > { %1224 = vmatprep.subr.bf16.mxu0 %v1159_v46 }
 0x37a   : > { %1225 = vmatpush1.bf16.msra.mxu0 %v1158_v47 }
 0x37d   : > { %4952 = vmatmul.mubr.msk.bf16.vlgmr.msra.gmra.mxu0 %vm782_vm1, %v5330_v39 }
 0x37e   : > { %1252 = vmatprep.mubr.bf16.mxu0 %v5491_v2 }
 0x385   : > { %4953 = vmatmul.mubr.msk.bf16.gmra.mxu0 %vm782_vm1, %v5331_v48 }
 0x386   : > { %1262 = vmatprep.mubr.bf16.mxu0 %v5491_v2 }
 0x38d   : > { %4954 = vmatmul.mubr.msk.bf16.gmra.mxu0 %vm782_vm1, %v5332_v44 }
 0x38e   : > { %1272 = vmatprep.mubr.bf16.mxu0 %v5491_v2 }
 0x395   : > { %4955 = vmatmul.mubr.msk.bf16.gmra.mxu0 %vm782_vm1, %v5333_v49 }
 0x396   : > { %1282 = vmatprep.mubr.bf16.mxu0 %v5491_v2 }
 0x39d   : > { %4956 = vmatmul.mubr.msk.bf16.gmra.mxu0 %vm782_vm1, %v5334_v50 }
 0x39e   : > { %1292 = vmatprep.mubr.bf16.mxu0 %v5491_v2 }
 0x3a5   : > { %4957 = vmatmul.mubr.msk.bf16.gmra.mxu0 %vm782_vm1, %v5335_v51 }
 0x3a6   : > { %1932 = vmatprep.mubr.bf16.mxu0 %v5491_v2 }
 0x43d   : > { %v1244_v52 = vpop.f32.mrf.mxu0 }
 0x43e   : > { %1338 = vrot.lane.b32.xlu0 %v1244_v52, %s7622_s23 }
 0x43f   : > { %v1246_v53 = vpop.f32.mrf.mxu0 }
 0x441   : > { %v1248_v54 = vpop.f32.mrf.mxu0 }
 0x442   : > { %1346 = vrot.lane.b32.xlu0 %v1246_v53, %s7622_s23  ;;  %1340 = vrot.lane.b32.xlu1 %v1248_v54, %s7622_s23 }
 0x443   : > { %v1250_v55 = vpop.f32.mrf.mxu0 }
 0x445   : > { %v1254_v42 = vpop.f32.mrf.mxu0 }
 0x446   : > { %1348 = vrot.lane.b32.xlu1 %v1250_v55, %s7622_s23  ;;  %1342 = vrot.lane.b32.xlu0 %v1254_v42, %s7622_s23 }
 0x447   : > { %v1256_v56 = vpop.f32.mrf.mxu0 }
 0x449   : > { %v1258_v57 = vpop.f32.mrf.mxu0 }
 0x44a   : > { %1350 = vrot.lane.b32.xlu0 %v1256_v56, %s7622_s23  ;;  %1344 = vrot.lane.b32.xlu1 %v1258_v57, %s7622_s23 }
 0x44b   : > { %v1260_v58 = vpop.f32.mrf.mxu0 }
 0x44d   : > { %v1264_v59 = vpop.f32.mrf.mxu0 }
 0x44e   : > { %1352 = vrot.lane.b32.xlu1 %v1260_v58, %s7622_s23  ;;  %v1328_v47 = vadd.f32 %v1311_v22, %v1264_v59  ;;  %s5263_s23 = smul.u32 48, %s5659_s20 }
 0x44f   : > { %v1266_v60 = vpop.f32.mrf.mxu0 }
 0x450   : > { %v1329_v49 = vadd.f32 %v1311_v22, %v1266_v60 }
 0x451   : > { %v1268_v61 = vpop.f32.mrf.mxu0 }
 0x452   : > { %v1330_v50 = vadd.f32 %v1316_v23, %v1268_v61 }
 0x453   : > { %v5965_v62 = vpop.f32.mrf.mxu0 }
 0x454   : > { %v1331_v53 = vadd.f32 %v1316_v23, %v5965_v62 }
 0x455   : > { %v1274_v63 = vpop.f32.mrf.mxu0 }
 0x456   : > { %v1332_v54 = vadd.f32 %v1321_v20, %v1274_v63 }
 0x457   : > { %v5967_v0 = vpop.f32.mrf.mxu0 }
 0x458   : > { %v1333_v56 = vadd.f32 %v1321_v20, %v5967_v0 }
 0x459   : > { %v5969_v1 = vpop.f32.mrf.mxu0 }
 0x45a   : > { %v1334_v57 = vadd.f32 %v1326_v21, %v5969_v1 }
 0x45b   : > { %v5971_v3 = vpop.f32.mrf.mxu0 }
 0x45d   : > { %v1284_v4 = vpop.f32.mrf.mxu0 }
 0x45e   : > { %1385 = vrot.lane.b32.xlu0 %v1284_v4, %s7624_s28 }
 0x45f   : > { %v1286_v5 = vpop.f32.mrf.mxu0 }
 0x461   : > { %v1288_v6 = vpop.f32.mrf.mxu0 }
 0x462   : > { %1387 = vrot.lane.b32.xlu1 %v1288_v6, %s7624_s28 }
 0x463   : > { %v1290_v7 = vpop.f32.mrf.mxu0 }
 0x465   : > { %v1294_v8 = vpop.f32.mrf.mxu0 }
 0x466   : > { %1389 = vrot.lane.b32.xlu0 %v1294_v8, %s7624_s28  ;;  %v1335_v8 = vadd.f32 %v1326_v21, %v5971_v3 }
 0x467   : > { %v1296_v9 = vpop.f32.mrf.mxu0 }
 0x469   : > { %v1298_v10 = vpop.f32.mrf.mxu0 }
 0x46a   : > { %1397 = vrot.lane.b32.xlu0 %v1296_v9, %s7624_s28  ;;  %1391 = vrot.lane.b32.xlu1 %v1298_v10, %s7624_s28 }
 0x46b   : > { %v1300_v11 = vpop.f32.mrf.mxu0 }
 0x46e   : > { %1393 = vrot.lane.b32.xlu0 %v1286_v5, %s7624_s28  ;;  %1399 = vrot.lane.b32.xlu1 %v1300_v11, %s7624_s28 }
 0x472   : > { %1464 = vperm.xlu0 %5315, %v4968_v12   ;;  %1395 = vrot.lane.b32.xlu1 %v1290_v7, %s7624_s28  ;;  %s6335_s28 = scalar_lea.vmem [#allocation5], %s5263_s23  ;;  %s5262_s23 = sshll.u32 %s5622_s12, 8 }
 0x473   : > { %s7546_s5 = scalar_lea.hbm %s7610_s18, %s5262_s23  ;;  %s4821_s12 = scalar_lea.sflag [#allocation6], %s5659_s20 }
 0x476   : > { %1454 = vperm.xlu0 %5315, %v4966_v13   ;;  %1469 = vperm.xlu1 %5316, %v4969_v14  }
 0x47a   : > { %1732 = vperm.xlu0 %5315, %v5000_v15   ;;  %1459 = vperm.xlu1 %5316, %v4967_v16  }
 0x47e   : > { %1722 = vperm.xlu0 %5315, %v4998_v17   ;;  %1737 = vperm.xlu1 %5316, %v5001_v18  }
 0x482   : > { %1727 = vperm.xlu1 %5316, %v4999_v19  }
 0x4b0   : > { %v1339_v24 = vpop.permute.xlu0 %1338 }
 0x4b4   : > { %v1341_v25 = vpop.permute.xlu1 %1340  ;;  %v1347_v35 = vpop.permute.xlu0 %1346 }
 0x4b5   : > { %v1359_v51 = vsel %vm1354_vm8, %v1347_v35, %v1339_v24  ;;  %v1355_v58 = vsel %vm1354_vm8, %v1339_v24, %v1347_v35 }
 0x4b6   : > { %v1367_v60 = vsel %vm1336_vm10, %v1359_v51, 0.0  ;;  %v1368_v12 = vsel %vm1336_vm10, %v1355_v58, 0.0 }
 0x4b7   : > { %v1375_v13 = vadd.f32 %v1367_v60, %v1328_v47 }
 0x4b8   : > { %v1349_v36 = vpop.permute.xlu1 %1348  ;;  %v1343_v40 = vpop.permute.xlu0 %1342 }
 0x4b9   : > { %v1356_v61 = vsel %vm1354_vm8, %v1341_v25, %v1349_v36  ;;  %v1360_v62 = vsel %vm1354_vm8, %v1349_v36, %v1341_v25 }
 0x4ba   : > { %v1369_v14 = vsel %vm1336_vm10, %v1360_v62, 0.0  ;;  %v1370_v16 = vsel %vm1336_vm10, %v1356_v61, 0.0 }
 0x4bb   : > { %v1378_v47 = vadd.f32 %v1370_v16, %v1331_v53 }
 0x4bc   : > { %v1345_v32 = vpop.permute.xlu1 %1344  ;;  %v1351_v34 = vpop.permute.xlu0 %1350 }
 0x4bd   : > { %v1361_v39 = vsel %vm1354_vm8, %v1351_v34, %v1343_v40  ;;  %v1357_v52 = vsel %vm1354_vm8, %v1343_v40, %v1351_v34  ;;  %v1377_v34 = vadd.f32 %v1369_v14, %v1330_v50 }
 0x4be   : > { %v1371_v59 = vsel %vm1336_vm10, %v1361_v39, 0.0  ;;  %v1372_v63 = vsel %vm1336_vm10, %v1357_v52, 0.0 }
 0x4bf   : > { %v1379_v9 = vadd.f32 %v1371_v59, %v1332_v54  ;;  %v1380_v15 = vadd.f32 %v1372_v63, %v1333_v56 }
 0x4c0   : > { %v1353_v45 = vpop.permute.xlu1 %1352 }
 0x4c1   : > { %v1358_v55 = vsel %vm1354_vm8, %v1345_v32, %v1353_v45  ;;  %v1362_v42 = vsel %vm1354_vm8, %v1353_v45, %v1345_v32  ;;  %v1376_v32 = vadd.f32 %v1368_v12, %v1329_v49 }
 0x4c2   : > { %v1373_v4 = vsel %vm1336_vm10, %v1362_v42, 0.0  ;;  %v1374_v5 = vsel %vm1336_vm10, %v1358_v55, 0.0 }
 0x4c3   : > { %v1381_v17 = vadd.f32 %v1373_v4, %v1334_v57  ;;  %v1382_v3 = vadd.f32 %v1374_v5, %v1335_v8  ;;  %v5336_v5 = vld [vmem:[%s7656_s6 + $0x10] sm:$0xff]  }
 0x4d0   : > { %v1386_v46 = vpop.permute.xlu0 %1385 }
 0x4d4   : > { %v1388_v48 = vpop.permute.xlu1 %1387 }
 0x4d8   : > { %v1390_v44 = vpop.permute.xlu0 %1389 }
 0x4dc   : > { %v1398_v0 = vpop.permute.xlu0 %1397  ;;  %v1392_v1 = vpop.permute.xlu1 %1391 }
 0x4dd   : > { %v1404_v6 = vsel %vm1383_vm9, %v1390_v44, %v1398_v0  ;;  %v1408_v7 = vsel %vm1383_vm9, %v1398_v0, %v1390_v44 }
 0x4de   : > { %v1418_v10 = vsel %vm1383_vm9, %v1404_v6, 0.0  ;;  %v1419_v11 = vsel %vm1383_vm9, %v1408_v7, 0.0  ;;  %v5337_v6 = vld [vmem:[%s7656_s6 + $0x18] sm:$0xff]  }
 0x4df   : > { %v1426_v18 = vadd.f32 %v1418_v10, %v1379_v9  ;;  %v1427_v21 = vadd.f32 %v1419_v11, %v1380_v15 }
 0x4e0   : > { %v1394_v19 = vpop.permute.xlu0 %1393  ;;  %v1400_v20 = vpop.permute.xlu1 %1399 }
 0x4e1   : > { %v1402_v22 = vsel %vm1383_vm9, %v1386_v46, %v1394_v19  ;;  %v1406_v23 = vsel %vm1383_vm9, %v1394_v19, %v1386_v46  ;;  %v1405_v24 = vsel %vm1383_vm9, %v1392_v1, %v1400_v20  ;;  %v1409_v36 = vsel %vm1383_vm9, %v1400_v20, %v1392_v1 }
 0x4e2   : > { %v1414_v25 = vsel %vm1383_vm9, %v1402_v22, 0.0  ;;  %v1415_v35 = vsel %vm1383_vm9, %v1406_v23, 0.0  ;;  %v1420_v40 = vsel %vm1383_vm9, %v1405_v24, 0.0  ;;  %v1421_v45 = vsel %vm1383_vm9, %v1409_v36, 0.0 }
 0x4e3   : > { %v1428_v46 = vadd.f32 %v1420_v40, %v1381_v17  ;;  %v1434_v39 = vmax.f32 %v1426_v18, 0.0  ;;  %v1422_v44 = vadd.f32 %v1414_v25, %v1375_v13  ;;  %v1429_v51 = vadd.f32 %v1421_v45, %v1382_v3 }
 0x4e4   : > { %v1396_v52 = vpop.permute.xlu1 %1395  ;;  %v1423_v54 = vadd.f32 %v1415_v35, %v1376_v32  ;;  %v1435_v57 = vmax.f32 %v1427_v21, 0.0 }
 0x4e5   : > { %v1436_v55 = vmax.f32 %v1428_v46, 0.0  ;;  %v1403_v42 = vsel %vm1383_vm9, %v1388_v48, %v1396_v52  ;;  %v1407_v56 = vsel %vm1383_vm9, %v1396_v52, %v1388_v48  ;;  %v1437_v53 = vmax.f32 %v1429_v51, 0.0 }
 0x4e6   : > { %v1416_v49 = vsel %vm1383_vm9, %v1403_v42, 0.0  ;;  %v1417_v50 = vsel %vm1383_vm9, %v1407_v56, 0.0  ;;  %v1430_v62 = vmax.f32 %v1422_v44, 0.0  ;;  %v1431_v0 = vmax.f32 %v1423_v54, 0.0  ;;  %v5338_v54 = vld [vmem:[%s7654_s4 + $0x60] sm:$0xff]   ;;  %v5340_v42 = vld [vmem:[%s7654_s4 + $0x70] sm:$0xff]  }
 0x4e7   : > { %v1424_v58 = vadd.f32 %v1416_v49, %v1377_v34  ;;  %v1425_v59 = vadd.f32 %v1417_v50, %v1378_v47  ;;  %v1445_v60 = vpack.c.bf16 %v1436_v55, %v1434_v39  ;;  %v1446_v61 = vpack.c.bf16 %v1437_v53, %v1435_v57  ;;  %v5339_v55 = vld [vmem:[%s7654_s4 + $0x68] sm:$0xff]   ;;  %v5341_v56 = vld [vmem:[%s7654_s4 + $0x78] sm:$0xff]   ;;  %v5342_v49 = vld [vmem:[%s7654_s4 + $0x80] sm:$0xff]  }
 0x4e8   : > { %v5343_v50 = vld [vmem:[%s7654_s4 + $0x88] sm:$0xff]   ;;  %s7665_s4 = smov 124  }
 0x4e9   : > { %v1432_v63 = vmax.f32 %v1424_v58, 0.0  ;;  %v1433_v1 = vmax.f32 %v1425_v59, 0.0  ;;  %1500 = vmatprep.subr.bf16.mxu1 %v1446_v61 }
 0x4ea   : > { %1501 = vmatpush1.bf16.msra.mxu1 %v1445_v60 }
 0x4eb   : > { %v1444_v4 = vpack.c.bf16 %v1433_v1, %v1431_v0  ;;  %v1443_v48 = vpack.c.bf16 %v1432_v63, %v1430_v62 }
 0x4ed   : > { %1502 = vmatprep.subr.bf16.mxu1 %v1444_v4  ;;  %v1465_v11 = vpop.permute.xlu0 %1464 }
 0x4ee   : > { %1503 = vmatpush1.bf16.msra.mxu1 %v1443_v48 }
 0x4f1   : > { %4972 = vmatmul.mubr.msk.bf16.vlgmr.msra.gmra.mxu1 %vm782_vm1, %v5336_v5  ;;  %v1470_v9 = vpop.permute.xlu1 %1469  ;;  %v1455_v3 = vpop.permute.xlu0 %1454 }
 0x4f2   : > { %1530 = vmatprep.mubr.bf16.mxu1 %v5491_v2 }
 0x4f5   : > { %v1460_v14 = vpop.permute.xlu1 %1459 }
 0x4f9   : > { %4973 = vmatmul.mubr.msk.bf16.gmra.mxu1 %vm782_vm1, %v5337_v6 }
 0x4fa   : > { %1654 = vmatprep.mubr.bf16.mxu1 %v5491_v2 }
 0x5b1   : > { %v1522_v7 = vpop.f32.mrf.mxu1 }
 0x5b2   : > { %v1523_v40 = vadd.f32 %v1522_v7, %v1455_v3 }
 0x5b3   : > { %v1524_v8 = vpop.f32.mrf.mxu1 }
 0x5b4   : > { %v1525_v20 = vadd.f32 %v1524_v8, %v1455_v3  ;;  %v5006_v3 = vld [vmem:[%s7655_s7 + $0x40] sm:$0xff] }
 0x5b5   : > { %v1526_v10 = vpop.f32.mrf.mxu1 }
 0x5b6   : > { %v1527_v22 = vadd.f32 %v1526_v10, %v1460_v14  ;;  %v1542_v34 = vadd.f32 %v1525_v20, %v5911_v41  ;;  %v5007_v20 = vld [vmem:[%s7655_s7 + $0x48] sm:$0xff] }
 0x5b7   : > { %v1528_v12 = vpop.f32.mrf.mxu1 }
 0x5b8   : > { %v1529_v16 = vadd.f32 %v1528_v12, %v1460_v14  ;;  %v1543_v46 = vadd.f32 %v1527_v22, %v5916_v43  ;;  %v2072_v22 = vld [vmem:[%s7603_s11 + $0x10] sm:$0xff] }
 0x5b9   : > { %v1532_v13 = vpop.f32.mrf.mxu1 }
 0x5ba   : > { %v1533_v18 = vadd.f32 %v1532_v13, %v1465_v11  ;;  %v1544_v24 = vadd.f32 %v1529_v16, %v5898_v29  ;;  %v6115_v43 = vmul.f32 %v1543_v46, %v5887_v33 }
 0x5bb   : > { %v1534_v15 = vpop.f32.mrf.mxu1 }
 0x5bc   : > { %v1535_v17 = vadd.f32 %v1534_v15, %v1465_v11  ;;  %v1545_v32 = vadd.f32 %v1533_v18, %v5908_v30  ;;  %v6097_v39 = vmul.f32 %v1544_v24, %v5891_v38  ;;  %v5009_v18 = vld [vmem:[%s7655_s7 + $0x58] sm:$0xff]  ;;  %v2070_v24 = vld [vmem:[%s7603_s11] sm:$0xff] }
 0x5bd   : > { %v1536_v19 = vpop.f32.mrf.mxu1 }
 0x5be   : > { %v1537_v21 = vadd.f32 %v1536_v19, %v1470_v9  ;;  %v1546_v25 = vadd.f32 %v1535_v17, %v5901_v26  ;;  %v1541_v26 = vadd.f32 %v1523_v40, %v5923_v37  ;;  %v6107_v30 = vmul.f32 %v1545_v32, %v5887_v33  ;;  %v5008_v17 = vld [vmem:[%s7655_s7 + $0x50] sm:$0xff]  ;;  %v1974_v19 = vld [vmem:[%s7657_s9] sm:$0xff]  ;;  %v1733_v32 = vpop.permute.xlu0 %1732 }
 0x5bf   : > { %v1538_v23 = vpop.f32.mrf.mxu1  ;;  %v2328_v40 = vld [vmem:[%s7605_s13] sm:$0xff] }
 0x5c0   : > { %v1547_v35 = vadd.f32 %v1537_v21, %v5895_v28  ;;  %v1539_v36 = vadd.f32 %v1538_v23, %v1470_v9  ;;  %v6100_v29 = vmul.f32 %v1546_v25, %v5891_v38  ;;  %v6122_v37 = vmul.f32 %v1541_v26, %v5887_v33  ;;  %v2073_v21 = vld [vmem:[%s7603_s11 + $0x18] sm:$0xff]  ;;  %v2071_v23 = vld [vmem:[%s7603_s11 + $0x8] sm:$0xff] }
 0x5c1   : > { %v2331_v25 = vld [vmem:[%s7605_s13 + $0x18] sm:$0xff] }
 0x5c2   : > { %v1548_v45 = vadd.f32 %v1539_v36, %v5904_v31  ;;  %v6094_v47 = vmul.f32 %v1547_v35, %v5887_v33  ;;  %v6110_v31 = vmul.f32 %v1542_v34, %v5891_v38  ;;  %v1570_v52 = vpack.c.bf16 %v6115_v43, %v6122_v37  ;;  %v2330_v35 = vld [vmem:[%s7605_s13 + $0x10] sm:$0xff]  ;;  %v2329_v36 = vld [vmem:[%s7605_s13 + $0x8] sm:$0xff]  ;;  %v1738_v34 = vpop.permute.xlu1 %1737 }
 0x5c4   : > { %v6103_v28 = vmul.f32 %v1548_v45, %v5891_v38  ;;  %v1572_v44 = vpack.c.bf16 %v6094_v47, %v6107_v30  ;;  %v1571_v51 = vpack.c.bf16 %v6097_v39, %v6110_v31  ;;  %v1723_v45 = vpop.permute.xlu0 %1722 }
 0x5c6   : > { %v1573_v41 = vpack.c.bf16 %v6103_v28, %v6100_v29  ;;  %v1728_v46 = vpop.permute.xlu1 %1727 }
 0x5c8   : > { %1634 = vmatprep.subr.bf16.mxu1 %v1573_v41 }
 0x5c9   : > { %1635 = vmatpush1.bf16.msra.mxu1 %v1572_v44 }
 0x5ca   : > { %1636 = vmatprep.subr.bf16.mxu1 %v1571_v51 }
 0x5cd   : > { %1637 = vmatpush1.bf16.msra.mxu1 %v1570_v52 }
 0x5d0   : > { %4992 = vmatmul.mubr.msk.bf16.vlgmr.msra.gmra.mxu1 %vm782_vm1, %v5338_v54 }
 0x5d1   : > { %1664 = vmatprep.mubr.bf16.mxu1 %v5491_v2 }
 0x5d8   : > { %4993 = vmatmul.mubr.msk.bf16.gmra.mxu1 %vm782_vm1, %v5339_v55 }
 0x5d9   : > { %1674 = vmatprep.mubr.bf16.mxu1 %v5491_v2 }
 0x5e0   : > { %4994 = vmatmul.mubr.msk.bf16.gmra.mxu1 %vm782_vm1, %v5340_v42 }
 0x5e1   : > { %1684 = vmatprep.mubr.bf16.mxu1 %v5491_v2 }
 0x5e8   : > { %4995 = vmatmul.mubr.msk.bf16.gmra.mxu1 %vm782_vm1, %v5341_v56 }
 0x5e9   : > { %1694 = vmatprep.mubr.bf16.mxu1 %v5491_v2 }
 0x5f0   : > { %4996 = vmatmul.mubr.msk.bf16.gmra.mxu1 %vm782_vm1, %v5342_v49 }
 0x5f1   : > { %1704 = vmatprep.mubr.bf16.mxu1 %v5491_v2 }
 0x5f8   : > { %4997 = vmatmul.mubr.msk.bf16.gmra.mxu1 %vm782_vm1, %v5343_v50 }
 0x5f9   : > { %2267 = vmatprep.mubr.bf16.mxu1 %v5491_v2 }
 0x690   : > { %v1656_v57 = vpop.f32.mrf.mxu1 }
 0x691   : > { %1750 = vrot.lane.b32.xlu0 %v1656_v57, %s7626_s24 }
 0x692   : > { %v1658_v53 = vpop.f32.mrf.mxu1 }
 0x694   : > { %v1660_v58 = vpop.f32.mrf.mxu1 }
 0x695   : > { %1758 = vrot.lane.b32.xlu0 %v1658_v53, %s7626_s24  ;;  %1752 = vrot.lane.b32.xlu1 %v1660_v58, %s7626_s24 }
 0x696   : > { %v1662_v59 = vpop.f32.mrf.mxu1 }
 0x698   : > { %v1666_v60 = vpop.f32.mrf.mxu1 }
 0x699   : > { %1760 = vrot.lane.b32.xlu1 %v1662_v59, %s7626_s24  ;;  %1754 = vrot.lane.b32.xlu0 %v1666_v60, %s7626_s24 }
 0x69a   : > { %v1668_v61 = vpop.f32.mrf.mxu1 }
 0x69c   : > { %v1670_v62 = vpop.f32.mrf.mxu1 }
 0x69d   : > { %1762 = vrot.lane.b32.xlu0 %v1668_v61, %s7626_s24  ;;  %1756 = vrot.lane.b32.xlu1 %v1670_v62, %s7626_s24 }
 0x69e   : > { %v1672_v63 = vpop.f32.mrf.mxu1 }
 0x6a0   : > { %v6163_v0 = vpop.f32.mrf.mxu1 }
 0x6a1   : > { %1764 = vrot.lane.b32.xlu1 %v1672_v63, %s7626_s24  ;;  %v1740_v49 = vadd.f32 %v1723_v45, %v6163_v0  ;;  %s7662_s24 = smov 2  }
 0x6a2   : > { %v6166_v1 = vpop.f32.mrf.mxu1 }
 0x6a3   : > { %v1741_v58 = vadd.f32 %v1723_v45, %v6166_v1 }
 0x6a4   : > { %v6168_v4 = vpop.f32.mrf.mxu1 }
 0x6a5   : > { %v1742_v59 = vadd.f32 %v1728_v46, %v6168_v4 }
 0x6a6   : > { %v6170_v48 = vpop.f32.mrf.mxu1 }
 0x6a7   : > { %v1743_v62 = vadd.f32 %v1728_v46, %v6170_v48 }
 0x6a8   : > { %v6172_v5 = vpop.f32.mrf.mxu1 }
 0x6a9   : > { %v1744_v63 = vadd.f32 %v1733_v32, %v6172_v5 }
 0x6aa   : > { %v6174_v6 = vpop.f32.mrf.mxu1 }
 0x6ab   : > { %v1745_v1 = vadd.f32 %v1733_v32, %v6174_v6 }
 0x6ac   : > { %v6176_v7 = vpop.f32.mrf.mxu1 }
 0x6ad   : > { %v1746_v4 = vadd.f32 %v1738_v34, %v6176_v7 }
 0x6ae   : > { %v6178_v8 = vpop.f32.mrf.mxu1 }
 0x6b0   : > { %v1696_v9 = vpop.f32.mrf.mxu1 }
 0x6b1   : > { %1797 = vrot.lane.b32.xlu0 %v1696_v9, %s7628_s22 }
 0x6b2   : > { %v1698_v10 = vpop.f32.mrf.mxu1 }
 0x6b4   : > { %v1700_v11 = vpop.f32.mrf.mxu1 }
 0x6b5   : > { %1799 = vrot.lane.b32.xlu1 %v1700_v11, %s7628_s22 }
 0x6b6   : > { %v1702_v12 = vpop.f32.mrf.mxu1 }
 0x6b8   : > { %v1706_v13 = vpop.f32.mrf.mxu1 }
 0x6b9   : > { %1801 = vrot.lane.b32.xlu0 %v1706_v13, %s7628_s22 }
 0x6ba   : > { %v1708_v14 = vpop.f32.mrf.mxu1 }
 0x6bc   : > { %v1710_v15 = vpop.f32.mrf.mxu1 }
 0x6bd   : > { %1809 = vrot.lane.b32.xlu0 %v1708_v14, %s7628_s22  ;;  %1803 = vrot.lane.b32.xlu1 %v1710_v15, %s7628_s22 }
 0x6be   : > { %v1712_v16 = vpop.f32.mrf.mxu1 }
 0x6c1   : > { %1805 = vrot.lane.b32.xlu0 %v1698_v10, %s7628_s22  ;;  %1811 = vrot.lane.b32.xlu1 %v1712_v16, %s7628_s22 }
 0x6c5   : > { %1876 = vperm.xlu0 %5315, %v5008_v17   ;;  %1807 = vrot.lane.b32.xlu1 %v1702_v12, %s7628_s22  ;;  %s7659_s22 = sld [smem:[#allocation24_spill]] }
 0x6c9   : > { %1866 = vperm.xlu0 %5315, %v5006_v3   ;;  %1881 = vperm.xlu1 %5316, %v5009_v18   ;;  %v1747_v3 = vadd.f32 %v1738_v34, %v6178_v8 }
 0x6cd   : > { %1977 = vperm.xlu0 %5315, %v1974_v19   ;;  %1871 = vperm.xlu1 %5316, %v5007_v20  }
 0x6d1   : > { %2091 = vperm.xlu0 %5315, %v2073_v21   ;;  %2086 = vperm.xlu1 %5316, %v2072_v22  }
 0x6d5   : > { %2081 = vperm.xlu0 %5315, %v2071_v23   ;;  %2076 = vperm.xlu1 %5316, %v2070_v24  }
 0x6d9   : > { %2349 = vperm.xlu0 %5315, %v2331_v25   ;;  %2344 = vperm.xlu1 %5316, %v2330_v35  }
 0x6dd   : > { %2339 = vperm.xlu0 %5315, %v2329_v36   ;;  %2334 = vperm.xlu1 %5316, %v2328_v40  }
 0x703   : > { %v1751_v26 = vpop.permute.xlu0 %1750 }
 0x707   : > { %v1753_v41 = vpop.permute.xlu1 %1752  ;;  %v1759_v44 = vpop.permute.xlu0 %1758 }
 0x708   : > { %v1771_v60 = vsel %vm1766_vm11, %v1759_v44, %v1751_v26  ;;  %v1767_v10 = vsel %vm1766_vm11, %v1751_v26, %v1759_v44 }
 0x709   : > { %v1779_v48 = vsel %vm1748_vm13, %v1771_v60, 0.0  ;;  %v1780_v21 = vsel %vm1748_vm13, %v1767_v10, 0.0 }
 0x70a   : > { %v1787_v22 = vadd.f32 %v1779_v48, %v1740_v49 }
 0x70b   : > { %v1761_v51 = vpop.permute.xlu1 %1760  ;;  %v1755_v52 = vpop.permute.xlu0 %1754 }
 0x70c   : > { %v1768_v5 = vsel %vm1766_vm11, %v1753_v41, %v1761_v51  ;;  %v1772_v12 = vsel %vm1766_vm11, %v1761_v51, %v1753_v41 }
 0x70d   : > { %v1781_v23 = vsel %vm1748_vm13, %v1772_v12, 0.0  ;;  %v1782_v25 = vsel %vm1748_vm13, %v1768_v5, 0.0 }
 0x70e   : > { %v1790_v49 = vadd.f32 %v1782_v25, %v1743_v62 }
 0x70f   : > { %v1757_v54 = vpop.permute.xlu1 %1756  ;;  %v1763_v55 = vpop.permute.xlu0 %1762 }
 0x710   : > { %v1773_v50 = vsel %vm1766_vm11, %v1763_v55, %v1755_v52  ;;  %v1769_v61 = vsel %vm1766_vm11, %v1755_v52, %v1763_v55  ;;  %v1789_v55 = vadd.f32 %v1781_v23, %v1742_v59 }
 0x711   : > { %v1783_v11 = vsel %vm1748_vm13, %v1773_v50, 0.0  ;;  %v1784_v6 = vsel %vm1748_vm13, %v1769_v61, 0.0 }
 0x712   : > { %v1791_v18 = vadd.f32 %v1783_v11, %v1744_v63  ;;  %v1792_v24 = vadd.f32 %v1784_v6, %v1745_v1 }
 0x713   : > { %v1765_v42 = vpop.permute.xlu1 %1764 }
 0x714   : > { %v1770_v0 = vsel %vm1766_vm11, %v1757_v54, %v1765_v42  ;;  %v1774_v9 = vsel %vm1766_vm11, %v1765_v42, %v1757_v54  ;;  %v1788_v54 = vadd.f32 %v1780_v21, %v1741_v58 }
 0x715   : > { %v1785_v14 = vsel %vm1748_vm13, %v1774_v9, 0.0  ;;  %v1786_v15 = vsel %vm1748_vm13, %v1770_v0, 0.0 }
 0x716   : > { %v1793_v35 = vadd.f32 %v1785_v14, %v1746_v4  ;;  %v1794_v8 = vadd.f32 %v1786_v15, %v1747_v3  ;;  %v5344_v15 = vld [vmem:[%s7656_s6 + $0x20] sm:$0xff]  }
 0x723   : > { %v1798_v56 = vpop.permute.xlu0 %1797 }
 0x727   : > { %v1800_v57 = vpop.permute.xlu1 %1799 }
 0x72b   : > { %v1802_v53 = vpop.permute.xlu0 %1801 }
 0x72f   : > { %v1810_v13 = vpop.permute.xlu0 %1809  ;;  %v1804_v7 = vpop.permute.xlu1 %1803 }
 0x730   : > { %v1816_v16 = vsel %vm1795_vm12, %v1802_v53, %v1810_v13  ;;  %v1820_v17 = vsel %vm1795_vm12, %v1810_v13, %v1802_v53 }
 0x731   : > { %v1830_v19 = vsel %vm1795_vm12, %v1816_v16, 0.0  ;;  %v1831_v20 = vsel %vm1795_vm12, %v1820_v17, 0.0  ;;  %v5345_v16 = vld [vmem:[%s7656_s6 + $0x28] sm:$0xff]   ;;  %s5499_s6 = smov [#allocation5]  }
 0x732   : > { %v1838_v36 = vadd.f32 %v1830_v19, %v1791_v18  ;;  %v1839_v34 = vadd.f32 %v1831_v20, %v1792_v24 }
 0x733   : > { %v1806_v40 = vpop.permute.xlu0 %1805  ;;  %v1812_v32 = vpop.permute.xlu1 %1811 }
 0x734   : > { %v1814_v45 = vsel %vm1795_vm12, %v1798_v56, %v1806_v40  ;;  %v1818_v46 = vsel %vm1795_vm12, %v1806_v40, %v1798_v56  ;;  %v1817_v26 = vsel %vm1795_vm12, %v1804_v7, %v1812_v32  ;;  %v1821_v51 = vsel %vm1795_vm12, %v1812_v32, %v1804_v7 }
 0x735   : > { %v1826_v41 = vsel %vm1795_vm12, %v1814_v45, 0.0  ;;  %v1827_v44 = vsel %vm1795_vm12, %v1818_v46, 0.0  ;;  %v1832_v52 = vsel %vm1795_vm12, %v1817_v26, 0.0  ;;  %v1833_v42 = vsel %vm1795_vm12, %v1821_v51, 0.0 }
 0x736   : > { %v1840_v56 = vadd.f32 %v1832_v52, %v1793_v35  ;;  %v1846_v50 = vmax.f32 %v1838_v36, 0.0  ;;  %v1834_v53 = vadd.f32 %v1826_v41, %v1787_v22  ;;  %v1841_v60 = vadd.f32 %v1833_v42, %v1794_v8 }
 0x737   : > { %v1808_v61 = vpop.permute.xlu1 %1807  ;;  %v1835_v63 = vadd.f32 %v1827_v44, %v1788_v54  ;;  %v1847_v4 = vmax.f32 %v1839_v34, 0.0 }
 0x738   : > { %v1848_v0 = vmax.f32 %v1840_v56, 0.0  ;;  %v1815_v9 = vsel %vm1795_vm12, %v1800_v57, %v1808_v61  ;;  %v1819_v1 = vsel %vm1795_vm12, %v1808_v61, %v1800_v57  ;;  %v1849_v62 = vmax.f32 %v1841_v60, 0.0 }
 0x739   : > { %v1828_v58 = vsel %vm1795_vm12, %v1815_v9, 0.0  ;;  %v1829_v59 = vsel %vm1795_vm12, %v1819_v1, 0.0  ;;  %v1842_v12 = vmax.f32 %v1834_v53, 0.0  ;;  %v1843_v13 = vmax.f32 %v1835_v63, 0.0 }
 0x73a   : > { %v1836_v10 = vadd.f32 %v1828_v58, %v1789_v55  ;;  %v1837_v11 = vadd.f32 %v1829_v59, %v1790_v49  ;;  %v1857_v48 = vpack.c.bf16 %v1848_v0, %v1846_v50  ;;  %v1858_v5 = vpack.c.bf16 %v1849_v62, %v1847_v4 }
 0x73c   : > { %v1844_v6 = vmax.f32 %v1836_v10, 0.0  ;;  %v1845_v7 = vmax.f32 %v1837_v11, 0.0  ;;  %1912 = vmatprep.subr.bf16.mxu0 %v1858_v5 }
 0x73d   : > { %1913 = vmatpush1.bf16.msra.mxu0 %v1857_v48 }
 0x73e   : > { %v1856_v14 = vpack.c.bf16 %v1845_v7, %v1843_v13  ;;  %v1855_v57 = vpack.c.bf16 %v1844_v6, %v1842_v12 }
 0x740   : > { %1914 = vmatprep.subr.bf16.mxu0 %v1856_v14  ;;  %v1877_v20 = vpop.permute.xlu0 %1876 }
 0x741   : > { %1915 = vmatpush1.bf16.msra.mxu0 %v1855_v57 }
 0x744   : > { %5012 = vmatmul.mubr.msk.bf16.vlgmr.msra.gmra.mxu0 %vm782_vm1, %v5344_v15  ;;  %v1882_v18 = vpop.permute.xlu1 %1881  ;;  %v1867_v8 = vpop.permute.xlu0 %1866 }
 0x745   : > { %1942 = vmatprep.mubr.bf16.mxu0 %v5491_v2 }
 0x748   : > { %v1872_v23 = vpop.permute.xlu1 %1871  ;;  %v1978_v0 = vpop.permute.xlu0 %1977 }
 0x74c   : > { %5013 = vmatmul.mubr.msk.bf16.gmra.mxu0 %vm782_vm1, %v5345_v16 }
 0x74d   : > { %2015 = vmatprep.mubr.bf16.mxu0 %v5491_v2 }
 0x804   : > { %v1934_v17 = vpop.f32.mrf.mxu0 }
 0x805   : > { %v1935_v52 = vadd.f32 %v1934_v17, %v1867_v8 }
 0x806   : > { %v1936_v3 = vpop.f32.mrf.mxu0 }
 0x807   : > { %v1937_v32 = vadd.f32 %v1936_v3, %v1867_v8 }
 0x808   : > { %v1938_v19 = vpop.f32.mrf.mxu0 }
 0x809   : > { %v1939_v45 = vadd.f32 %v1938_v19, %v1872_v23  ;;  %v1954_v55 = vadd.f32 %v1937_v32, %v6110_v31 }
 0x80a   : > { %v1940_v21 = vpop.f32.mrf.mxu0 }
 0x80b   : > { %v1941_v25 = vadd.f32 %v1940_v21, %v1872_v23  ;;  %v1955_v56 = vadd.f32 %v1939_v45, %v6115_v43 }
 0x80c   : > { %v1944_v22 = vpop.f32.mrf.mxu0 }
 0x80d   : > { %v1945_v36 = vadd.f32 %v1944_v22, %v1877_v20  ;;  %v1956_v26 = vadd.f32 %v1941_v25, %v6097_v39 }
 0x80e   : > { %v1946_v24 = vpop.f32.mrf.mxu0 }
 0x80f   : > { %v1947_v35 = vadd.f32 %v1946_v24, %v1877_v20  ;;  %v1957_v54 = vadd.f32 %v1945_v36, %v6107_v30  ;;  %v1964_v50 = vmul.f32 %v1956_v26, %v5891_v38  ;;  %v1962_v30 = vmul.f32 %v1954_v55, %v5891_v38 }
 0x810   : > { %v1948_v40 = vpop.f32.mrf.mxu0 }
 0x811   : > { %v1949_v34 = vadd.f32 %v1948_v40, %v1882_v18  ;;  %v1958_v41 = vadd.f32 %v1947_v35, %v6100_v29  ;;  %v1965_v53 = vmul.f32 %v1957_v54, %v5887_v33  ;;  %v1971_v43 = vpack.c.bf16 %v1964_v50, %v1962_v30 }
 0x812   : > { %v1950_v46 = vpop.f32.mrf.mxu0 }
 0x813   : > { %v1959_v44 = vadd.f32 %v1949_v34, %v6094_v47  ;;  %v1951_v51 = vadd.f32 %v1950_v46, %v1882_v18  ;;  %v1966_v39 = vmul.f32 %v1958_v41, %v5891_v38  ;;  %v1953_v47 = vadd.f32 %v1935_v52, %v6122_v37  ;;  %v1969_v37 = vld [vmem:[%s7658_s8] sm:$0xf] }
 0x815   : > { %v1960_v42 = vadd.f32 %v1951_v51, %v6103_v28  ;;  %v1967_v49 = vmul.f32 %v1959_v44, %v5887_v33  ;;  %v1963_v28 = vmul.f32 %v1955_v56, %v5887_v33  ;;  %v1961_v61 = vmul.f32 %v1953_v47, %v5887_v33 }
 0x817   : > { %v1968_v29 = vmul.f32 %v1960_v42, %v5891_v38  ;;  %v1972_v60 = vpack.c.bf16 %v1967_v49, %v1965_v53  ;;  %v1970_v63 = vpack.c.bf16 %v1963_v28, %v1961_v61  ;;  %v2092_v28 = vpop.permute.xlu0 %2091 }
 0x819   : > { %v1973_v31 = vpack.c.bf16 %v1968_v29, %v1966_v39  ;;  %v5346_v39 = vld [vmem:[%s7602_s10] sm:$0xff]   ;;  %v5347_v29 = vld [vmem:[%s7602_s10 + $0x8] sm:$0xff]  }
 0x81b   : > { %1995 = vmatprep.subr.bf16.mxu0 %v1973_v31 }
 0x81c   : > { %1996 = vmatpush1.bf16.msra.mxu0 %v1972_v60 }
 0x81d   : > { %1997 = vmatprep.subr.bf16.mxu0 %v1971_v43  ;;  %v2087_v43 = vpop.permute.xlu1 %2086 }
 0x820   : > { %1998 = vmatpush1.bf16.msra.mxu0 %v1970_v63 }
 0x823   : > { %5014 = vmatmul.mubr.msk.bf16.vlgmr.msra.gmra.mxu0 %vm782_vm1, %v1969_v37  ;;  %v2082_v37 = vpop.permute.xlu0 %2081 }
 0x824   : > { %2150 = vmatprep.mubr.bf16.mxu0 %v5491_v2 }
 0x8e3   : > { %v2017_v9 = vpop.f32.mrf.mxu0 }
 0x8e4   : > { %v2018_v1 = vadd.f32 %v2017_v9, %v1978_v0 }
 0x8e5   : > { %v2019_v58 = vpop.f32.mrf.mxu0 }
 0x8e6   : > { %v2024_v59 = vmul.f32 %v2018_v1, %v5887_v33  ;;  %v2020_v4 = vadd.f32 %v2019_v58, %v1978_v0 }
 0x8e7   : > { %v2021_v62 = vpop.f32.mrf.mxu0 }
 0x8e8   : > { %2026 = vst [vmem:[%s6335_s28] sm:$0xff] %v2024_v59  ;;  %v2028_v10 = vrot.slane %v2024_v59, 4  ;;  %v2025_v11 = vmul.f32 %v2020_v4, %v5891_v38  ;;  %v2077_v4 = vpop.permute.xlu1 %2076 }
 0x8e9   : > { %v2022_v48 = vpop.f32.mrf.mxu0 }
 0x8ea   : > { %v2029_v5 = vmax.f32 %v2024_v59, %v2028_v10  ;;  %2027 = vst [vmem:[%s6335_s28 + $0x8] sm:$0xff] %v2025_v11  ;;  %v2034_v12 = vrot.slane %v2025_v11, 4 }
 0x8ec   : > { %v2030_v6 = vrot.slane %v2029_v5, 2  ;;  %v2035_v13 = vmax.f32 %v2025_v11, %v2034_v12 }
 0x8ee   : > { %v2031_v7 = vmax.f32 %v2029_v5, %v2030_v6  ;;  %v2036_v14 = vrot.slane %v2035_v13, 2 }
 0x8f0   : > { %v2032_v57 = vrot.slane %v2031_v7, 1  ;;  %v2037_v15 = vmax.f32 %v2035_v13, %v2036_v14  ;;  %v5349_v14 = vld [vmem:[%s7659_s22 + $0x8] sm:$0xff]  }
 0x8f2   : > { %v2033_v16 = vmax.f32 %v2031_v7, %v2032_v57  ;;  %v2038_v17 = vrot.slane %v2037_v15, 1  ;;  %v5348_v7 = vld [vmem:[%s7659_s22] sm:$0xff]   ;;  %v5350_v57 = vld [vmem:[%s7659_s22 + $0x10] sm:$0xff]  }
 0x8f4   : > { %v2040_v3 = vsub.f32 %v2024_v59, %v2033_v16  ;;  %v2039_v18 = vmax.f32 %v2037_v15, %v2038_v17  ;;  %v5351_v15 = vld [vmem:[%s7659_s22 + $0x18] sm:$0xff]   ;;  %v5352_v16 = vld [vmem:[%s7659_s22 + $0x20] sm:$0xff]   ;;  %v5353_v17 = vld [vmem:[%s7659_s22 + $0x28] sm:$0xff]  }
 0x8f6   : > { %v2042_v19 = vmul.f32 1.442695, %v2040_v3  ;;  %v2041_v20 = vsub.f32 %v2025_v11, %v2039_v18 }
 0x8f8   : > { %5398 = vpow2.f32 %v2042_v19  ;;  %v2044_v21 = vmul.f32 1.442695, %v2041_v20 }
 0x8fa   : > { %5400 = vpow2.f32 %v2044_v21 }
 0x905   : > { %v5399_v22 = vpop.eup %5398 }
 0x906   : > { %v2046_v23 = vrot.slane %v5399_v22, 4 }
 0x907   : > { %v5401_v24 = vpop.eup %5400 }
 0x908   : > { %v2052_v25 = vrot.slane %v5401_v24, 4  ;;  %v2047_v35 = vadd.f32 %v5399_v22, %v2046_v23 }
 0x90a   : > { %v2053_v8 = vadd.f32 %v5401_v24, %v2052_v25  ;;  %v2048_v36 = vrot.slane %v2047_v35, 2 }
 0x90c   : > { %v2054_v40 = vrot.slane %v2053_v8, 2  ;;  %v2049_v32 = vadd.f32 %v2048_v36, %v2047_v35 }
 0x90e   : > { %v2055_v34 = vadd.f32 %v2054_v40, %v2053_v8  ;;  %v2050_v45 = vrot.slane %v2049_v32, 1 }
 0x910   : > { %v2056_v46 = vrot.slane %v2055_v34, 1  ;;  %v2051_v26 = vadd.f32 %v2050_v45, %v2049_v32 }
 0x912   : > { %v2057_v41 = vadd.f32 %v2056_v46, %v2055_v34  ;;  %5402 = vrcp.f32 %v2051_v26 }
 0x914   : > { %5404 = vrcp.f32 %v2057_v41 }
 0x91f   : > { %v5403_v44 = vpop.eup %5402 }
 0x920   : > { %v2060_v51 = vmul.f32 %v5403_v44, %v5399_v22 }
 0x921   : > { %v5405_v52 = vpop.eup %5404 }
 0x922   : > { %v2061_v54 = vmul.f32 %v5405_v52, %v5401_v24  ;;  %v2062_v55 = vmul.f32 %v2060_v51, %v5887_v33 }
 0x924   : > { %v2063_v42 = vmul.f32 %v2061_v54, %v5891_v38  ;;  %v2068_v56 = vpack.c.bf16 %v2062_v55, %v2062_v55 }
 0x926   : > { %v2069_v49 = vpack.c.bf16 %v2063_v42, %v2063_v42  ;;  %v2113_v50 = vsel %vm2111_vm14, %v2068_v56, 0  ;;  %v2458_v42 = vld [vmem:[%s7607_s15 + $0x10] sm:$0xff]  ;;  %v2456_v56 = vld [vmem:[%s7607_s15] sm:$0xff] }
 0x928   : > { %5017 = vmatprep.subr.msk.bf16.mxu0 %vm2111_vm14, %v2069_v49  ;;  %v2459_v49 = vld [vmem:[%s7607_s15 + $0x18] sm:$0xff] }
 0x929   : > { %2133 = vmatpush1.bf16.msra.mxu0 %v2113_v50  ;;  %v5062_v50 = vld [vmem:[%s7605_s13 + $0x30] sm:$0xff] }
 0x92c   : > { %5018 = vmatmul.mubr.msk.bf16.vlgmr.msra.gmra.mxu0 %vm2104_vm15, %v5346_v39  ;;  %v2457_v39 = vld [vmem:[%s7607_s15 + $0x8] sm:$0xff] }
 0x92d   : > { %2160 = vmatprep.mubr.bf16.mxu0 %v5491_v2 }
 0x934   : > { %5019 = vmatmul.mubr.msk.bf16.gmra.mxu0 %vm2104_vm15, %v5347_v29  ;;  %v5060_v29 = vld [vmem:[%s7605_s13 + $0x20] sm:$0xff] }
 0x935   : > { %2528 = vmatprep.mubr.bf16.mxu0 %v5491_v2 }
 0x9ec   : > { %v2152_v47 = vpop.f32.mrf.mxu0 }
 0x9ed   : > { %v6374_v6 = vadd.f32 %v2152_v47, %v2077_v4  ;;  %v5063_v47 = vld [vmem:[%s7605_s13 + $0x38] sm:$0xff] }
 0x9ee   : > { %v2154_v53 = vpop.f32.mrf.mxu0 }
 0x9ef   : > { %v6364_v10 = vadd.f32 %v2154_v53, %v2077_v4  ;;  %v5061_v53 = vld [vmem:[%s7605_s13 + $0x28] sm:$0xff] }
 0x9f0   : > { %v2156_v30 = vpop.f32.mrf.mxu0 }
 0x9f1   : > { %v6368_v48 = vadd.f32 %v2156_v30, %v2082_v37  ;;  %v2345_v30 = vpop.permute.xlu1 %2344 }
 0x9f2   : > { %v2158_v31 = vpop.f32.mrf.mxu0 }
 0x9f3   : > { %v6356_v1 = vadd.f32 %v2158_v31, %v2082_v37  ;;  %v2183_v13 = vpack.c.bf16 %v6368_v48, %v6374_v6  ;;  %v2350_v31 = vpop.permute.xlu0 %2349 }
 0x9f4   : > { %v2162_v60 = vpop.f32.mrf.mxu0 }
 0x9f5   : > { %v6362_v62 = vadd.f32 %v2162_v60, %v2087_v43  ;;  %v2184_v12 = vpack.c.bf16 %v6356_v1, %v6364_v10 }
 0x9f6   : > { %v2164_v61 = vpop.f32.mrf.mxu0 }
 0x9f7   : > { %v6358_v58 = vadd.f32 %v2164_v61, %v2087_v43  ;;  %v2340_v60 = vpop.permute.xlu0 %2339 }
 0x9f8   : > { %v2166_v63 = vpop.f32.mrf.mxu0 }
 0x9f9   : > { %v6354_v0 = vadd.f32 %v2166_v63, %v2092_v28 }
 0x9fa   : > { %v2168_v9 = vpop.f32.mrf.mxu0 }
 0x9fb   : > { %v6360_v59 = vadd.f32 %v2168_v9, %v2092_v28  ;;  %v2185_v5 = vpack.c.bf16 %v6354_v0, %v6362_v62  ;;  %v2335_v28 = vpop.permute.xlu1 %2334 }
 0x9fd   : > { %v2186_v11 = vpack.c.bf16 %v6360_v59, %v6358_v58 }
 0x9ff   : > { %2247 = vmatprep.subr.bf16.mxu1 %v2186_v11 }
 0xa00   : > { %2248 = vmatpush1.bf16.msra.mxu1 %v2185_v5 }
 0xa01   : > { %2249 = vmatprep.subr.bf16.mxu1 %v2184_v12 }
 0xa04   : > { %2250 = vmatpush1.bf16.msra.mxu1 %v2183_v13 }
 0xa07   : > { %5026 = vmatmul.mubr.msk.bf16.vlgmr.msra.gmra.mxu1 %vm782_vm1, %v5348_v7 }
 0xa08   : > { %2277 = vmatprep.mubr.bf16.mxu1 %v5491_v2 }
 0xa0f   : > { %5027 = vmatmul.mubr.msk.bf16.gmra.mxu1 %vm782_vm1, %v5349_v14 }
 0xa10   : > { %2287 = vmatprep.mubr.bf16.mxu1 %v5491_v2 }
 0xa17   : > { %5028 = vmatmul.mubr.msk.bf16.gmra.mxu1 %vm782_vm1, %v5350_v57 }
 0xa18   : > { %2297 = vmatprep.mubr.bf16.mxu1 %v5491_v2 }
 0xa1f   : > { %5029 = vmatmul.mubr.msk.bf16.gmra.mxu1 %vm782_vm1, %v5351_v15 }
 0xa20   : > { %2307 = vmatprep.mubr.bf16.mxu1 %v5491_v2 }
 0xa27   : > { %5030 = vmatmul.mubr.msk.bf16.gmra.mxu1 %vm782_vm1, %v5352_v16 }
 0xa28   : > { %2317 = vmatprep.mubr.bf16.mxu1 %v5491_v2 }
 0xa2f   : > { %5031 = vmatmul.mubr.msk.bf16.gmra.mxu1 %vm782_vm1, %v5353_v17 }
 0xa30   : > { %2926 = vmatprep.mubr.bf16.mxu1 %v5491_v2 }
 0xac7   : > { %v2269_v3 = vpop.f32.mrf.mxu1 }
 0xac8   : > { %2360 = vrot.lane.b32.xlu1 %v2269_v3, %s7660_s25 }
 0xac9   : > { %v2271_v18 = vpop.f32.mrf.mxu1 }
 0xacb   : > { %v2273_v19 = vpop.f32.mrf.mxu1 }
 0xacc   : > { %2368 = vrot.lane.b32.xlu1 %v2271_v18, %s7660_s25  ;;  %2362 = vrot.lane.b32.xlu0 %v2273_v19, %s7660_s25 }
 0xacd   : > { %v2275_v20 = vpop.f32.mrf.mxu1 }
 0xacf   : > { %v2279_v21 = vpop.f32.mrf.mxu1 }
 0xad0   : > { %2370 = vrot.lane.b32.xlu0 %v2275_v20, %s7660_s25  ;;  %2364 = vrot.lane.b32.xlu1 %v2279_v21, %s7660_s25 }
 0xad1   : > { %v2281_v22 = vpop.f32.mrf.mxu1 }
 0xad3   : > { %v2283_v23 = vpop.f32.mrf.mxu1 }
 0xad4   : > { %2372 = vrot.lane.b32.xlu1 %v2281_v22, %s7660_s25  ;;  %2366 = vrot.lane.b32.xlu0 %v2283_v23, %s7660_s25 }
 0xad5   : > { %v2285_v24 = vpop.f32.mrf.mxu1 }
 0xad7   : > { %v2289_v25 = vpop.f32.mrf.mxu1 }
 0xad8   : > { %2374 = vrot.lane.b32.xlu0 %v2285_v24, %s7660_s25  ;;  %v2352_v13 = vadd.f32 %v2335_v28, %v2289_v25 }
 0xad9   : > { %v2291_v35 = vpop.f32.mrf.mxu1 }
 0xada   : > { %v2353_v15 = vadd.f32 %v2335_v28, %v2291_v35 }
 0xadb   : > { %v2293_v8 = vpop.f32.mrf.mxu1 }
 0xadc   : > { %v2354_v16 = vadd.f32 %v2340_v60, %v2293_v8 }
 0xadd   : > { %v2295_v36 = vpop.f32.mrf.mxu1 }
 0xade   : > { %v2355_v18 = vadd.f32 %v2340_v60, %v2295_v36 }
 0xadf   : > { %v2299_v40 = vpop.f32.mrf.mxu1 }
 0xae0   : > { %v2356_v19 = vadd.f32 %v2345_v30, %v2299_v40 }
 0xae1   : > { %v2301_v32 = vpop.f32.mrf.mxu1 }
 0xae2   : > { %v2357_v22 = vadd.f32 %v2345_v30, %v2301_v32 }
 0xae3   : > { %v2303_v34 = vpop.f32.mrf.mxu1 }
 0xae4   : > { %v2358_v23 = vadd.f32 %v2350_v31, %v2303_v34 }
 0xae5   : > { %v6416_v45 = vpop.f32.mrf.mxu1 }
 0xae7   : > { %v2309_v46 = vpop.f32.mrf.mxu1 }
 0xae8   : > { %2400 = vrot.lane.b32.xlu1 %v2309_v46, %s7661_s0 }
 0xae9   : > { %v2311_v26 = vpop.f32.mrf.mxu1 }
 0xaeb   : > { %v2313_v41 = vpop.f32.mrf.mxu1 }
 0xaec   : > { %2402 = vrot.lane.b32.xlu0 %v2313_v41, %s7661_s0 }
 0xaed   : > { %v2315_v44 = vpop.f32.mrf.mxu1 }
 0xaef   : > { %v2319_v51 = vpop.f32.mrf.mxu1 }
 0xaf0   : > { %2404 = vrot.lane.b32.xlu1 %v2319_v51, %s7661_s0  ;;  %v2359_v51 = vadd.f32 %v2350_v31, %v6416_v45 }
 0xaf1   : > { %v2321_v52 = vpop.f32.mrf.mxu1 }
 0xaf3   : > { %v2323_v54 = vpop.f32.mrf.mxu1 }
 0xaf4   : > { %2412 = vrot.lane.b32.xlu1 %v2321_v52, %s7661_s0  ;;  %2406 = vrot.lane.b32.xlu0 %v2323_v54, %s7661_s0 }
 0xaf5   : > { %v2325_v55 = vpop.f32.mrf.mxu1 }
 0xaf8   : > { %2408 = vrot.lane.b32.xlu1 %v2311_v26, %s7661_s0  ;;  %2414 = vrot.lane.b32.xlu0 %v2325_v55, %s7661_s0 }
 0xafc   : > { %2472 = vperm.xlu1 %5316, %v2458_v42   ;;  %2410 = vrot.lane.b32.xlu0 %v2315_v44, %s7661_s0 }
 0xb00   : > { %2462 = vperm.xlu1 %5316, %v2456_v56   ;;  %2477 = vperm.xlu0 %5315, %v2459_v49  }
 0xb04   : > { %2740 = vperm.xlu1 %5316, %v5062_v50   ;;  %2467 = vperm.xlu0 %5315, %v2457_v39  }
 0xb08   : > { %2730 = vperm.xlu1 %5316, %v5060_v29   ;;  %2745 = vperm.xlu0 %5315, %v5063_v47  }
 0xb0c   : > { %2735 = vperm.xlu0 %5315, %v5061_v53  }
 0xb3a   : > { %v2361_v43 = vpop.permute.xlu1 %2360 }
 0xb3e   : > { %v2363_v61 = vpop.permute.xlu0 %2362  ;;  %v2369_v63 = vpop.permute.xlu1 %2368 }
 0xb3f   : > { %v2380_v17 = vsel %vm944_vm2, %v2369_v63, %v2361_v43  ;;  %v2376_v24 = vsel %vm944_vm2, %v2361_v43, %v2369_v63 }
 0xb40   : > { %v2384_v35 = vsel %vm926_vm3, %v2380_v17, 0.0  ;;  %v2385_v42 = vsel %vm926_vm3, %v2376_v24, 0.0 }
 0xb41   : > { %v2392_v56 = vadd.f32 %v2384_v35, %v2352_v13 }
 0xb42   : > { %v2371_v37 = vpop.permute.xlu0 %2370  ;;  %v2365_v9 = vpop.permute.xlu1 %2364 }
 0xb43   : > { %v2377_v8 = vsel %vm944_vm2, %v2363_v61, %v2371_v37  ;;  %v2381_v36 = vsel %vm944_vm2, %v2371_v37, %v2363_v61 }
 0xb44   : > { %v2386_v49 = vsel %vm926_vm3, %v2381_v36, 0.0  ;;  %v2387_v39 = vsel %vm926_vm3, %v2377_v8, 0.0 }
 0xb46   : > { %v2367_v4 = vpop.permute.xlu0 %2366  ;;  %v2373_v11 = vpop.permute.xlu1 %2372 }
 0xb47   : > { %v2382_v7 = vsel %vm944_vm2, %v2373_v11, %v2365_v9  ;;  %v2378_v3 = vsel %vm944_vm2, %v2365_v9, %v2373_v11 }
 0xb48   : > { %v2388_v25 = vsel %vm926_vm3, %v2382_v7, 0.0  ;;  %v2389_v40 = vsel %vm926_vm3, %v2378_v3, 0.0  ;;  %v2394_v7 = vadd.f32 %v2386_v49, %v2354_v16 }
 0xb49   : > { %v2396_v52 = vadd.f32 %v2388_v25, %v2356_v19  ;;  %v2397_v50 = vadd.f32 %v2389_v40, %v2357_v22 }
 0xb4a   : > { %v2375_v5 = vpop.permute.xlu0 %2374 }
 0xb4b   : > { %v2379_v20 = vsel %vm944_vm2, %v2367_v4, %v2375_v5  ;;  %v2383_v21 = vsel %vm944_vm2, %v2375_v5, %v2367_v4  ;;  %v2393_v4 = vadd.f32 %v2385_v42, %v2353_v15 }
 0xb4c   : > { %v2390_v46 = vsel %vm926_vm3, %v2383_v21, 0.0  ;;  %v2391_v26 = vsel %vm926_vm3, %v2379_v20, 0.0 }
 0xb4d   : > { %v2398_v29 = vadd.f32 %v2390_v46, %v2358_v23  ;;  %v2399_v45 = vadd.f32 %v2391_v26, %v2359_v51  ;;  %v5354_v26 = vld [vmem:[%s7606_s14] sm:$0xff]  }
 0xb5a   : > { %v2401_v12 = vpop.permute.xlu1 %2400 }
 0xb5e   : > { %v2403_v14 = vpop.permute.xlu0 %2402 }
 0xb62   : > { %v2405_v57 = vpop.permute.xlu1 %2404 }
 0xb66   : > { %v2407_v32 = vpop.permute.xlu0 %2406  ;;  %v2413_v34 = vpop.permute.xlu1 %2412 }
 0xb67   : > { %v2418_v41 = vsel %vm973_vm4, %v2405_v57, %v2413_v34  ;;  %v2422_v44 = vsel %vm973_vm4, %v2413_v34, %v2405_v57  ;;  %v2395_v57 = vadd.f32 %v2387_v39, %v2355_v18 }
 0xb68   : > { %v2428_v54 = vsel %vm973_vm4, %v2418_v41, 0.0  ;;  %v2429_v55 = vsel %vm973_vm4, %v2422_v44, 0.0  ;;  %v5355_v41 = vld [vmem:[%s7606_s14 + $0x8] sm:$0xff]  }
 0xb69   : > { %v2436_v47 = vadd.f32 %v2428_v54, %v2396_v52  ;;  %v2437_v31 = vadd.f32 %v2429_v55, %v2397_v50 }
 0xb6a   : > { %v2415_v53 = vpop.permute.xlu0 %2414  ;;  %v2409_v30 = vpop.permute.xlu1 %2408 }
 0xb6b   : > { %v2419_v28 = vsel %vm973_vm4, %v2407_v32, %v2415_v53  ;;  %v2423_v60 = vsel %vm973_vm4, %v2415_v53, %v2407_v32  ;;  %v2416_v43 = vsel %vm973_vm4, %v2401_v12, %v2409_v30  ;;  %v2420_v37 = vsel %vm973_vm4, %v2409_v30, %v2401_v12 }
 0xb6c   : > { %v2430_v61 = vsel %vm973_vm4, %v2419_v28, 0.0  ;;  %v2431_v63 = vsel %vm973_vm4, %v2423_v60, 0.0  ;;  %v2424_v9 = vsel %vm973_vm4, %v2416_v43, 0.0  ;;  %v2425_v13 = vsel %vm973_vm4, %v2420_v37, 0.0 }
 0xb6d   : > { %v2438_v11 = vadd.f32 %v2430_v61, %v2398_v29  ;;  %v2439_v5 = vadd.f32 %v2431_v63, %v2399_v45  ;;  %v2444_v17 = vmax.f32 %v2436_v47, 0.0  ;;  %v2432_v3 = vadd.f32 %v2424_v9, %v2392_v56 }
 0xb6e   : > { %v2411_v19 = vpop.permute.xlu0 %2410  ;;  %v2433_v21 = vadd.f32 %v2425_v13, %v2393_v4  ;;  %v2445_v24 = vmax.f32 %v2437_v31, 0.0 }
 0xb6f   : > { %v2446_v20 = vmax.f32 %v2438_v11, 0.0  ;;  %v2417_v22 = vsel %vm973_vm4, %v2403_v14, %v2411_v19  ;;  %v2421_v12 = vsel %vm973_vm4, %v2411_v19, %v2403_v14  ;;  %v2447_v16 = vmax.f32 %v2439_v5, 0.0 }
 0xb70   : > { %v2426_v15 = vsel %vm973_vm4, %v2417_v22, 0.0  ;;  %v2427_v23 = vsel %vm973_vm4, %v2421_v12, 0.0  ;;  %v2440_v36 = vmax.f32 %v2432_v3, 0.0  ;;  %v2441_v32 = vmax.f32 %v2433_v21, 0.0  ;;  %v5357_v21 = vld [vmem:[%s7659_s22 + $0x38] sm:$0xff]   ;;  %v5358_v22 = vld [vmem:[%s7659_s22 + $0x40] sm:$0xff]  }
 0xb71   : > { %v2434_v18 = vadd.f32 %v2426_v15, %v2394_v7  ;;  %v2435_v25 = vadd.f32 %v2427_v23, %v2395_v57  ;;  %v2454_v35 = vpack.c.bf16 %v2446_v20, %v2444_v17  ;;  %v2455_v8 = vpack.c.bf16 %v2447_v16, %v2445_v24  ;;  %v5356_v20 = vld [vmem:[%s7659_s22 + $0x30] sm:$0xff]   ;;  %v5359_v12 = vld [vmem:[%s7659_s22 + $0x48] sm:$0xff]   ;;  %v5361_v23 = vld [vmem:[%s7659_s22 + $0x58] sm:$0xff]  }
 0xb72   : > { %v5360_v15 = vld [vmem:[%s7659_s22 + $0x50] sm:$0xff]  }
 0xb73   : > { %v2442_v40 = vmax.f32 %v2434_v18, 0.0  ;;  %v2443_v34 = vmax.f32 %v2435_v25, 0.0  ;;  %2508 = vmatprep.subr.bf16.mxu0 %v2455_v8 }
 0xb74   : > { %2509 = vmatpush1.bf16.msra.mxu0 %v2454_v35 }
 0xb75   : > { %v2453_v46 = vpack.c.bf16 %v2443_v34, %v2441_v32  ;;  %v2452_v14 = vpack.c.bf16 %v2442_v40, %v2440_v36 }
 0xb77   : > { %2510 = vmatprep.subr.bf16.mxu0 %v2453_v46  ;;  %v2473_v55 = vpop.permute.xlu1 %2472 }
 0xb78   : > { %2511 = vmatpush1.bf16.msra.mxu0 %v2452_v14 }
 0xb7b   : > { %5034 = vmatmul.mubr.msk.bf16.vlgmr.msra.gmra.mxu0 %vm782_vm1, %v5354_v26  ;;  %v2478_v52 = vpop.permute.xlu0 %2477  ;;  %v2463_v45 = vpop.permute.xlu1 %2462 }
 0xb7c   : > { %2538 = vmatprep.mubr.bf16.mxu0 %v5491_v2 }
 0xb7f   : > { %v2468_v49 = vpop.permute.xlu0 %2467 }
 0xb83   : > { %5035 = vmatmul.mubr.msk.bf16.gmra.mxu0 %vm782_vm1, %v5355_v41 }
 0xb84   : > { %2662 = vmatprep.mubr.bf16.mxu0 %v5491_v2 }
 0xc3b   : > { %v2530_v44 = vpop.f32.mrf.mxu0 }
 0xc3c   : > { %v2531_v9 = vadd.f32 %v2530_v44, %v2463_v45 }
 0xc3d   : > { %v2532_v51 = vpop.f32.mrf.mxu0 }
 0xc3e   : > { %v2533_v30 = vadd.f32 %v2532_v51, %v2463_v45  ;;  %v5068_v45 = vld [vmem:[%s7607_s15 + $0x20] sm:$0xff] }
 0xc3f   : > { %v2534_v54 = vpop.f32.mrf.mxu0 }
 0xc40   : > { %v2535_v28 = vadd.f32 %v2534_v54, %v2468_v49  ;;  %v2550_v11 = vadd.f32 %v2533_v30, %v6364_v10  ;;  %v5069_v30 = vld [vmem:[%s7607_s15 + $0x28] sm:$0xff] }
 0xc41   : > { %v2536_v42 = vpop.f32.mrf.mxu0 }
 0xc42   : > { %v2537_v39 = vadd.f32 %v2536_v42, %v2468_v49  ;;  %v2551_v13 = vadd.f32 %v2535_v28, %v6368_v48  ;;  %v5103_v28 = vld [vmem:[%s7605_s13 + $0x58] sm:$0xff] }
 0xc43   : > { %v2540_v56 = vpop.f32.mrf.mxu0 }
 0xc44   : > { %v2541_v47 = vadd.f32 %v2540_v56, %v2473_v55  ;;  %v2552_v43 = vadd.f32 %v2537_v39, %v6356_v1  ;;  %v6554_v48 = vmul.f32 %v2551_v13, %v5887_v33 }
 0xc45   : > { %v2542_v50 = vpop.f32.mrf.mxu0 }
 0xc46   : > { %v2543_v29 = vadd.f32 %v2542_v50, %v2473_v55  ;;  %v2553_v4 = vadd.f32 %v2541_v47, %v6362_v62  ;;  %v6536_v57 = vmul.f32 %v2552_v43, %v5891_v38  ;;  %v5071_v47 = vld [vmem:[%s7607_s15 + $0x38] sm:$0xff]  ;;  %v2741_v43 = vpop.permute.xlu1 %2740 }
 0xc47   : > { %v2544_v53 = vpop.f32.mrf.mxu0 }
 0xc48   : > { %v2545_v31 = vadd.f32 %v2544_v53, %v2478_v52  ;;  %v2554_v61 = vadd.f32 %v2543_v29, %v6358_v58  ;;  %v2549_v58 = vadd.f32 %v2531_v9, %v6374_v6  ;;  %v6546_v62 = vmul.f32 %v2553_v4, %v5887_v33  ;;  %v5070_v29 = vld [vmem:[%s7607_s15 + $0x30] sm:$0xff] }
 0xc49   : > { %v2546_v60 = vpop.f32.mrf.mxu0  ;;  %v5102_v53 = vld [vmem:[%s7605_s13 + $0x50] sm:$0xff] }
 0xc4a   : > { %v2555_v63 = vadd.f32 %v2545_v31, %v6354_v0  ;;  %v2547_v37 = vadd.f32 %v2546_v60, %v2478_v52  ;;  %v6539_v1 = vmul.f32 %v2554_v61, %v5891_v38  ;;  %v6561_v6 = vmul.f32 %v2549_v58, %v5887_v33  ;;  %v5100_v31 = vld [vmem:[%s7605_s13 + $0x40] sm:$0xff]  ;;  %v5101_v60 = vld [vmem:[%s7605_s13 + $0x48] sm:$0xff]  ;;  %v2746_v61 = vpop.permute.xlu0 %2745 }
 0xc4c   : > { %v2556_v5 = vadd.f32 %v2547_v37, %v6360_v59  ;;  %v6533_v7 = vmul.f32 %v2555_v63, %v5887_v33  ;;  %v6549_v59 = vmul.f32 %v2550_v11, %v5891_v38  ;;  %v2578_v19 = vpack.c.bf16 %v6554_v48, %v6561_v6  ;;  %v2731_v63 = vpop.permute.xlu1 %2730 }
 0xc4e   : > { %v6542_v0 = vmul.f32 %v2556_v5, %v5891_v38  ;;  %v2580_v17 = vpack.c.bf16 %v6533_v7, %v6546_v62  ;;  %v2579_v3 = vpack.c.bf16 %v6536_v57, %v6549_v59  ;;  %v2736_v37 = vpop.permute.xlu0 %2735 }
 0xc50   : > { %v2581_v10 = vpack.c.bf16 %v6542_v0, %v6539_v1 }
 0xc52   : > { %2642 = vmatprep.subr.bf16.mxu0 %v2581_v10 }
 0xc53   : > { %2643 = vmatpush1.bf16.msra.mxu0 %v2580_v17 }
 0xc54   : > { %2644 = vmatprep.subr.bf16.mxu0 %v2579_v3 }
 0xc57   : > { %2645 = vmatpush1.bf16.msra.mxu0 %v2578_v19 }
 0xc5a   : > { %5054 = vmatmul.mubr.msk.bf16.vlgmr.msra.gmra.mxu0 %vm782_vm1, %v5356_v20 }
 0xc5b   : > { %2672 = vmatprep.mubr.bf16.mxu0 %v5491_v2 }
 0xc62   : > { %5055 = vmatmul.mubr.msk.bf16.gmra.mxu0 %vm782_vm1, %v5357_v21 }
 0xc63   : > { %2682 = vmatprep.mubr.bf16.mxu0 %v5491_v2 }
 0xc6a   : > { %5056 = vmatmul.mubr.msk.bf16.gmra.mxu0 %vm782_vm1, %v5358_v22 }
 0xc6b   : > { %2692 = vmatprep.mubr.bf16.mxu0 %v5491_v2 }
 0xc72   : > { %5057 = vmatmul.mubr.msk.bf16.gmra.mxu0 %vm782_vm1, %v5359_v12 }
 0xc73   : > { %2702 = vmatprep.mubr.bf16.mxu0 %v5491_v2 }
 0xc7a   : > { %5058 = vmatmul.mubr.msk.bf16.gmra.mxu0 %vm782_vm1, %v5360_v15 }
 0xc7b   : > { %2712 = vmatprep.mubr.bf16.mxu0 %v5491_v2 }
 0xc82   : > { %5059 = vmatmul.mubr.msk.bf16.gmra.mxu0 %vm782_vm1, %v5361_v23 }
 0xc83   : > { %3324 = vmatprep.mubr.bf16.mxu0 %v5491_v2 }
 0xd1a   : > { %v2664_v24 = vpop.f32.mrf.mxu0 }
 0xd1b   : > { %2756 = vrot.lane.b32.xlu1 %v2664_v24, %s7662_s24 }
 0xd1c   : > { %v2666_v16 = vpop.f32.mrf.mxu0 }
 0xd1e   : > { %v2668_v18 = vpop.f32.mrf.mxu0 }
 0xd1f   : > { %2764 = vrot.lane.b32.xlu1 %v2666_v16, %s7662_s24  ;;  %2758 = vrot.lane.b32.xlu0 %v2668_v18, %s7662_s24 }
 0xd20   : > { %v2670_v25 = vpop.f32.mrf.mxu0 }
 0xd22   : > { %v2674_v35 = vpop.f32.mrf.mxu0 }
 0xd23   : > { %2766 = vrot.lane.b32.xlu0 %v2670_v25, %s7662_s24  ;;  %2760 = vrot.lane.b32.xlu1 %v2674_v35, %s7662_s24 }
 0xd24   : > { %v2676_v8 = vpop.f32.mrf.mxu0 }
 0xd26   : > { %v2678_v36 = vpop.f32.mrf.mxu0 }
 0xd27   : > { %2768 = vrot.lane.b32.xlu1 %v2676_v8, %s7662_s24  ;;  %2762 = vrot.lane.b32.xlu0 %v2678_v36, %s7662_s24 }
 0xd28   : > { %v2680_v40 = vpop.f32.mrf.mxu0 }
 0xd2a   : > { %v2684_v32 = vpop.f32.mrf.mxu0 }
 0xd2b   : > { %2770 = vrot.lane.b32.xlu0 %v2680_v40, %s7662_s24  ;;  %v2748_v19 = vadd.f32 %v2731_v63, %v2684_v32 }
 0xd2c   : > { %v2686_v34 = vpop.f32.mrf.mxu0 }
 0xd2d   : > { %v2749_v12 = vadd.f32 %v2731_v63, %v2686_v34 }
 0xd2e   : > { %v2688_v46 = vpop.f32.mrf.mxu0 }
 0xd2f   : > { %v2750_v15 = vadd.f32 %v2736_v37, %v2688_v46 }
 0xd30   : > { %v2690_v14 = vpop.f32.mrf.mxu0 }
 0xd31   : > { %v2751_v16 = vadd.f32 %v2736_v37, %v2690_v14 }
 0xd32   : > { %v2694_v26 = vpop.f32.mrf.mxu0 }
 0xd33   : > { %v2752_v18 = vadd.f32 %v2741_v43, %v2694_v26 }
 0xd34   : > { %v2696_v41 = vpop.f32.mrf.mxu0 }
 0xd35   : > { %v2753_v8 = vadd.f32 %v2741_v43, %v2696_v41 }
 0xd36   : > { %v2698_v44 = vpop.f32.mrf.mxu0 }
 0xd37   : > { %v2754_v36 = vadd.f32 %v2746_v61, %v2698_v44 }
 0xd38   : > { %v6603_v51 = vpop.f32.mrf.mxu0 }
 0xd3a   : > { %v2704_v52 = vpop.f32.mrf.mxu0 }
 0xd3b   : > { %2796 = vrot.lane.b32.xlu1 %v2704_v52, %s7663_s2 }
 0xd3c   : > { %v2706_v54 = vpop.f32.mrf.mxu0 }
 0xd3e   : > { %v2708_v55 = vpop.f32.mrf.mxu0 }
 0xd3f   : > { %2798 = vrot.lane.b32.xlu0 %v2708_v55, %s7663_s2 }
 0xd40   : > { %v2710_v42 = vpop.f32.mrf.mxu0 }
 0xd42   : > { %v2714_v56 = vpop.f32.mrf.mxu0 }
 0xd43   : > { %2800 = vrot.lane.b32.xlu1 %v2714_v56, %s7663_s2  ;;  %v2755_v56 = vadd.f32 %v2746_v61, %v6603_v51 }
 0xd44   : > { %v2716_v49 = vpop.f32.mrf.mxu0 }
 0xd46   : > { %v2718_v50 = vpop.f32.mrf.mxu0 }
 0xd47   : > { %2808 = vrot.lane.b32.xlu1 %v2716_v49, %s7663_s2  ;;  %2802 = vrot.lane.b32.xlu0 %v2718_v50, %s7663_s2 }
 0xd48   : > { %v2720_v39 = vpop.f32.mrf.mxu0 }
 0xd4b   : > { %2804 = vrot.lane.b32.xlu1 %v2706_v54, %s7663_s2  ;;  %2810 = vrot.lane.b32.xlu0 %v2720_v39, %s7663_s2 }
 0xd4f   : > { %2870 = vperm.xlu1 %5316, %v5070_v29   ;;  %2806 = vrot.lane.b32.xlu0 %v2710_v42, %s7663_s2 }
 0xd53   : > { %2860 = vperm.xlu1 %5316, %v5068_v45   ;;  %2875 = vperm.xlu0 %5315, %v5071_v47  }
 0xd57   : > { %3138 = vperm.xlu1 %5316, %v5102_v53   ;;  %2865 = vperm.xlu0 %5315, %v5069_v30  }
 0xd5b   : > { %3128 = vperm.xlu1 %5316, %v5100_v31   ;;  %3143 = vperm.xlu0 %5315, %v5103_v28  }
 0xd5f   : > { %3133 = vperm.xlu0 %5315, %v5101_v60  }
 0xd8d   : > { %v2757_v9 = vpop.permute.xlu1 %2756 }
 0xd91   : > { %v2759_v4 = vpop.permute.xlu0 %2758  ;;  %v2765_v11 = vpop.permute.xlu1 %2764 }
 0xd92   : > { %v2776_v23 = vsel %vm1354_vm8, %v2765_v11, %v2757_v9  ;;  %v2772_v40 = vsel %vm1354_vm8, %v2757_v9, %v2765_v11 }
 0xd93   : > { %v2780_v34 = vsel %vm1336_vm10, %v2776_v23, 0.0  ;;  %v2781_v29 = vsel %vm1336_vm10, %v2772_v40, 0.0 }
 0xd94   : > { %v2788_v45 = vadd.f32 %v2780_v34, %v2748_v19 }
 0xd95   : > { %v2767_v5 = vpop.permute.xlu0 %2766  ;;  %v2761_v13 = vpop.permute.xlu1 %2760 }
 0xd96   : > { %v2773_v46 = vsel %vm1354_vm8, %v2759_v4, %v2767_v5  ;;  %v2777_v14 = vsel %vm1354_vm8, %v2767_v5, %v2759_v4 }
 0xd97   : > { %v2782_v47 = vsel %vm1336_vm10, %v2777_v14, 0.0  ;;  %v2783_v30 = vsel %vm1336_vm10, %v2773_v46, 0.0 }
 0xd99   : > { %v2763_v58 = vpop.permute.xlu0 %2762  ;;  %v2769_v10 = vpop.permute.xlu1 %2768 }
 0xd9a   : > { %v2778_v20 = vsel %vm1354_vm8, %v2769_v10, %v2761_v13  ;;  %v2774_v24 = vsel %vm1354_vm8, %v2761_v13, %v2769_v10 }
 0xd9b   : > { %v2784_v32 = vsel %vm1336_vm10, %v2778_v20, 0.0  ;;  %v2785_v26 = vsel %vm1336_vm10, %v2774_v24, 0.0  ;;  %v2790_v20 = vadd.f32 %v2782_v47, %v2750_v15 }
 0xd9c   : > { %v2792_v49 = vadd.f32 %v2784_v32, %v2752_v18  ;;  %v2793_v53 = vadd.f32 %v2785_v26, %v2753_v8 }
 0xd9d   : > { %v2771_v17 = vpop.permute.xlu0 %2770 }
 0xd9e   : > { %v2775_v25 = vsel %vm1354_vm8, %v2763_v58, %v2771_v17  ;;  %v2779_v35 = vsel %vm1354_vm8, %v2771_v17, %v2763_v58  ;;  %v2789_v58 = vadd.f32 %v2781_v29, %v2749_v12 }
 0xd9f   : > { %v2786_v52 = vsel %vm1336_vm10, %v2779_v35, 0.0  ;;  %v2787_v54 = vsel %vm1336_vm10, %v2775_v25, 0.0 }
 0xda0   : > { %v2794_v31 = vadd.f32 %v2786_v52, %v2754_v36  ;;  %v2795_v51 = vadd.f32 %v2787_v54, %v2755_v56  ;;  %v5362_v54 = vld [vmem:[%s7606_s14 + $0x10] sm:$0xff]  }
 0xdad   : > { %v2797_v3 = vpop.permute.xlu1 %2796 }
 0xdb1   : > { %v2799_v21 = vpop.permute.xlu0 %2798 }
 0xdb5   : > { %v2801_v22 = vpop.permute.xlu1 %2800 }
 0xdb9   : > { %v2803_v41 = vpop.permute.xlu0 %2802  ;;  %v2809_v44 = vpop.permute.xlu1 %2808 }
 0xdba   : > { %v2814_v55 = vsel %vm1383_vm9, %v2801_v22, %v2809_v44  ;;  %v2818_v42 = vsel %vm1383_vm9, %v2809_v44, %v2801_v22  ;;  %v2791_v22 = vadd.f32 %v2783_v30, %v2751_v16 }
 0xdbb   : > { %v2824_v50 = vsel %vm1383_vm9, %v2814_v55, 0.0  ;;  %v2825_v39 = vsel %vm1383_vm9, %v2818_v42, 0.0  ;;  %v5363_v55 = vld [vmem:[%s7606_s14 + $0x18] sm:$0xff]  }
 0xdbc   : > { %v2832_v28 = vadd.f32 %v2824_v50, %v2792_v49  ;;  %v2833_v61 = vadd.f32 %v2825_v39, %v2793_v53 }
 0xdbd   : > { %v2811_v60 = vpop.permute.xlu0 %2810  ;;  %v2805_v43 = vpop.permute.xlu1 %2804 }
 0xdbe   : > { %v2815_v63 = vsel %vm1383_vm9, %v2803_v41, %v2811_v60  ;;  %v2819_v37 = vsel %vm1383_vm9, %v2811_v60, %v2803_v41  ;;  %v2812_v9 = vsel %vm1383_vm9, %v2797_v3, %v2805_v43  ;;  %v2816_v5 = vsel %vm1383_vm9, %v2805_v43, %v2797_v3 }
 0xdbf   : > { %v2826_v4 = vsel %vm1383_vm9, %v2815_v63, 0.0  ;;  %v2827_v11 = vsel %vm1383_vm9, %v2819_v37, 0.0  ;;  %v2820_v13 = vsel %vm1383_vm9, %v2812_v9, 0.0  ;;  %v2821_v19 = vsel %vm1383_vm9, %v2816_v5, 0.0 }
 0xdc0   : > { %v2834_v10 = vadd.f32 %v2826_v4, %v2794_v31  ;;  %v2835_v17 = vadd.f32 %v2827_v11, %v2795_v51  ;;  %v2840_v23 = vmax.f32 %v2832_v28, 0.0  ;;  %v2828_v24 = vadd.f32 %v2820_v13, %v2788_v45 }
 0xdc1   : > { %v2807_v18 = vpop.permute.xlu0 %2806  ;;  %v2829_v35 = vadd.f32 %v2821_v19, %v2789_v58  ;;  %v2841_v40 = vmax.f32 %v2833_v61, 0.0 }
 0xdc2   : > { %v2842_v25 = vmax.f32 %v2834_v10, 0.0  ;;  %v2813_v8 = vsel %vm1383_vm9, %v2799_v21, %v2807_v18  ;;  %v2817_v3 = vsel %vm1383_vm9, %v2807_v18, %v2799_v21  ;;  %v2843_v15 = vmax.f32 %v2835_v17, 0.0 }
 0xdc3   : > { %v2822_v12 = vsel %vm1383_vm9, %v2813_v8, 0.0  ;;  %v2823_v36 = vsel %vm1383_vm9, %v2817_v3, 0.0  ;;  %v2836_v14 = vmax.f32 %v2828_v24, 0.0  ;;  %v2837_v41 = vmax.f32 %v2829_v35, 0.0  ;;  %v5365_v35 = vld [vmem:[%s7659_s22 + $0x68] sm:$0xff]   ;;  %v5366_v8 = vld [vmem:[%s7659_s22 + $0x70] sm:$0xff]  }
 0xdc4   : > { %v2830_v16 = vadd.f32 %v2822_v12, %v2790_v20  ;;  %v2831_v32 = vadd.f32 %v2823_v36, %v2791_v22  ;;  %v2851_v34 = vpack.c.bf16 %v2842_v25, %v2840_v23  ;;  %v2852_v46 = vpack.c.bf16 %v2843_v15, %v2841_v40  ;;  %v5364_v25 = vld [vmem:[%s7659_s22 + $0x60] sm:$0xff]   ;;  %v5367_v3 = vld [vmem:[%s7659_s22 + $0x78] sm:$0xff]   ;;  %v5369_v36 = vld [vmem:[%s7659_s22 + $0x88] sm:$0xff]  }
 0xdc5   : > { %v5368_v12 = vld [vmem:[%s7659_s22 + $0x80] sm:$0xff]  }
 0xdc6   : > { %v2838_v26 = vmax.f32 %v2830_v16, 0.0  ;;  %v2839_v44 = vmax.f32 %v2831_v32, 0.0  ;;  %2906 = vmatprep.subr.bf16.mxu1 %v2852_v46 }
 0xdc7   : > { %2907 = vmatpush1.bf16.msra.mxu1 %v2851_v34 }
 0xdc8   : > { %v2850_v52 = vpack.c.bf16 %v2839_v44, %v2837_v41  ;;  %v2849_v21 = vpack.c.bf16 %v2838_v26, %v2836_v14 }
 0xdca   : > { %2908 = vmatprep.subr.bf16.mxu1 %v2850_v52  ;;  %v2871_v39 = vpop.permute.xlu1 %2870 }
 0xdcb   : > { %2909 = vmatpush1.bf16.msra.mxu1 %v2849_v21 }
 0xdce   : > { %5074 = vmatmul.mubr.msk.bf16.vlgmr.msra.gmra.mxu1 %vm782_vm1, %v5362_v54  ;;  %v2876_v49 = vpop.permute.xlu0 %2875  ;;  %v2861_v51 = vpop.permute.xlu1 %2860 }
 0xdcf   : > { %2936 = vmatprep.mubr.bf16.mxu1 %v5491_v2 }
 0xdd2   : > { %v2866_v47 = vpop.permute.xlu0 %2865 }
 0xdd6   : > { %5075 = vmatmul.mubr.msk.bf16.gmra.mxu1 %vm782_vm1, %v5363_v55 }
 0xdd7   : > { %3060 = vmatprep.mubr.bf16.mxu1 %v5491_v2 }
 0xe8e   : > { %v2928_v42 = vpop.f32.mrf.mxu1 }
 0xe8f   : > { %v2929_v13 = vadd.f32 %v2928_v42, %v2861_v51 }
 0xe90   : > { %v2930_v56 = vpop.f32.mrf.mxu1 }
 0xe91   : > { %v2931_v43 = vadd.f32 %v2930_v56, %v2861_v51  ;;  %v5108_v51 = vld [vmem:[%s7607_s15 + $0x40] sm:$0xff] }
 0xe92   : > { %v2932_v50 = vpop.f32.mrf.mxu1 }
 0xe93   : > { %v2933_v63 = vadd.f32 %v2932_v50, %v2866_v47  ;;  %v2948_v10 = vadd.f32 %v2931_v43, %v6549_v59  ;;  %v5109_v43 = vld [vmem:[%s7607_s15 + $0x48] sm:$0xff] }
 0xe94   : > { %v2934_v29 = vpop.f32.mrf.mxu1 }
 0xe95   : > { %v2935_v30 = vadd.f32 %v2934_v29, %v2866_v47  ;;  %v2949_v19 = vadd.f32 %v2933_v63, %v6554_v48  ;;  %v5125_v63 = vld [vmem:[%s7603_s11 + $0x30] sm:$0xff] }
 0xe96   : > { %v2938_v45 = vpop.f32.mrf.mxu1 }
 0xe97   : > { %v2939_v28 = vadd.f32 %v2938_v45, %v2871_v39  ;;  %v2950_v9 = vadd.f32 %v2935_v30, %v6536_v57  ;;  %v6741_v48 = vmul.f32 %v2949_v19, %v5887_v33 }
 0xe98   : > { %v2940_v53 = vpop.f32.mrf.mxu1 }
 0xe99   : > { %v2941_v31 = vadd.f32 %v2940_v53, %v2871_v39  ;;  %v2951_v58 = vadd.f32 %v2939_v28, %v6546_v62  ;;  %v6723_v22 = vmul.f32 %v2950_v9, %v5891_v38  ;;  %v5111_v28 = vld [vmem:[%s7607_s15 + $0x58] sm:$0xff]  ;;  %v5123_v9 = vld [vmem:[%s7603_s11 + $0x20] sm:$0xff] }
 0xe9a   : > { %v2942_v60 = vpop.f32.mrf.mxu1 }
 0xe9b   : > { %v2943_v61 = vadd.f32 %v2942_v60, %v2876_v49  ;;  %v2952_v4 = vadd.f32 %v2941_v31, %v6539_v1  ;;  %v2947_v1 = vadd.f32 %v2929_v13, %v6561_v6  ;;  %v6733_v62 = vmul.f32 %v2951_v58, %v5887_v33  ;;  %v5110_v31 = vld [vmem:[%s7607_s15 + $0x50] sm:$0xff]  ;;  %v3366_v60 = vld [vmem:[%s7609_s17] sm:$0xff]  ;;  %v3139_v58 = vpop.permute.xlu1 %3138 }
 0xe9c   : > { %v2944_v37 = vpop.f32.mrf.mxu1  ;;  %v5156_v13 = vld [vmem:[%s7605_s13 + $0x60] sm:$0xff] }
 0xe9d   : > { %v2953_v11 = vadd.f32 %v2943_v61, %v6533_v7  ;;  %v2945_v5 = vadd.f32 %v2944_v37, %v2876_v49  ;;  %v6726_v57 = vmul.f32 %v2952_v4, %v5891_v38  ;;  %v6748_v6 = vmul.f32 %v2947_v1, %v5887_v33  ;;  %v5126_v61 = vld [vmem:[%s7603_s11 + $0x38] sm:$0xff]  ;;  %v5124_v37 = vld [vmem:[%s7603_s11 + $0x28] sm:$0xff] }
 0xe9e   : > { %v5159_v4 = vld [vmem:[%s7605_s13 + $0x78] sm:$0xff] }
 0xe9f   : > { %v2954_v17 = vadd.f32 %v2945_v5, %v6542_v0  ;;  %v6720_v20 = vmul.f32 %v2953_v11, %v5887_v33  ;;  %v6736_v0 = vmul.f32 %v2948_v10, %v5891_v38  ;;  %v2976_v18 = vpack.c.bf16 %v6741_v48, %v6748_v6  ;;  %v5158_v11 = vld [vmem:[%s7605_s13 + $0x70] sm:$0xff]  ;;  %v5157_v5 = vld [vmem:[%s7605_s13 + $0x68] sm:$0xff]  ;;  %v3144_v10 = vpop.permute.xlu0 %3143 }
 0xea1   : > { %v6729_v7 = vmul.f32 %v2954_v17, %v5891_v38  ;;  %v2978_v23 = vpack.c.bf16 %v6720_v20, %v6733_v62  ;;  %v2977_v24 = vpack.c.bf16 %v6723_v22, %v6736_v0  ;;  %v3129_v17 = vpop.permute.xlu1 %3128 }
 0xea3   : > { %v2979_v59 = vpack.c.bf16 %v6729_v7, %v6726_v57  ;;  %v3134_v19 = vpop.permute.xlu0 %3133 }
 0xea5   : > { %3040 = vmatprep.subr.bf16.mxu1 %v2979_v59 }
 0xea6   : > { %3041 = vmatpush1.bf16.msra.mxu1 %v2978_v23 }
 0xea7   : > { %3042 = vmatprep.subr.bf16.mxu1 %v2977_v24 }
 0xeaa   : > { %3043 = vmatpush1.bf16.msra.mxu1 %v2976_v18 }
 0xead   : > { %5094 = vmatmul.mubr.msk.bf16.vlgmr.msra.gmra.mxu1 %vm782_vm1, %v5364_v25 }
 0xeae   : > { %3070 = vmatprep.mubr.bf16.mxu1 %v5491_v2 }
 0xeb5   : > { %5095 = vmatmul.mubr.msk.bf16.gmra.mxu1 %vm782_vm1, %v5365_v35 }
 0xeb6   : > { %3080 = vmatprep.mubr.bf16.mxu1 %v5491_v2 }
 0xebd   : > { %5096 = vmatmul.mubr.msk.bf16.gmra.mxu1 %vm782_vm1, %v5366_v8 }
 0xebe   : > { %3090 = vmatprep.mubr.bf16.mxu1 %v5491_v2 }
 0xec5   : > { %5097 = vmatmul.mubr.msk.bf16.gmra.mxu1 %vm782_vm1, %v5367_v3 }
 0xec6   : > { %3100 = vmatprep.mubr.bf16.mxu1 %v5491_v2 }
 0xecd   : > { %5098 = vmatmul.mubr.msk.bf16.gmra.mxu1 %vm782_vm1, %v5368_v12 }
 0xece   : > { %3110 = vmatprep.mubr.bf16.mxu1 %v5491_v2 }
 0xed5   : > { %5099 = vmatmul.mubr.msk.bf16.gmra.mxu1 %vm782_vm1, %v5369_v36 }
 0xed6   : > { %3925 = vmatprep.mubr.bf16.mxu1 %v5491_v2 }
 0xf6d   : > { %v3062_v40 = vpop.f32.mrf.mxu1 }
 0xf6e   : > { %3154 = vrot.lane.b32.xlu1 %v3062_v40, %s7664_s3 }
 0xf6f   : > { %v3064_v15 = vpop.f32.mrf.mxu1 }
 0xf71   : > { %v3066_v16 = vpop.f32.mrf.mxu1 }
 0xf72   : > { %3162 = vrot.lane.b32.xlu1 %v3064_v15, %s7664_s3  ;;  %3156 = vrot.lane.b32.xlu0 %v3066_v16, %s7664_s3 }
 0xf73   : > { %v3068_v32 = vpop.f32.mrf.mxu1 }
 0xf75   : > { %v3072_v34 = vpop.f32.mrf.mxu1 }
 0xf76   : > { %3164 = vrot.lane.b32.xlu0 %v3068_v32, %s7664_s3  ;;  %3158 = vrot.lane.b32.xlu1 %v3072_v34, %s7664_s3 }
 0xf77   : > { %v3074_v46 = vpop.f32.mrf.mxu1 }
 0xf79   : > { %v3076_v14 = vpop.f32.mrf.mxu1 }
 0xf7a   : > { %3166 = vrot.lane.b32.xlu1 %v3074_v46, %s7664_s3  ;;  %3160 = vrot.lane.b32.xlu0 %v3076_v14, %s7664_s3 }
 0xf7b   : > { %v3078_v26 = vpop.f32.mrf.mxu1 }
 0xf7d   : > { %v6789_v41 = vpop.f32.mrf.mxu1 }
 0xf7e   : > { %3168 = vrot.lane.b32.xlu0 %v3078_v26, %s7664_s3  ;;  %v3146_v40 = vadd.f32 %v3129_v17, %v6789_v41 }
 0xf7f   : > { %v6792_v44 = vpop.f32.mrf.mxu1 }
 0xf80   : > { %v3147_v15 = vadd.f32 %v3129_v17, %v6792_v44 }
 0xf81   : > { %v6794_v52 = vpop.f32.mrf.mxu1 }
 0xf83   : > { %v6796_v21 = vpop.f32.mrf.mxu1 }
 0xf84   : > { %v3149_v41 = vadd.f32 %v3134_v19, %v6796_v21 }
 0xf85   : > { %v6798_v54 = vpop.f32.mrf.mxu1 }
 0xf87   : > { %v6800_v55 = vpop.f32.mrf.mxu1 }
 0xf89   : > { %v6802_v42 = vpop.f32.mrf.mxu1 }
 0xf8b   : > { %v6804_v56 = vpop.f32.mrf.mxu1 }
 0xf8d   : > { %v3102_v49 = vpop.f32.mrf.mxu1 }
 0xf8e   : > { %3194 = vrot.lane.b32.xlu1 %v3102_v49, %s7665_s4  ;;  %v3148_v49 = vadd.f32 %v3134_v19, %v6794_v52 }
 0xf8f   : > { %v3104_v50 = vpop.f32.mrf.mxu1 }
 0xf91   : > { %v3106_v39 = vpop.f32.mrf.mxu1 }
 0xf92   : > { %3196 = vrot.lane.b32.xlu0 %v3106_v39, %s7665_s4  ;;  %v3150_v39 = vadd.f32 %v3139_v58, %v6798_v54 }
 0xf93   : > { %v3108_v29 = vpop.f32.mrf.mxu1 }
 0xf95   : > { %v3112_v45 = vpop.f32.mrf.mxu1 }
 0xf96   : > { %3198 = vrot.lane.b32.xlu1 %v3112_v45, %s7665_s4 }
 0xf97   : > { %v3114_v47 = vpop.f32.mrf.mxu1 }
 0xf99   : > { %v3116_v53 = vpop.f32.mrf.mxu1 }
 0xf9a   : > { %3206 = vrot.lane.b32.xlu1 %v3114_v47, %s7665_s4  ;;  %3200 = vrot.lane.b32.xlu0 %v3116_v53, %s7665_s4 }
 0xf9b   : > { %v3118_v30 = vpop.f32.mrf.mxu1 }
 0xf9e   : > { %3202 = vrot.lane.b32.xlu1 %v3104_v50, %s7665_s4  ;;  %3208 = vrot.lane.b32.xlu0 %v3118_v30, %s7665_s4 }
 0xfa2   : > { %3268 = vperm.xlu1 %5316, %v5110_v31   ;;  %3204 = vrot.lane.b32.xlu0 %v3108_v29, %s7665_s4  ;;  %v3151_v29 = vadd.f32 %v3139_v58, %v6800_v55 }
 0xfa6   : > { %3258 = vperm.xlu1 %5316, %v5108_v51   ;;  %3273 = vperm.xlu0 %5315, %v5111_v28  }
 0xfaa   : > { %3369 = vperm.xlu1 %5316, %v3366_v60   ;;  %3263 = vperm.xlu0 %5315, %v5109_v43  }
 0xfae   : > { %3486 = vperm.xlu1 %5316, %v5126_v61   ;;  %3481 = vperm.xlu0 %5315, %v5125_v63  }
 0xfb2   : > { %3476 = vperm.xlu1 %5316, %v5124_v37   ;;  %3471 = vperm.xlu0 %5315, %v5123_v9   ;;  %v3152_v9 = vadd.f32 %v3144_v10, %v6802_v42 }
 0xfb6   : > { %3744 = vperm.xlu1 %5316, %v5159_v4   ;;  %3739 = vperm.xlu0 %5315, %v5158_v11   ;;  %v3153_v4 = vadd.f32 %v3144_v10, %v6804_v56 }
 0xfba   : > { %3734 = vperm.xlu1 %5316, %v5157_v5   ;;  %3729 = vperm.xlu0 %5315, %v5156_v13  }
 0xfe0   : > { %v3155_v1 = vpop.permute.xlu1 %3154 }
 0xfe4   : > { %v3157_v59 = vpop.permute.xlu0 %3156  ;;  %v3163_v23 = vpop.permute.xlu1 %3162 }
 0xfe5   : > { %v3170_v34 = vsel %vm1766_vm11, %v3155_v1, %v3163_v23  ;;  %v3174_v46 = vsel %vm1766_vm11, %v3163_v23, %v3155_v1 }
 0xfe6   : > { %v3178_v52 = vsel %vm1748_vm13, %v3174_v46, 0.0  ;;  %v3179_v21 = vsel %vm1748_vm13, %v3170_v34, 0.0 }
 0xfe7   : > { %v3186_v11 = vadd.f32 %v3178_v52, %v3146_v40  ;;  %v3187_v5 = vadd.f32 %v3179_v21, %v3147_v15 }
 0xfe8   : > { %v3165_v24 = vpop.permute.xlu0 %3164  ;;  %v3159_v18 = vpop.permute.xlu1 %3158 }
 0xfe9   : > { %v3171_v14 = vsel %vm1766_vm11, %v3157_v59, %v3165_v24  ;;  %v3175_v26 = vsel %vm1766_vm11, %v3165_v24, %v3157_v59 }
 0xfea   : > { %v3180_v53 = vsel %vm1748_vm13, %v3175_v26, 0.0  ;;  %v3181_v54 = vsel %vm1748_vm13, %v3171_v14, 0.0 }
 0xfeb   : > { %v3188_v13 = vadd.f32 %v3180_v53, %v3148_v49  ;;  %v3189_v58 = vadd.f32 %v3181_v54, %v3149_v41 }
 0xfec   : > { %v3161_v25 = vpop.permute.xlu0 %3160  ;;  %v3167_v35 = vpop.permute.xlu1 %3166 }
 0xfed   : > { %v3172_v12 = vsel %vm1766_vm11, %v3159_v18, %v3167_v35  ;;  %v3176_v36 = vsel %vm1766_vm11, %v3167_v35, %v3159_v18 }
 0xfee   : > { %v3182_v44 = vsel %vm1748_vm13, %v3176_v36, 0.0  ;;  %v3183_v50 = vsel %vm1748_vm13, %v3172_v12, 0.0 }
 0xfef   : > { %v3190_v31 = vadd.f32 %v3182_v44, %v3150_v39  ;;  %v3191_v51 = vadd.f32 %v3183_v50, %v3151_v29 }
 0xff0   : > { %v3169_v8 = vpop.permute.xlu0 %3168 }
 0xff1   : > { %v3173_v45 = vsel %vm1766_vm11, %v3161_v25, %v3169_v8  ;;  %v3177_v47 = vsel %vm1766_vm11, %v3169_v8, %v3161_v25 }
 0xff2   : > { %v3184_v43 = vsel %vm1748_vm13, %v3177_v47, 0.0  ;;  %v3185_v61 = vsel %vm1748_vm13, %v3173_v45, 0.0 }
 0xff3   : > { %v3192_v23 = vadd.f32 %v3184_v43, %v3152_v9  ;;  %v3193_v24 = vadd.f32 %v3185_v61, %v3153_v4 }
0x1000   : > { %v3195_v3 = vpop.permute.xlu1 %3194 }
0x1004   : > { %v3197_v16 = vpop.permute.xlu0 %3196 }
0x1008   : > { %v3199_v32 = vpop.permute.xlu1 %3198 }
0x100c   : > { %v3201_v30 = vpop.permute.xlu0 %3200  ;;  %v3207_v55 = vpop.permute.xlu1 %3206 }
0x100d   : > { %v3212_v28 = vsel %vm1795_vm12, %v3199_v32, %v3207_v55  ;;  %v3216_v60 = vsel %vm1795_vm12, %v3207_v55, %v3199_v32 }
0x100e   : > { %v3222_v63 = vsel %vm1795_vm12, %v3212_v28, 0.0  ;;  %v3223_v37 = vsel %vm1795_vm12, %v3216_v60, 0.0 }
0x100f   : > { %v3230_v17 = vadd.f32 %v3222_v63, %v3190_v31  ;;  %v3231_v19 = vadd.f32 %v3223_v37, %v3191_v51  ;;  %v5371_v31 = vld [vmem:[%s7606_s14 + $0x28] sm:$0xff]  }
0x1010   : > { %v3209_v1 = vpop.permute.xlu0 %3208  ;;  %v3203_v59 = vpop.permute.xlu1 %3202 }
0x1011   : > { %v3213_v18 = vsel %vm1795_vm12, %v3201_v30, %v3209_v1  ;;  %v3217_v25 = vsel %vm1795_vm12, %v3209_v1, %v3201_v30  ;;  %v3210_v10 = vsel %vm1795_vm12, %v3195_v3, %v3203_v59  ;;  %v3214_v35 = vsel %vm1795_vm12, %v3203_v59, %v3195_v3 }
0x1012   : > { %v3224_v42 = vsel %vm1795_vm12, %v3213_v18, 0.0  ;;  %v3225_v56 = vsel %vm1795_vm12, %v3217_v25, 0.0  ;;  %v3218_v36 = vsel %vm1795_vm12, %v3210_v10, 0.0  ;;  %v3219_v40 = vsel %vm1795_vm12, %v3214_v35, 0.0 }
0x1013   : > { %v3232_v8 = vadd.f32 %v3224_v42, %v3192_v23  ;;  %v3233_v12 = vadd.f32 %v3225_v56, %v3193_v24  ;;  %v3238_v15 = vmax.f32 %v3230_v17, 0.0  ;;  %v3239_v32 = vmax.f32 %v3231_v19, 0.0 }
0x1014   : > { %v3226_v34 = vadd.f32 %v3218_v36, %v3186_v11  ;;  %v3227_v46 = vadd.f32 %v3219_v40, %v3187_v5  ;;  %v3205_v14 = vpop.permute.xlu0 %3204 }
0x1015   : > { %v3240_v26 = vmax.f32 %v3232_v8, 0.0  ;;  %v3241_v49 = vmax.f32 %v3233_v12, 0.0  ;;  %v3211_v41 = vsel %vm1795_vm12, %v3197_v16, %v3205_v14  ;;  %v3215_v3 = vsel %vm1795_vm12, %v3205_v14, %v3197_v16  ;;  %v5370_v16 = vld [vmem:[%s7606_s14 + $0x20] sm:$0xff]  }
0x1016   : > { %v3220_v44 = vsel %vm1795_vm12, %v3211_v41, 0.0  ;;  %v3221_v50 = vsel %vm1795_vm12, %v3215_v3, 0.0  ;;  %v3234_v52 = vmax.f32 %v3226_v34, 0.0  ;;  %v3235_v21 = vmax.f32 %v3227_v46, 0.0 }
0x1017   : > { %v3249_v39 = vpack.c.bf16 %v3240_v26, %v3238_v15  ;;  %v3228_v29 = vadd.f32 %v3220_v44, %v3188_v13  ;;  %v3229_v45 = vadd.f32 %v3221_v50, %v3189_v58  ;;  %v3250_v47 = vpack.c.bf16 %v3241_v49, %v3239_v32 }
0x1019   : > { %v3236_v53 = vmax.f32 %v3228_v29, 0.0  ;;  %v3237_v54 = vmax.f32 %v3229_v45, 0.0  ;;  %3304 = vmatprep.subr.bf16.mxu0 %v3250_v47 }
0x101a   : > { %3305 = vmatpush1.bf16.msra.mxu0 %v3249_v39 }
0x101b   : > { %v3247_v30 = vpack.c.bf16 %v3236_v53, %v3234_v52  ;;  %v3248_v55 = vpack.c.bf16 %v3237_v54, %v3235_v21 }
0x101d   : > { %3306 = vmatprep.subr.bf16.mxu0 %v3248_v55  ;;  %v3269_v61 = vpop.permute.xlu1 %3268 }
0x101e   : > { %3307 = vmatpush1.bf16.msra.mxu0 %v3247_v30 }
0x1021   : > { %5114 = vmatmul.mubr.msk.bf16.vlgmr.msra.gmra.mxu0 %vm782_vm1, %v5370_v16  ;;  %v3274_v60 = vpop.permute.xlu0 %3273  ;;  %v3259_v13 = vpop.permute.xlu1 %3258 }
0x1022   : > { %3334 = vmatprep.mubr.bf16.mxu0 %v5491_v2 }
0x1025   : > { %v3264_v9 = vpop.permute.xlu0 %3263  ;;  %v3370_v14 = vpop.permute.xlu1 %3369 }
0x1029   : > { %5115 = vmatmul.mubr.msk.bf16.gmra.mxu0 %vm782_vm1, %v5371_v31 }
0x102a   : > { %3407 = vmatprep.mubr.bf16.mxu0 %v5491_v2 }
0x10e1   : > { %v3326_v51 = vpop.f32.mrf.mxu0 }
0x10e2   : > { %v3327_v56 = vadd.f32 %v3326_v51, %v3259_v13 }
0x10e3   : > { %v3328_v28 = vpop.f32.mrf.mxu0 }
0x10e4   : > { %v3329_v19 = vadd.f32 %v3328_v28, %v3259_v13 }
0x10e5   : > { %v3330_v43 = vpop.f32.mrf.mxu0 }
0x10e6   : > { %v3331_v59 = vadd.f32 %v3330_v43, %v3264_v9  ;;  %v3346_v35 = vadd.f32 %v3329_v19, %v6736_v0 }
0x10e7   : > { %v3332_v63 = vpop.f32.mrf.mxu0 }
0x10e8   : > { %v3333_v11 = vadd.f32 %v3332_v63, %v3264_v9  ;;  %v3347_v12 = vadd.f32 %v3331_v59, %v6741_v48 }
0x10e9   : > { %v3336_v37 = vpop.f32.mrf.mxu0 }
0x10ea   : > { %v3337_v58 = vadd.f32 %v3336_v37, %v3269_v61  ;;  %v3348_v24 = vadd.f32 %v3333_v11, %v6723_v22  ;;  %v3355_v0 = vmul.f32 %v3347_v12, %v5887_v33 }
0x10eb   : > { %v3338_v4 = vpop.f32.mrf.mxu0 }
0x10ec   : > { %v3339_v5 = vadd.f32 %v3338_v4, %v3269_v61  ;;  %v3349_v10 = vadd.f32 %v3337_v58, %v6733_v62  ;;  %v3356_v40 = vmul.f32 %v3348_v24, %v5891_v38  ;;  %v3354_v62 = vmul.f32 %v3346_v35, %v5891_v38 }
0x10ed   : > { %v3340_v17 = vpop.f32.mrf.mxu0 }
0x10ee   : > { %v3341_v1 = vadd.f32 %v3340_v17, %v3274_v60  ;;  %v3350_v18 = vadd.f32 %v3339_v5, %v6726_v57  ;;  %v3357_v15 = vmul.f32 %v3349_v10, %v5887_v33  ;;  %v3363_v48 = vpack.c.bf16 %v3356_v40, %v3354_v62 }
0x10ef   : > { %v3342_v23 = vpop.f32.mrf.mxu0 }
0x10f0   : > { %v3351_v25 = vadd.f32 %v3341_v1, %v6720_v20  ;;  %v3343_v42 = vadd.f32 %v3342_v23, %v3274_v60  ;;  %v3358_v22 = vmul.f32 %v3350_v18, %v5891_v38  ;;  %v3345_v20 = vadd.f32 %v3327_v56, %v6748_v6  ;;  %v3361_v6 = vld [vmem:[%s7608_s16] sm:$0xf] }
0x10f2   : > { %v3352_v8 = vadd.f32 %v3343_v42, %v6729_v7  ;;  %v3359_v36 = vmul.f32 %v3351_v25, %v5887_v33  ;;  %v3353_v34 = vmul.f32 %v3345_v20, %v5887_v33 }
0x10f4   : > { %v3360_v57 = vmul.f32 %v3352_v8, %v5891_v38  ;;  %v3364_v7 = vpack.c.bf16 %v3359_v36, %v3357_v15  ;;  %v3362_v46 = vpack.c.bf16 %v3355_v0, %v3353_v34  ;;  %v3487_v0 = vpop.permute.xlu1 %3486 }
0x10f6   : > { %v3365_v32 = vpack.c.bf16 %v3360_v57, %v3358_v22  ;;  %v5372_v22 = vld [vmem:[%s7602_s10 + $0x10] sm:$0xff]   ;;  %v5373_v57 = vld [vmem:[%s7602_s10 + $0x18] sm:$0xff]  }
0x10f8   : > { %3387 = vmatprep.subr.bf16.mxu0 %v3365_v32 }
0x10f9   : > { %3388 = vmatpush1.bf16.msra.mxu0 %v3364_v7 }
0x10fa   : > { %3389 = vmatprep.subr.bf16.mxu0 %v3363_v48  ;;  %v3482_v48 = vpop.permute.xlu0 %3481 }
0x10fd   : > { %3390 = vmatpush1.bf16.msra.mxu0 %v3362_v46 }
0x1100   : > { %5116 = vmatmul.mubr.msk.bf16.vlgmr.msra.gmra.mxu0 %vm782_vm1, %v3361_v6  ;;  %v3477_v6 = vpop.permute.xlu1 %3476 }
0x1101   : > { %3543 = vmatprep.mubr.bf16.mxu0 %v5491_v2 }
0x11c0   : > { %v3409_v26 = vpop.f32.mrf.mxu0 }
0x11c1   : > { %v3410_v49 = vadd.f32 %v3409_v26, %v3370_v14 }
0x11c2   : > { %v3411_v41 = vpop.f32.mrf.mxu0 }
0x11c3   : > { %v3416_v3 = vmul.f32 %v3410_v49, %v5887_v33  ;;  %v3412_v44 = vadd.f32 %v3411_v41, %v3370_v14 }
0x11c4   : > { %v3413_v50 = vpop.f32.mrf.mxu0 }
0x11c5   : > { %5117 = vst [vmem:[%s6335_s28 + $0x10] sm:$0xff] %v3416_v3  ;;  %v3421_v39 = vrot.slane %v3416_v3, 4  ;;  %v3417_v29 = vmul.f32 %v3412_v44, %v5891_v38  ;;  %v3472_v44 = vpop.permute.xlu0 %3471 }
0x11c6   : > { %v3414_v45 = vpop.f32.mrf.mxu0 }
0x11c7   : > { %v3422_v47 = vmax.f32 %v3416_v3, %v3421_v39  ;;  %5118 = vst [vmem:[%s6335_s28 + $0x18] sm:$0xff] %v3417_v29  ;;  %v3427_v52 = vrot.slane %v3417_v29, 4 }
0x11c9   : > { %v3423_v21 = vrot.slane %v3422_v47, 2  ;;  %v3428_v53 = vmax.f32 %v3417_v29, %v3427_v52 }
0x11cb   : > { %v3424_v54 = vmax.f32 %v3422_v47, %v3423_v21  ;;  %v3429_v30 = vrot.slane %v3428_v53, 2 }
0x11cd   : > { %v3425_v55 = vrot.slane %v3424_v54, 1  ;;  %v3430_v16 = vmax.f32 %v3428_v53, %v3429_v30  ;;  %v5375_v30 = vld [vmem:[%s7659_s22 + $0x98] sm:$0xff]  }
0x11cf   : > { %v3426_v31 = vmax.f32 %v3424_v54, %v3425_v55  ;;  %v3431_v51 = vrot.slane %v3430_v16, 1  ;;  %v5374_v54 = vld [vmem:[%s7659_s22 + $0x90] sm:$0xff]   ;;  %v5376_v55 = vld [vmem:[%s7659_s22 + $0xa0] sm:$0xff]  }
0x11d1   : > { %v3433_v28 = vsub.f32 %v3416_v3, %v3426_v31  ;;  %v3432_v60 = vmax.f32 %v3430_v16, %v3431_v51  ;;  %v5377_v16 = vld [vmem:[%s7659_s22 + $0xa8] sm:$0xff]   ;;  %v5378_v31 = vld [vmem:[%s7659_s22 + $0xb0] sm:$0xff]   ;;  %v5379_v51 = vld [vmem:[%s7659_s22 + $0xb8] sm:$0xff]  }
0x11d3   : > { %v3435_v43 = vmul.f32 1.442695, %v3433_v28  ;;  %v3434_v61 = vsub.f32 %v3417_v29, %v3432_v60 }
0x11d5   : > { %5406 = vpow2.f32 %v3435_v43  ;;  %v3437_v63 = vmul.f32 1.442695, %v3434_v61 }
0x11d7   : > { %5408 = vpow2.f32 %v3437_v63 }
0x11e2   : > { %v5407_v37 = vpop.eup %5406 }
0x11e3   : > { %v3439_v9 = vrot.slane %v5407_v37, 4 }
0x11e4   : > { %v5409_v4 = vpop.eup %5408 }
0x11e5   : > { %v3445_v11 = vrot.slane %v5409_v4, 4  ;;  %v3440_v5 = vadd.f32 %v5407_v37, %v3439_v9 }
0x11e7   : > { %v3446_v13 = vadd.f32 %v5409_v4, %v3445_v11  ;;  %v3441_v58 = vrot.slane %v3440_v5, 2 }
0x11e9   : > { %v3447_v17 = vrot.slane %v3446_v13, 2  ;;  %v3442_v19 = vadd.f32 %v3441_v58, %v3440_v5 }
0x11eb   : > { %v3448_v1 = vadd.f32 %v3447_v17, %v3446_v13  ;;  %v3443_v59 = vrot.slane %v3442_v19, 1 }
0x11ed   : > { %v3449_v23 = vrot.slane %v3448_v1, 1  ;;  %v3444_v24 = vadd.f32 %v3443_v59, %v3442_v19 }
0x11ef   : > { %v3450_v18 = vadd.f32 %v3449_v23, %v3448_v1  ;;  %5410 = vrcp.f32 %v3444_v24 }
0x11f1   : > { %5412 = vrcp.f32 %v3450_v18 }
0x11fc   : > { %v5411_v25 = vpop.eup %5410 }
0x11fd   : > { %v3453_v42 = vmul.f32 %v5411_v25, %v5407_v37 }
0x11fe   : > { %v5413_v56 = vpop.eup %5412 }
0x11ff   : > { %v3454_v10 = vmul.f32 %v5413_v56, %v5409_v4  ;;  %v3455_v35 = vmul.f32 %v3453_v42, %v5887_v33 }
0x1201   : > { %v3456_v8 = vmul.f32 %v3454_v10, %v5891_v38  ;;  %v3462_v12 = vpack.c.bf16 %v3455_v35, %v3455_v35 }
0x1203   : > { %v3463_v36 = vpack.c.bf16 %v3456_v8, %v3456_v8  ;;  %v3506_v40 = vsel %vm2111_vm14, %v3462_v12, 0  ;;  %v5166_v8 = vld [vmem:[%s7607_s15 + $0x70] sm:$0xff]  ;;  %v5164_v12 = vld [vmem:[%s7607_s15 + $0x60] sm:$0xff] }
0x1205   : > { %5129 = vmatprep.subr.msk.bf16.mxu0 %vm2111_vm14, %v3463_v36  ;;  %v5167_v36 = vld [vmem:[%s7607_s15 + $0x78] sm:$0xff] }
0x1206   : > { %3526 = vmatpush1.bf16.msra.mxu0 %v3506_v40  ;;  %v5198_v40 = vld [vmem:[%s7605_s13 + $0x90] sm:$0xff] }
0x1209   : > { %5130 = vmatmul.mubr.msk.bf16.vlgmr.msra.gmra.mxu0 %vm2104_vm15, %v5372_v22  ;;  %v5165_v22 = vld [vmem:[%s7607_s15 + $0x68] sm:$0xff] }
0x120a   : > { %3553 = vmatprep.mubr.bf16.mxu0 %v5491_v2 }
0x1211   : > { %5131 = vmatmul.mubr.msk.bf16.gmra.mxu0 %vm2104_vm15, %v5373_v57  ;;  %v5196_v57 = vld [vmem:[%s7605_s13 + $0x80] sm:$0xff] }
0x1212   : > { %3661 = vmatprep.mubr.bf16.mxu0 %v5491_v2 }
0x12c9   : > { %v3545_v20 = vpop.f32.mrf.mxu0 }
0x12ca   : > { %v6994_v21 = vadd.f32 %v3545_v20, %v3472_v44  ;;  %v5199_v20 = vld [vmem:[%s7605_s13 + $0x98] sm:$0xff] }
0x12cb   : > { %v3547_v15 = vpop.f32.mrf.mxu0 }
0x12cc   : > { %v6984_v39 = vadd.f32 %v3547_v15, %v3472_v44  ;;  %v5197_v15 = vld [vmem:[%s7605_s13 + $0x88] sm:$0xff] }
0x12cd   : > { %v3549_v62 = vpop.f32.mrf.mxu0 }
0x12ce   : > { %v6988_v45 = vadd.f32 %v3549_v62, %v3477_v6  ;;  %v3740_v62 = vpop.permute.xlu0 %3739 }
0x12cf   : > { %v3551_v32 = vpop.f32.mrf.mxu0 }
0x12d0   : > { %v6976_v49 = vadd.f32 %v3551_v32, %v3477_v6  ;;  %v3577_v53 = vpack.c.bf16 %v6988_v45, %v6994_v21  ;;  %v3745_v32 = vpop.permute.xlu1 %3744 }
0x12d1   : > { %v3555_v7 = vpop.f32.mrf.mxu0 }
0x12d2   : > { %v6982_v50 = vadd.f32 %v3555_v7, %v3482_v48  ;;  %v3578_v52 = vpack.c.bf16 %v6976_v49, %v6984_v39 }
0x12d3   : > { %v3557_v34 = vpop.f32.mrf.mxu0 }
0x12d4   : > { %v6978_v41 = vadd.f32 %v3557_v34, %v3482_v48  ;;  %v3735_v7 = vpop.permute.xlu1 %3734 }
0x12d5   : > { %v3559_v46 = vpop.f32.mrf.mxu0 }
0x12d6   : > { %v6974_v14 = vadd.f32 %v3559_v46, %v3487_v0 }
0x12d7   : > { %v3561_v26 = vpop.f32.mrf.mxu0 }
0x12d8   : > { %v6980_v3 = vadd.f32 %v3561_v26, %v3487_v0  ;;  %v3579_v47 = vpack.c.bf16 %v6974_v14, %v6982_v50  ;;  %v3730_v0 = vpop.permute.xlu0 %3729 }
0x12da   : > { %v3580_v29 = vpack.c.bf16 %v6980_v3, %v6978_v41 }
0x12dc   : > { %3641 = vmatprep.subr.bf16.mxu0 %v3580_v29 }
0x12dd   : > { %3642 = vmatpush1.bf16.msra.mxu0 %v3579_v47 }
0x12de   : > { %3643 = vmatprep.subr.bf16.mxu0 %v3578_v52 }
0x12e1   : > { %3644 = vmatpush1.bf16.msra.mxu0 %v3577_v53 }
0x12e4   : > { %5150 = vmatmul.mubr.msk.bf16.vlgmr.msra.gmra.mxu0 %vm782_vm1, %v5374_v54 }
0x12e5   : > { %3671 = vmatprep.mubr.bf16.mxu0 %v5491_v2 }
0x12ec   : > { %5151 = vmatmul.mubr.msk.bf16.gmra.mxu0 %vm782_vm1, %v5375_v30 }
0x12ed   : > { %3681 = vmatprep.mubr.bf16.mxu0 %v5491_v2 }
0x12f4   : > { %5152 = vmatmul.mubr.msk.bf16.gmra.mxu0 %vm782_vm1, %v5376_v55 }
0x12f5   : > { %3691 = vmatprep.mubr.bf16.mxu0 %v5491_v2 }
0x12fc   : > { %5153 = vmatmul.mubr.msk.bf16.gmra.mxu0 %vm782_vm1, %v5377_v16 }
0x12fd   : > { %3701 = vmatprep.mubr.bf16.mxu0 %v5491_v2 }
0x1304   : > { %5154 = vmatmul.mubr.msk.bf16.gmra.mxu0 %vm782_vm1, %v5378_v31 }
0x1305   : > { %3711 = vmatprep.mubr.bf16.mxu0 %v5491_v2 }
0x130c   : > { %5155 = vmatmul.mubr.msk.bf16.gmra.mxu0 %vm782_vm1, %v5379_v51 }
0x130d   : > { %4323 = vmatprep.mubr.bf16.mxu0 %v5491_v2 }
0x13a4   : > { %v3663_v28 = vpop.f32.mrf.mxu0 }
0x13a5   : > { %3755 = vrot.lane.b32.xlu0 %v3663_v28, %s7660_s25 }
0x13a6   : > { %v3665_v60 = vpop.f32.mrf.mxu0 }
0x13a8   : > { %v3667_v43 = vpop.f32.mrf.mxu0 }
0x13a9   : > { %3763 = vrot.lane.b32.xlu0 %v3665_v60, %s7660_s25  ;;  %3757 = vrot.lane.b32.xlu1 %v3667_v43, %s7660_s25 }
0x13aa   : > { %v3669_v61 = vpop.f32.mrf.mxu0 }
0x13ac   : > { %v3673_v63 = vpop.f32.mrf.mxu0 }
0x13ad   : > { %3765 = vrot.lane.b32.xlu1 %v3669_v61, %s7660_s25  ;;  %3759 = vrot.lane.b32.xlu0 %v3673_v63, %s7660_s25 }
0x13ae   : > { %v3675_v37 = vpop.f32.mrf.mxu0 }
0x13b0   : > { %v3677_v9 = vpop.f32.mrf.mxu0 }
0x13b1   : > { %3767 = vrot.lane.b32.xlu0 %v3675_v37, %s7660_s25  ;;  %3761 = vrot.lane.b32.xlu1 %v3677_v9, %s7660_s25 }
0x13b2   : > { %v3679_v4 = vpop.f32.mrf.mxu0 }
0x13b4   : > { %v3683_v11 = vpop.f32.mrf.mxu0 }
0x13b5   : > { %3769 = vrot.lane.b32.xlu1 %v3679_v4, %s7660_s25  ;;  %v3747_v16 = vadd.f32 %v3730_v0, %v3683_v11 }
0x13b6   : > { %v3685_v5 = vpop.f32.mrf.mxu0 }
0x13b7   : > { %v3748_v31 = vadd.f32 %v3730_v0, %v3685_v5 }
0x13b8   : > { %v3687_v13 = vpop.f32.mrf.mxu0 }
0x13b9   : > { %v3749_v60 = vadd.f32 %v3735_v7, %v3687_v13 }
0x13ba   : > { %v3689_v58 = vpop.f32.mrf.mxu0 }
0x13bb   : > { %v3750_v43 = vadd.f32 %v3735_v7, %v3689_v58 }
0x13bc   : > { %v3693_v17 = vpop.f32.mrf.mxu0 }
0x13bd   : > { %v3751_v37 = vadd.f32 %v3740_v62, %v3693_v17 }
0x13be   : > { %v3695_v19 = vpop.f32.mrf.mxu0 }
0x13bf   : > { %v3752_v9 = vadd.f32 %v3740_v62, %v3695_v19 }
0x13c0   : > { %v7036_v1 = vpop.f32.mrf.mxu0 }
0x13c2   : > { %v7038_v59 = vpop.f32.mrf.mxu0 }
0x13c4   : > { %v3703_v23 = vpop.f32.mrf.mxu0 }
0x13c5   : > { %3795 = vrot.lane.b32.xlu0 %v3703_v23, %s7661_s0 }
0x13c6   : > { %v3705_v24 = vpop.f32.mrf.mxu0 }
0x13c8   : > { %v3707_v18 = vpop.f32.mrf.mxu0 }
0x13c9   : > { %3797 = vrot.lane.b32.xlu1 %v3707_v18, %s7661_s0 }
0x13ca   : > { %v3709_v25 = vpop.f32.mrf.mxu0 }
0x13cc   : > { %v3713_v42 = vpop.f32.mrf.mxu0 }
0x13cd   : > { %3799 = vrot.lane.b32.xlu0 %v3713_v42, %s7661_s0 }
0x13ce   : > { %v3715_v56 = vpop.f32.mrf.mxu0 }
0x13d0   : > { %v3717_v10 = vpop.f32.mrf.mxu0 }
0x13d1   : > { %3807 = vrot.lane.b32.xlu0 %v3715_v56, %s7661_s0  ;;  %3801 = vrot.lane.b32.xlu1 %v3717_v10, %s7661_s0 }
0x13d2   : > { %v3719_v35 = vpop.f32.mrf.mxu0 }
0x13d5   : > { %3803 = vrot.lane.b32.xlu0 %v3705_v24, %s7661_s0  ;;  %3809 = vrot.lane.b32.xlu1 %v3719_v35, %s7661_s0 }
0x13d9   : > { %3869 = vperm.xlu0 %5315, %v5166_v8   ;;  %3805 = vrot.lane.b32.xlu1 %v3709_v25, %s7661_s0 }
0x13dd   : > { %3859 = vperm.xlu0 %5315, %v5164_v12   ;;  %3874 = vperm.xlu1 %5316, %v5167_v36   ;;  %v3753_v12 = vadd.f32 %v3745_v32, %v7036_v1  ;;  %v3754_v36 = vadd.f32 %v3745_v32, %v7038_v59 }
0x13e1   : > { %4137 = vperm.xlu0 %5315, %v5198_v40   ;;  %3864 = vperm.xlu1 %5316, %v5165_v22  }
0x13e5   : > { %4127 = vperm.xlu0 %5315, %v5196_v57   ;;  %4142 = vperm.xlu1 %5316, %v5199_v20  }
0x13e9   : > { %4132 = vperm.xlu1 %5316, %v5197_v15  }
0x1417   : > { %v3756_v48 = vpop.permute.xlu0 %3755 }
0x141b   : > { %v3758_v34 = vpop.permute.xlu1 %3757  ;;  %v3764_v46 = vpop.permute.xlu0 %3763 }
0x141c   : > { %v3771_v51 = vsel %vm944_vm2, %v3756_v48, %v3764_v46  ;;  %v3775_v28 = vsel %vm944_vm2, %v3764_v46, %v3756_v48 }
0x141d   : > { %v3779_v5 = vsel %vm926_vm3, %v3775_v28, 0.0  ;;  %v3780_v13 = vsel %vm926_vm3, %v3771_v51, 0.0 }
0x141e   : > { %v3787_v40 = vadd.f32 %v3779_v5, %v3747_v16  ;;  %v3788_v22 = vadd.f32 %v3780_v13, %v3748_v31 }
0x141f   : > { %v3766_v6 = vpop.permute.xlu1 %3765  ;;  %v3760_v26 = vpop.permute.xlu0 %3759 }
0x1420   : > { %v3772_v58 = vsel %vm944_vm2, %v3758_v34, %v3766_v6  ;;  %v3776_v23 = vsel %vm944_vm2, %v3766_v6, %v3758_v34 }
0x1421   : > { %v3781_v57 = vsel %vm926_vm3, %v3776_v23, 0.0  ;;  %v3782_v20 = vsel %vm926_vm3, %v3772_v58, 0.0 }
0x1423   : > { %v3762_v44 = vpop.permute.xlu1 %3761  ;;  %v3768_v29 = vpop.permute.xlu0 %3767 }
0x1424   : > { %v3773_v53 = vsel %vm944_vm2, %v3760_v26, %v3768_v29  ;;  %v3777_v54 = vsel %vm944_vm2, %v3768_v29, %v3760_v26  ;;  %v3790_v29 = vadd.f32 %v3782_v20, %v3750_v43 }
0x1425   : > { %v3783_v61 = vsel %vm926_vm3, %v3777_v54, 0.0  ;;  %v3784_v63 = vsel %vm926_vm3, %v3773_v53, 0.0 }
0x1426   : > { %v3791_v24 = vadd.f32 %v3783_v61, %v3751_v37  ;;  %v3792_v18 = vadd.f32 %v3784_v63, %v3752_v9 }
0x1427   : > { %v3770_v47 = vpop.permute.xlu1 %3769 }
0x1428   : > { %v3774_v4 = vsel %vm944_vm2, %v3762_v44, %v3770_v47  ;;  %v3778_v11 = vsel %vm944_vm2, %v3770_v47, %v3762_v44  ;;  %v3789_v44 = vadd.f32 %v3781_v57, %v3749_v60 }
0x1429   : > { %v3785_v56 = vsel %vm926_vm3, %v3778_v11, 0.0  ;;  %v3786_v10 = vsel %vm926_vm3, %v3774_v4, 0.0 }
0x142a   : > { %v3793_v48 = vadd.f32 %v3785_v56, %v3753_v12  ;;  %v3794_v34 = vadd.f32 %v3786_v10, %v3754_v36 }
0x1437   : > { %v3796_v52 = vpop.permute.xlu0 %3795 }
0x143b   : > { %v3798_v30 = vpop.permute.xlu1 %3797 }
0x143f   : > { %v3800_v55 = vpop.permute.xlu0 %3799 }
0x1443   : > { %v3808_v17 = vpop.permute.xlu0 %3807  ;;  %v3802_v19 = vpop.permute.xlu1 %3801 }
0x1444   : > { %v3813_v25 = vsel %vm973_vm4, %v3800_v55, %v3808_v17  ;;  %v3817_v42 = vsel %vm973_vm4, %v3808_v17, %v3800_v55 }
0x1445   : > { %v3823_v35 = vsel %vm973_vm4, %v3813_v25, 0.0  ;;  %v3824_v8 = vsel %vm973_vm4, %v3817_v42, 0.0  ;;  %v5381_v25 = vld [vmem:[%s7606_s14 + $0x38] sm:$0xff]  }
0x1446   : > { %v3831_v15 = vadd.f32 %v3823_v35, %v3791_v24  ;;  %v3832_v62 = vadd.f32 %v3824_v8, %v3792_v18  ;;  %v5380_v18 = vld [vmem:[%s7606_s14 + $0x30] sm:$0xff]  }
0x1447   : > { %v3804_v0 = vpop.permute.xlu0 %3803  ;;  %v3810_v7 = vpop.permute.xlu1 %3809 }
0x1448   : > { %v3811_v46 = vsel %vm973_vm4, %v3796_v52, %v3804_v0  ;;  %v3815_v1 = vsel %vm973_vm4, %v3804_v0, %v3796_v52  ;;  %v3814_v6 = vsel %vm973_vm4, %v3802_v19, %v3810_v7  ;;  %v3818_v26 = vsel %vm973_vm4, %v3810_v7, %v3802_v19 }
0x1449   : > { %v3819_v59 = vsel %vm973_vm4, %v3811_v46, 0.0  ;;  %v3820_v32 = vsel %vm973_vm4, %v3815_v1, 0.0  ;;  %v3825_v47 = vsel %vm973_vm4, %v3814_v6, 0.0  ;;  %v3826_v52 = vsel %vm973_vm4, %v3818_v26, 0.0 }
0x144a   : > { %v3839_v53 = vmax.f32 %v3831_v15, 0.0  ;;  %v3840_v54 = vmax.f32 %v3832_v62, 0.0  ;;  %v3833_v55 = vadd.f32 %v3825_v47, %v3793_v48  ;;  %v3834_v16 = vadd.f32 %v3826_v52, %v3794_v34 }
0x144b   : > { %v3806_v31 = vpop.permute.xlu1 %3805  ;;  %v3827_v51 = vadd.f32 %v3819_v59, %v3787_v40  ;;  %v3828_v28 = vadd.f32 %v3820_v32, %v3788_v22 }
0x144c   : > { %v3812_v61 = vsel %vm973_vm4, %v3798_v30, %v3806_v31  ;;  %v3816_v60 = vsel %vm973_vm4, %v3806_v31, %v3798_v30  ;;  %v3841_v43 = vmax.f32 %v3833_v55, 0.0  ;;  %v3842_v63 = vmax.f32 %v3834_v16, 0.0 }
0x144d   : > { %v3821_v37 = vsel %vm973_vm4, %v3812_v61, 0.0  ;;  %v3822_v9 = vsel %vm973_vm4, %v3816_v60, 0.0  ;;  %v3835_v58 = vmax.f32 %v3827_v51, 0.0  ;;  %v3836_v23 = vmax.f32 %v3828_v28, 0.0  ;;  %v5382_v51 = vld [vmem:[%s7659_s22 + $0xc0] sm:$0xff]   ;;  %v5383_v28 = vld [vmem:[%s7659_s22 + $0xc8] sm:$0xff]  }
0x144e   : > { %v3829_v4 = vadd.f32 %v3821_v37, %v3789_v44  ;;  %v3830_v11 = vadd.f32 %v3822_v9, %v3790_v29  ;;  %v3850_v5 = vpack.c.bf16 %v3841_v43, %v3839_v53  ;;  %v3851_v13 = vpack.c.bf16 %v3842_v63, %v3840_v54  ;;  %v5384_v61 = vld [vmem:[%s7659_s22 + $0xd0] sm:$0xff]   ;;  %v5385_v60 = vld [vmem:[%s7659_s22 + $0xd8] sm:$0xff]   ;;  %v5386_v43 = vld [vmem:[%s7659_s22 + $0xe0] sm:$0xff]  }
0x144f   : > { %v5387_v63 = vld [vmem:[%s7659_s22 + $0xe8] sm:$0xff]  }
0x1450   : > { %v3837_v17 = vmax.f32 %v3829_v4, 0.0  ;;  %v3838_v19 = vmax.f32 %v3830_v11, 0.0  ;;  %3905 = vmatprep.subr.bf16.mxu1 %v3851_v13 }
0x1451   : > { %3906 = vmatpush1.bf16.msra.mxu1 %v3850_v5 }
0x1452   : > { %v3848_v24 = vpack.c.bf16 %v3837_v17, %v3835_v58  ;;  %v3849_v30 = vpack.c.bf16 %v3838_v19, %v3836_v23 }
0x1454   : > { %3907 = vmatprep.subr.bf16.mxu1 %v3849_v30  ;;  %v3870_v8 = vpop.permute.xlu0 %3869 }
0x1455   : > { %3908 = vmatpush1.bf16.msra.mxu1 %v3848_v24 }
0x1458   : > { %5170 = vmatmul.mubr.msk.bf16.vlgmr.msra.gmra.mxu1 %vm782_vm1, %v5380_v18  ;;  %v3875_v10 = vpop.permute.xlu1 %3874  ;;  %v3860_v15 = vpop.permute.xlu0 %3859 }
0x1459   : > { %3935 = vmatprep.mubr.bf16.mxu1 %v5491_v2 }
0x145c   : > { %v3865_v40 = vpop.permute.xlu1 %3864 }
0x1460   : > { %5171 = vmatmul.mubr.msk.bf16.gmra.mxu1 %vm782_vm1, %v5381_v25 }
0x1461   : > { %4059 = vmatprep.mubr.bf16.mxu1 %v5491_v2 }
0x1518   : > { %v3927_v42 = vpop.f32.mrf.mxu1 }
0x1519   : > { %v3928_v26 = vadd.f32 %v3927_v42, %v3860_v15 }
0x151a   : > { %v3929_v56 = vpop.f32.mrf.mxu1 }
0x151b   : > { %v3930_v7 = vadd.f32 %v3929_v56, %v3860_v15  ;;  %v5204_v15 = vld [vmem:[%s7607_s15 + $0x80] sm:$0xff] }
0x151c   : > { %v3931_v35 = vpop.f32.mrf.mxu1 }
0x151d   : > { %v3932_v34 = vadd.f32 %v3931_v35, %v3865_v40  ;;  %v3947_v29 = vadd.f32 %v3930_v7, %v6984_v39  ;;  %v5205_v7 = vld [vmem:[%s7607_s15 + $0x88] sm:$0xff] }
0x151e   : > { %v3933_v12 = vpop.f32.mrf.mxu1 }
0x151f   : > { %v3934_v57 = vadd.f32 %v3933_v12, %v3865_v40  ;;  %v3948_v52 = vadd.f32 %v3932_v34, %v6988_v45  ;;  %v5239_v34 = vld [vmem:[%s7605_s13 + $0xb8] sm:$0xff] }
0x1520   : > { %v3937_v36 = vpop.f32.mrf.mxu1 }
0x1521   : > { %v3938_v62 = vadd.f32 %v3937_v36, %v3870_v8  ;;  %v3949_v1 = vadd.f32 %v3934_v57, %v6976_v49  ;;  %v7177_v45 = vmul.f32 %v3948_v52, %v5887_v33 }
0x1522   : > { %v3939_v22 = vpop.f32.mrf.mxu1 }
0x1523   : > { %v3940_v20 = vadd.f32 %v3939_v22, %v3870_v8  ;;  %v3950_v44 = vadd.f32 %v3938_v62, %v6982_v50  ;;  %v7159_v54 = vmul.f32 %v3949_v1, %v5891_v38  ;;  %v5207_v62 = vld [vmem:[%s7607_s15 + $0x98] sm:$0xff]  ;;  %v4138_v1 = vpop.permute.xlu0 %4137 }
0x1524   : > { %v3941_v0 = vpop.f32.mrf.mxu1 }
0x1525   : > { %v3942_v48 = vadd.f32 %v3941_v0, %v3875_v10  ;;  %v3951_v59 = vadd.f32 %v3940_v20, %v6978_v41  ;;  %v3946_v41 = vadd.f32 %v3928_v26, %v6994_v21  ;;  %v7169_v50 = vmul.f32 %v3950_v44, %v5887_v33  ;;  %v5206_v20 = vld [vmem:[%s7607_s15 + $0x90] sm:$0xff] }
0x1526   : > { %v3943_v46 = vpop.f32.mrf.mxu1  ;;  %v5238_v0 = vld [vmem:[%s7605_s13 + $0xb0] sm:$0xff] }
0x1527   : > { %v3952_v32 = vadd.f32 %v3942_v48, %v6974_v14  ;;  %v3944_v6 = vadd.f32 %v3943_v46, %v3875_v10  ;;  %v7162_v49 = vmul.f32 %v3951_v59, %v5891_v38  ;;  %v7184_v21 = vmul.f32 %v3946_v41, %v5887_v33  ;;  %v5236_v48 = vld [vmem:[%s7605_s13 + $0xa0] sm:$0xff]  ;;  %v5237_v46 = vld [vmem:[%s7605_s13 + $0xa8] sm:$0xff]  ;;  %v4143_v59 = vpop.permute.xlu1 %4142 }
0x1529   : > { %v3953_v47 = vadd.f32 %v3944_v6, %v6980_v3  ;;  %v7156_v53 = vmul.f32 %v3952_v32, %v5887_v33  ;;  %v7172_v3 = vmul.f32 %v3947_v29, %v5891_v38  ;;  %v3975_v31 = vpack.c.bf16 %v7177_v45, %v7184_v21  ;;  %v4128_v32 = vpop.permute.xlu0 %4127 }
0x152b   : > { %v7165_v14 = vmul.f32 %v3953_v47, %v5891_v38  ;;  %v3977_v55 = vpack.c.bf16 %v7156_v53, %v7169_v50  ;;  %v3976_v16 = vpack.c.bf16 %v7159_v54, %v7172_v3  ;;  %v4133_v6 = vpop.permute.xlu1 %4132 }
0x152d   : > { %v3978_v39 = vpack.c.bf16 %v7165_v14, %v7162_v49 }
0x152f   : > { %4039 = vmatprep.subr.bf16.mxu1 %v3978_v39 }
0x1530   : > { %4040 = vmatpush1.bf16.msra.mxu1 %v3977_v55 }
0x1531   : > { %4041 = vmatprep.subr.bf16.mxu1 %v3976_v16 }
0x1534   : > { %4042 = vmatpush1.bf16.msra.mxu1 %v3975_v31 }
0x1537   : > { %5190 = vmatmul.mubr.msk.bf16.vlgmr.msra.gmra.mxu1 %vm782_vm1, %v5382_v51 }
0x1538   : > { %4069 = vmatprep.mubr.bf16.mxu1 %v5491_v2 }
0x153f   : > { %5191 = vmatmul.mubr.msk.bf16.gmra.mxu1 %vm782_vm1, %v5383_v28 }
0x1540   : > { %4079 = vmatprep.mubr.bf16.mxu1 %v5491_v2 }
0x1547   : > { %5192 = vmatmul.mubr.msk.bf16.gmra.mxu1 %vm782_vm1, %v5384_v61 }
0x1548   : > { %4089 = vmatprep.mubr.bf16.mxu1 %v5491_v2 }
0x154f   : > { %5193 = vmatmul.mubr.msk.bf16.gmra.mxu1 %vm782_vm1, %v5385_v60 }
0x1550   : > { %4099 = vmatprep.mubr.bf16.mxu1 %v5491_v2 }
0x1557   : > { %5194 = vmatmul.mubr.msk.bf16.gmra.mxu1 %vm782_vm1, %v5386_v43 }
0x1558   : > { %4109 = vmatprep.mubr.bf16.mxu1 %v5491_v2 }
0x155f   : > { %5195 = vmatmul.mubr.msk.bf16.gmra.mxu1 %vm782_vm1, %v5387_v63 }
0x1560   : > { %4721 = vmatprep.mubr.bf16.mxu1 %v5491_v2 }
0x15f7   : > { %v4061_v37 = vpop.f32.mrf.mxu1 }
0x15f8   : > { %4153 = vrot.lane.b32.xlu0 %v4061_v37, %s7662_s24 }
0x15f9   : > { %v4063_v9 = vpop.f32.mrf.mxu1 }
0x15fb   : > { %v4065_v4 = vpop.f32.mrf.mxu1 }
0x15fc   : > { %4161 = vrot.lane.b32.xlu0 %v4063_v9, %s7662_s24  ;;  %4155 = vrot.lane.b32.xlu1 %v4065_v4, %s7662_s24 }
0x15fd   : > { %v4067_v11 = vpop.f32.mrf.mxu1 }
0x15ff   : > { %v4071_v5 = vpop.f32.mrf.mxu1 }
0x1600   : > { %4163 = vrot.lane.b32.xlu1 %v4067_v11, %s7662_s24  ;;  %4157 = vrot.lane.b32.xlu0 %v4071_v5, %s7662_s24 }
0x1601   : > { %v4073_v13 = vpop.f32.mrf.mxu1 }
0x1603   : > { %v4075_v58 = vpop.f32.mrf.mxu1 }
0x1604   : > { %4165 = vrot.lane.b32.xlu0 %v4073_v13, %s7662_s24  ;;  %4159 = vrot.lane.b32.xlu1 %v4075_v58, %s7662_s24 }
0x1605   : > { %v4077_v23 = vpop.f32.mrf.mxu1 }
0x1607   : > { %v4081_v17 = vpop.f32.mrf.mxu1 }
0x1608   : > { %4167 = vrot.lane.b32.xlu1 %v4077_v23, %s7662_s24  ;;  %v4145_v60 = vadd.f32 %v4128_v32, %v4081_v17 }
0x1609   : > { %v4083_v19 = vpop.f32.mrf.mxu1 }
0x160a   : > { %v4146_v43 = vadd.f32 %v4128_v32, %v4083_v19 }
0x160b   : > { %v4085_v24 = vpop.f32.mrf.mxu1 }
0x160c   : > { %v4147_v9 = vadd.f32 %v4133_v6, %v4085_v24 }
0x160d   : > { %v4087_v30 = vpop.f32.mrf.mxu1 }
0x160e   : > { %v4148_v4 = vadd.f32 %v4133_v6, %v4087_v30 }
0x160f   : > { %v4091_v18 = vpop.f32.mrf.mxu1 }
0x1610   : > { %v4149_v13 = vadd.f32 %v4138_v1, %v4091_v18 }
0x1611   : > { %v4093_v25 = vpop.f32.mrf.mxu1 }
0x1612   : > { %v4150_v58 = vadd.f32 %v4138_v1, %v4093_v25 }
0x1613   : > { %v7226_v42 = vpop.f32.mrf.mxu1 }
0x1615   : > { %v7228_v56 = vpop.f32.mrf.mxu1 }
0x1617   : > { %v4101_v10 = vpop.f32.mrf.mxu1 }
0x1618   : > { %4193 = vrot.lane.b32.xlu0 %v4101_v10, %s7663_s2 }
0x1619   : > { %v4103_v35 = vpop.f32.mrf.mxu1 }
0x161b   : > { %v4105_v8 = vpop.f32.mrf.mxu1 }
0x161c   : > { %4195 = vrot.lane.b32.xlu1 %v4105_v8, %s7663_s2 }
0x161d   : > { %v4107_v12 = vpop.f32.mrf.mxu1 }
0x161f   : > { %v4111_v36 = vpop.f32.mrf.mxu1 }
0x1620   : > { %4197 = vrot.lane.b32.xlu0 %v4111_v36, %s7663_s2 }
0x1621   : > { %v4113_v40 = vpop.f32.mrf.mxu1 }
0x1623   : > { %v4115_v22 = vpop.f32.mrf.mxu1 }
0x1624   : > { %4205 = vrot.lane.b32.xlu0 %v4113_v40, %s7663_s2  ;;  %4199 = vrot.lane.b32.xlu1 %v4115_v22, %s7663_s2 }
0x1625   : > { %v4117_v57 = vpop.f32.mrf.mxu1 }
0x1628   : > { %4201 = vrot.lane.b32.xlu0 %v4103_v35, %s7663_s2  ;;  %4207 = vrot.lane.b32.xlu1 %v4117_v57, %s7663_s2 }
0x162c   : > { %4267 = vperm.xlu0 %5315, %v5206_v20   ;;  %4203 = vrot.lane.b32.xlu1 %v4107_v12, %s7663_s2  ;;  %s5430_s2 = sshll.u32 %s5499_s6, 4  ;;  %s5431_s2 = int_to_ptr.vmem [resolvable:$false] %s5430_s2 }
0x162d   : > { %s5432_s7 = scalar_lea.vmem %s5431_s2, 1536 }
0x1630   : > { %4257 = vperm.xlu0 %5315, %v5204_v15   ;;  %4272 = vperm.xlu1 %5316, %v5207_v62   ;;  %v4151_v15 = vadd.f32 %v4143_v59, %v7226_v42  ;;  %v4152_v62 = vadd.f32 %v4143_v59, %v7228_v56 }
0x1634   : > { %4535 = vperm.xlu0 %5315, %v5238_v0   ;;  %4262 = vperm.xlu1 %5316, %v5205_v7  }
0x1638   : > { %4525 = vperm.xlu0 %5315, %v5236_v48   ;;  %4540 = vperm.xlu1 %5316, %v5239_v34  }
0x163c   : > { %4530 = vperm.xlu1 %5316, %v5237_v46  }
0x166a   : > { %v4154_v26 = vpop.permute.xlu0 %4153 }
0x166e   : > { %v4156_v44 = vpop.permute.xlu1 %4155  ;;  %v4162_v29 = vpop.permute.xlu0 %4161 }
0x166f   : > { %v4169_v63 = vsel %vm1354_vm8, %v4154_v26, %v4162_v29  ;;  %v4173_v37 = vsel %vm1354_vm8, %v4162_v29, %v4154_v26 }
0x1670   : > { %v4177_v19 = vsel %vm1336_vm10, %v4173_v37, 0.0  ;;  %v4178_v24 = vsel %vm1336_vm10, %v4169_v63, 0.0 }
0x1671   : > { %v4185_v0 = vadd.f32 %v4177_v19, %v4145_v60  ;;  %v4186_v7 = vadd.f32 %v4178_v24, %v4146_v43 }
0x1672   : > { %v4164_v47 = vpop.permute.xlu1 %4163  ;;  %v4158_v52 = vpop.permute.xlu0 %4157 }
0x1673   : > { %v4170_v30 = vsel %vm1354_vm8, %v4156_v44, %v4164_v47  ;;  %v4174_v10 = vsel %vm1354_vm8, %v4164_v47, %v4156_v44 }
0x1674   : > { %v4179_v48 = vsel %vm1336_vm10, %v4174_v10, 0.0  ;;  %v4180_v34 = vsel %vm1336_vm10, %v4170_v30, 0.0 }
0x1676   : > { %v4160_v41 = vpop.permute.xlu1 %4159  ;;  %v4166_v39 = vpop.permute.xlu0 %4165 }
0x1677   : > { %v4171_v31 = vsel %vm1354_vm8, %v4158_v52, %v4166_v39  ;;  %v4175_v51 = vsel %vm1354_vm8, %v4166_v39, %v4158_v52  ;;  %v4188_v39 = vadd.f32 %v4180_v34, %v4148_v4 }
0x1678   : > { %v4181_v11 = vsel %vm1336_vm10, %v4175_v51, 0.0  ;;  %v4182_v5 = vsel %vm1336_vm10, %v4171_v31, 0.0 }
0x1679   : > { %v4189_v35 = vadd.f32 %v4181_v11, %v4149_v13  ;;  %v4190_v8 = vadd.f32 %v4182_v5, %v4150_v58 }
0x167a   : > { %v4168_v55 = vpop.permute.xlu1 %4167 }
0x167b   : > { %v4172_v23 = vsel %vm1354_vm8, %v4160_v41, %v4168_v55  ;;  %v4176_v17 = vsel %vm1354_vm8, %v4168_v55, %v4160_v41  ;;  %v4187_v41 = vadd.f32 %v4179_v48, %v4147_v9 }
0x167c   : > { %v4183_v40 = vsel %vm1336_vm10, %v4176_v17, 0.0  ;;  %v4184_v22 = vsel %vm1336_vm10, %v4172_v23, 0.0 }
0x167d   : > { %v4191_v26 = vadd.f32 %v4183_v40, %v4151_v15  ;;  %v4192_v44 = vadd.f32 %v4184_v22, %v4152_v62 }
0x168a   : > { %v4194_v16 = vpop.permute.xlu0 %4193 }
0x168e   : > { %v4196_v28 = vpop.permute.xlu1 %4195 }
0x1692   : > { %v4198_v61 = vpop.permute.xlu0 %4197 }
0x1696   : > { %v4206_v18 = vpop.permute.xlu0 %4205  ;;  %v4200_v25 = vpop.permute.xlu1 %4199 }
0x1697   : > { %v4211_v12 = vsel %vm1383_vm9, %v4198_v61, %v4206_v18  ;;  %v4215_v36 = vsel %vm1383_vm9, %v4206_v18, %v4198_v61 }
0x1698   : > { %v4221_v57 = vsel %vm1383_vm9, %v4211_v12, 0.0  ;;  %v4222_v20 = vsel %vm1383_vm9, %v4215_v36, 0.0  ;;  %v5389_v12 = vld [vmem:[%s7606_s14 + $0x48] sm:$0xff]  }
0x1699   : > { %v4229_v46 = vadd.f32 %v4221_v57, %v4189_v35  ;;  %v4230_v1 = vadd.f32 %v4222_v20, %v4190_v8  ;;  %v5388_v8 = vld [vmem:[%s7606_s14 + $0x40] sm:$0xff]  }
0x169a   : > { %v4202_v32 = vpop.permute.xlu0 %4201  ;;  %v4208_v6 = vpop.permute.xlu1 %4207 }
0x169b   : > { %v4209_v29 = vsel %vm1383_vm9, %v4194_v16, %v4202_v32  ;;  %v4213_v42 = vsel %vm1383_vm9, %v4202_v32, %v4194_v16  ;;  %v4212_v47 = vsel %vm1383_vm9, %v4200_v25, %v4208_v6  ;;  %v4216_v52 = vsel %vm1383_vm9, %v4208_v6, %v4200_v25 }
0x169c   : > { %v4217_v56 = vsel %vm1383_vm9, %v4209_v29, 0.0  ;;  %v4218_v59 = vsel %vm1383_vm9, %v4213_v42, 0.0  ;;  %v4223_v55 = vsel %vm1383_vm9, %v4212_v47, 0.0  ;;  %v4224_v16 = vsel %vm1383_vm9, %v4216_v52, 0.0 }
0x169d   : > { %v4237_v31 = vmax.f32 %v4229_v46, 0.0  ;;  %v4238_v51 = vmax.f32 %v4230_v1, 0.0  ;;  %v4231_v61 = vadd.f32 %v4223_v55, %v4191_v26  ;;  %v4232_v60 = vadd.f32 %v4224_v16, %v4192_v44 }
0x169e   : > { %v4204_v43 = vpop.permute.xlu1 %4203  ;;  %v4225_v63 = vadd.f32 %v4217_v56, %v4185_v0  ;;  %v4226_v37 = vadd.f32 %v4218_v59, %v4186_v7 }
0x169f   : > { %v4210_v11 = vsel %vm1383_vm9, %v4196_v28, %v4204_v43  ;;  %v4214_v9 = vsel %vm1383_vm9, %v4204_v43, %v4196_v28  ;;  %v4239_v4 = vmax.f32 %v4231_v61, 0.0  ;;  %v4240_v5 = vmax.f32 %v4232_v60, 0.0 }
0x16a0   : > { %v4219_v13 = vsel %vm1383_vm9, %v4210_v11, 0.0  ;;  %v4220_v58 = vsel %vm1383_vm9, %v4214_v9, 0.0  ;;  %v4233_v30 = vmax.f32 %v4225_v63, 0.0  ;;  %v4234_v10 = vmax.f32 %v4226_v37, 0.0  ;;  %v5390_v63 = vld [vmem:[%s7659_s22 + $0xf0] sm:$0xff]   ;;  %v5391_v37 = vld [vmem:[%s7659_s22 + $0xf8] sm:$0xff]  }
0x16a1   : > { %v4227_v23 = vadd.f32 %v4219_v13, %v4187_v41  ;;  %v4228_v17 = vadd.f32 %v4220_v58, %v4188_v39  ;;  %v4248_v19 = vpack.c.bf16 %v4239_v4, %v4237_v31  ;;  %v4249_v24 = vpack.c.bf16 %v4240_v5, %v4238_v51  ;;  %v5392_v11 = vld [vmem:[%s7659_s22 + $0x100] sm:$0xff]   ;;  %v5393_v9 = vld [vmem:[%s7659_s22 + $0x108] sm:$0xff]   ;;  %v5394_v4 = vld [vmem:[%s7659_s22 + $0x110] sm:$0xff]  }
0x16a2   : > { %v5395_v5 = vld [vmem:[%s7659_s22 + $0x118] sm:$0xff]  }
0x16a3   : > { %v4235_v18 = vmax.f32 %v4227_v23, 0.0  ;;  %v4236_v25 = vmax.f32 %v4228_v17, 0.0  ;;  %4303 = vmatprep.subr.bf16.mxu0 %v4249_v24 }
0x16a4   : > { %4304 = vmatpush1.bf16.msra.mxu0 %v4248_v19 }
0x16a5   : > { %v4246_v35 = vpack.c.bf16 %v4235_v18, %v4233_v30  ;;  %v4247_v28 = vpack.c.bf16 %v4236_v25, %v4234_v10 }
0x16a7   : > { %4305 = vmatprep.subr.bf16.mxu0 %v4247_v28  ;;  %v4268_v20 = vpop.permute.xlu0 %4267 }
0x16a8   : > { %4306 = vmatpush1.bf16.msra.mxu0 %v4246_v35 }
0x16ab   : > { %5210 = vmatmul.mubr.msk.bf16.vlgmr.msra.gmra.mxu0 %vm782_vm1, %v5388_v8  ;;  %v4273_v22 = vpop.permute.xlu1 %4272  ;;  %v4258_v46 = vpop.permute.xlu0 %4257 }
0x16ac   : > { %4333 = vmatprep.mubr.bf16.mxu0 %v5491_v2 }
0x16af   : > { %v4263_v0 = vpop.permute.xlu1 %4262 }
0x16b3   : > { %5211 = vmatmul.mubr.msk.bf16.gmra.mxu0 %vm782_vm1, %v5389_v12 }
0x16b4   : > { %4457 = vmatprep.mubr.bf16.mxu0 %v5491_v2 }
0x176b   : > { %v4325_v36 = vpop.f32.mrf.mxu0 }
0x176c   : > { %v4326_v52 = vadd.f32 %v4325_v36, %v4258_v46 }
0x176d   : > { %v4327_v40 = vpop.f32.mrf.mxu0 }
0x176e   : > { %v4328_v6 = vadd.f32 %v4327_v40, %v4258_v46  ;;  %v5244_v46 = vld [vmem:[%s7607_s15 + $0xa0] sm:$0xff] }
0x176f   : > { %v4329_v57 = vpop.f32.mrf.mxu0 }
0x1770   : > { %v4330_v44 = vadd.f32 %v4329_v57, %v4263_v0  ;;  %v4345_v39 = vadd.f32 %v4328_v6, %v7172_v3  ;;  %v5245_v6 = vld [vmem:[%s7607_s15 + $0xa8] sm:$0xff] }
0x1771   : > { %v4331_v15 = vpop.f32.mrf.mxu0 }
0x1772   : > { %v4332_v48 = vadd.f32 %v4331_v15, %v4263_v0  ;;  %v4346_v16 = vadd.f32 %v4330_v44, %v7177_v45  ;;  %v4541_v44 = vpop.permute.xlu1 %4540 }
0x1773   : > { %v4335_v62 = vpop.f32.mrf.mxu0 }
0x1774   : > { %v4336_v1 = vadd.f32 %v4335_v62, %v4268_v20  ;;  %v4347_v42 = vadd.f32 %v4332_v48, %v7159_v54  ;;  %v7367_v45 = vmul.f32 %v4346_v16, %v5887_v33 }
0x1775   : > { %v4337_v7 = vpop.f32.mrf.mxu0 }
0x1776   : > { %v4338_v34 = vadd.f32 %v4337_v7, %v4268_v20  ;;  %v4348_v41 = vadd.f32 %v4336_v1, %v7169_v50  ;;  %v7349_v51 = vmul.f32 %v4347_v42, %v5891_v38  ;;  %v5247_v1 = vld [vmem:[%s7607_s15 + $0xb8] sm:$0xff]  ;;  %v4531_v42 = vpop.permute.xlu1 %4530 }
0x1777   : > { %v4339_v32 = vpop.f32.mrf.mxu0 }
0x1778   : > { %v4340_v26 = vadd.f32 %v4339_v32, %v4273_v22  ;;  %v4349_v56 = vadd.f32 %v4338_v34, %v7162_v49  ;;  %v4344_v49 = vadd.f32 %v4326_v52, %v7184_v21  ;;  %v7359_v50 = vmul.f32 %v4348_v41, %v5887_v33  ;;  %v5246_v34 = vld [vmem:[%s7607_s15 + $0xb0] sm:$0xff]  ;;  %v5253_v32 = vld [vmem:[%s7609_s17 + $0x8] sm:$0xff] }
0x1779   : > { %v4341_v29 = vpop.f32.mrf.mxu0 }
0x177a   : > { %v4350_v59 = vadd.f32 %v4340_v26, %v7156_v53  ;;  %v4342_v47 = vadd.f32 %v4341_v29, %v4273_v22  ;;  %v7352_v54 = vmul.f32 %v4349_v56, %v5891_v38  ;;  %v7374_v21 = vmul.f32 %v4344_v49, %v5887_v33  ;;  %v4536_v26 = vpop.permute.xlu0 %4535 }
0x177c   : > { %v4351_v55 = vadd.f32 %v4342_v47, %v7165_v14  ;;  %v7346_v31 = vmul.f32 %v4350_v59, %v5887_v33  ;;  %v7362_v14 = vmul.f32 %v4345_v39, %v5891_v38  ;;  %v4373_v43 = vpack.c.bf16 %v7367_v45, %v7374_v21 }
0x177e   : > { %v7355_v53 = vmul.f32 %v4351_v55, %v5891_v38  ;;  %v4375_v61 = vpack.c.bf16 %v7346_v31, %v7359_v50  ;;  %v4374_v60 = vpack.c.bf16 %v7349_v51, %v7362_v14  ;;  %v4526_v29 = vpop.permute.xlu0 %4525 }
0x1780   : > { %v4376_v3 = vpack.c.bf16 %v7355_v53, %v7352_v54 }
0x1782   : > { %4437 = vmatprep.subr.bf16.mxu0 %v4376_v3 }
0x1783   : > { %4438 = vmatpush1.bf16.msra.mxu0 %v4375_v61 }
0x1784   : > { %4439 = vmatprep.subr.bf16.mxu0 %v4374_v60 }
0x1787   : > { %4440 = vmatpush1.bf16.msra.mxu0 %v4373_v43 }
0x178a   : > { %5230 = vmatmul.mubr.msk.bf16.vlgmr.msra.gmra.mxu0 %vm782_vm1, %v5390_v63 }
0x178b   : > { %4467 = vmatprep.mubr.bf16.mxu0 %v5491_v2 }
0x1792   : > { %5231 = vmatmul.mubr.msk.bf16.gmra.mxu0 %vm782_vm1, %v5391_v37 }
0x1793   : > { %4477 = vmatprep.mubr.bf16.mxu0 %v5491_v2 }
0x179a   : > { %5232 = vmatmul.mubr.msk.bf16.gmra.mxu0 %vm782_vm1, %v5392_v11 }
0x179b   : > { %4487 = vmatprep.mubr.bf16.mxu0 %v5491_v2 }
0x17a2   : > { %5233 = vmatmul.mubr.msk.bf16.gmra.mxu0 %vm782_vm1, %v5393_v9 }
0x17a3   : > { %4497 = vmatprep.mubr.bf16.mxu0 %v5491_v2 }
0x17aa   : > { %5234 = vmatmul.mubr.msk.bf16.gmra.mxu0 %vm782_vm1, %v5394_v4 }
0x17ab   : > { %4507 = vmatprep.mubr.bf16.mxu0 %v5491_v2 }
0x17b2   : > { %5235 = vmatmul.mubr.msk.bf16.gmra.mxu0 %vm782_vm1, %v5395_v5 }
0x184a   : > { %v4459_v13 = vpop.f32.mrf.mxu0 }
0x184b   : > { %4551 = vrot.lane.b32.xlu0 %v4459_v13, %s7664_s3 }
0x184c   : > { %v4461_v58 = vpop.f32.mrf.mxu0 }
0x184e   : > { %v4463_v23 = vpop.f32.mrf.mxu0 }
0x184f   : > { %4559 = vrot.lane.b32.xlu0 %v4461_v58, %s7664_s3  ;;  %4553 = vrot.lane.b32.xlu1 %v4463_v23, %s7664_s3 }
0x1850   : > { %v4465_v17 = vpop.f32.mrf.mxu0 }
0x1852   : > { %v4469_v19 = vpop.f32.mrf.mxu0 }
0x1853   : > { %4561 = vrot.lane.b32.xlu1 %v4465_v17, %s7664_s3  ;;  %4555 = vrot.lane.b32.xlu0 %v4469_v19, %s7664_s3 }
0x1854   : > { %v4471_v24 = vpop.f32.mrf.mxu0 }
0x1856   : > { %v4473_v30 = vpop.f32.mrf.mxu0 }
0x1857   : > { %4563 = vrot.lane.b32.xlu0 %v4471_v24, %s7664_s3  ;;  %4557 = vrot.lane.b32.xlu1 %v4473_v30, %s7664_s3 }
0x1858   : > { %v4475_v10 = vpop.f32.mrf.mxu0 }
0x185a   : > { %v4479_v18 = vpop.f32.mrf.mxu0 }
0x185b   : > { %4565 = vrot.lane.b32.xlu1 %v4475_v10, %s7664_s3  ;;  %v4543_v63 = vadd.f32 %v4526_v29, %v4479_v18  ;;  %s4834_s3 = sshll.u32 %s6335_s28, 4  ;;  %s7540_s3 = int_to_ptr.vmem [resolvable:$true] %s4834_s3 }
0x185c   : > { %v4481_v25 = vpop.f32.mrf.mxu0  ;;  %s5426_s29 = scalar_lea.vmem %s7540_s3, 768  ;;  %p5433_p7 = scmp.lt.s32.totalorder %s7540_s3, %s5431_s2 }
0x185d   : > { %v4544_v37 = vadd.f32 %v4526_v29, %v4481_v25  ;;  %p5427_p4 = scmp.ne.s32.totalorder %s7540_s3, %s5426_s29  ;;  %p5434_p8 = scmp.lt.s32.totalorder %s5432_s7, %s5426_s29 }
0x185e   : > { %v4483_v35 = vpop.f32.mrf.mxu0 }
0x185f   : > { %v4545_v4 = vadd.f32 %v4531_v42, %v4483_v35  ;;  %p5428_p5 = pnand %p5427_p4, %p5640_p11  ;;  %p5435_p9 = por %p5434_p8, %p5433_p7 }
0x1860   : > { %v4485_v28 = vpop.f32.mrf.mxu0 }
0x1861   : > { %v4546_v5 = vadd.f32 %v4531_v42, %v4485_v28  ;;  %p5429_p6 = pneg %p5428_p5 }
0x1862   : > { %v4489_v8 = vpop.f32.mrf.mxu0 }
0x1863   : > { %v4547_v23 = vadd.f32 %v4536_v26, %v4489_v8  ;;  %p5436_p10 = pnand %p5435_p9, %p5429_p6 }
0x1864   : > { %v4491_v12 = vpop.f32.mrf.mxu0 }
0x1865   : > { %v4548_v17 = vadd.f32 %v4536_v26, %v4491_v12 }
0x1866   : > { %v7415_v36 = vpop.f32.mrf.mxu0 }
0x1868   : > { %v7417_v40 = vpop.f32.mrf.mxu0 }
0x186a   : > { %v4499_v22 = vpop.f32.mrf.mxu0 }
0x186b   : > { %4591 = vrot.lane.b32.xlu0 %v4499_v22, %s7665_s4 }
0x186c   : > { %v4501_v57 = vpop.f32.mrf.mxu0 }
0x186e   : > { %v4503_v20 = vpop.f32.mrf.mxu0 }
0x186f   : > { %4593 = vrot.lane.b32.xlu1 %v4503_v20, %s7665_s4 }
0x1870   : > { %v4505_v15 = vpop.f32.mrf.mxu0 }
0x1872   : > { %v4509_v62 = vpop.f32.mrf.mxu0 }
0x1873   : > { %4595 = vrot.lane.b32.xlu0 %v4509_v62, %s7665_s4 }
0x1874   : > { %v4511_v0 = vpop.f32.mrf.mxu0 }
0x1876   : > { %v4513_v7 = vpop.f32.mrf.mxu0 }
0x1877   : > { %4603 = vrot.lane.b32.xlu0 %v4511_v0, %s7665_s4  ;;  %4597 = vrot.lane.b32.xlu1 %v4513_v7, %s7665_s4  ;;  %v4549_v7 = vadd.f32 %v4541_v44, %v7415_v36 }
0x1878   : > { %v4515_v48 = vpop.f32.mrf.mxu0 }
0x187b   : > { %4599 = vrot.lane.b32.xlu0 %v4501_v57, %s7665_s4  ;;  %4605 = vrot.lane.b32.xlu1 %v4515_v48, %s7665_s4  ;;  %v4550_v48 = vadd.f32 %v4541_v44, %v7417_v40 }
0x187f   : > { %4665 = vperm.xlu0 %5315, %v5246_v34   ;;  %4601 = vrot.lane.b32.xlu1 %v4505_v15, %s7665_s4 }
0x1883   : > { %4655 = vperm.xlu0 %5315, %v5244_v46   ;;  %4670 = vperm.xlu1 %5316, %v5247_v1  }
0x1887   : > { %4768 = vperm.xlu0 %5315, %v5253_v32   ;;  %4660 = vperm.xlu1 %5316, %v5245_v6  }
0x18bd   : > { %v4552_v56 = vpop.permute.xlu0 %4551 }
0x18c1   : > { %v4554_v59 = vpop.permute.xlu1 %4553  ;;  %v4560_v47 = vpop.permute.xlu0 %4559 }
0x18c2   : > { %v4567_v11 = vsel %vm1766_vm11, %v4552_v56, %v4560_v47  ;;  %v4571_v9 = vsel %vm1766_vm11, %v4560_v47, %v4552_v56 }
0x18c3   : > { %v4575_v30 = vsel %vm1748_vm13, %v4571_v9, 0.0  ;;  %v4576_v10 = vsel %vm1748_vm13, %v4567_v11, 0.0 }
0x18c4   : > { %v4583_v34 = vadd.f32 %v4575_v30, %v4543_v63  ;;  %v4584_v46 = vadd.f32 %v4576_v10, %v4544_v37 }
0x18c5   : > { %v4562_v52 = vpop.permute.xlu1 %4561  ;;  %v4556_v41 = vpop.permute.xlu0 %4555 }
0x18c6   : > { %v4568_v18 = vsel %vm1766_vm11, %v4554_v59, %v4562_v52  ;;  %v4572_v25 = vsel %vm1766_vm11, %v4562_v52, %v4554_v59 }
0x18c7   : > { %v4577_v1 = vsel %vm1748_vm13, %v4572_v25, 0.0  ;;  %v4578_v32 = vsel %vm1748_vm13, %v4568_v18, 0.0 }
0x18c9   : > { %v4558_v39 = vpop.permute.xlu1 %4557  ;;  %v4564_v55 = vpop.permute.xlu0 %4563 }
0x18ca   : > { %v4569_v3 = vsel %vm1766_vm11, %v4556_v41, %v4564_v55  ;;  %v4573_v61 = vsel %vm1766_vm11, %v4564_v55, %v4556_v41  ;;  %v4586_v55 = vadd.f32 %v4578_v32, %v4546_v5 }
0x18cb   : > { %v4579_v13 = vsel %vm1748_vm13, %v4573_v61, 0.0  ;;  %v4580_v58 = vsel %vm1748_vm13, %v4569_v3, 0.0 }
0x18cc   : > { %v4587_v8 = vadd.f32 %v4579_v13, %v4547_v23  ;;  %v4588_v12 = vadd.f32 %v4580_v58, %v4548_v17 }
0x18cd   : > { %v4566_v16 = vpop.permute.xlu1 %4565 }
0x18ce   : > { %v4570_v19 = vsel %vm1766_vm11, %v4558_v39, %v4566_v16  ;;  %v4574_v24 = vsel %vm1766_vm11, %v4566_v16, %v4558_v39  ;;  %v4585_v39 = vadd.f32 %v4577_v1, %v4545_v4 }
0x18cf   : > { %v4581_v20 = vsel %vm1748_vm13, %v4574_v24, 0.0  ;;  %v4582_v15 = vsel %vm1748_vm13, %v4570_v19, 0.0 }
0x18d0   : > { %v4589_v56 = vadd.f32 %v4581_v20, %v4549_v7  ;;  %v4590_v59 = vadd.f32 %v4582_v15, %v4550_v48 }
0x18dd   : > { %v4592_v49 = vpop.permute.xlu0 %4591 }
0x18e1   : > { %v4594_v60 = vpop.permute.xlu1 %4593 }
0x18e5   : > { %v4596_v43 = vpop.permute.xlu0 %4595 }
0x18e9   : > { %v4604_v35 = vpop.permute.xlu0 %4603  ;;  %v4598_v28 = vpop.permute.xlu1 %4597 }
0x18ea   : > { %v4609_v22 = vsel %vm1795_vm12, %v4596_v43, %v4604_v35  ;;  %v4613_v57 = vsel %vm1795_vm12, %v4604_v35, %v4596_v43 }
0x18eb   : > { %v4619_v62 = vsel %vm1795_vm12, %v4609_v22, 0.0  ;;  %v4620_v0 = vsel %vm1795_vm12, %v4613_v57, 0.0 }
0x18ec   : > { %v4627_v6 = vadd.f32 %v4619_v62, %v4587_v8  ;;  %v4628_v26 = vadd.f32 %v4620_v0, %v4588_v12  ;;  %v5396_v12 = vld [vmem:[%s7606_s14 + $0x50] sm:$0xff]  }
0x18ed   : > { %v4600_v29 = vpop.permute.xlu0 %4599  ;;  %v4606_v42 = vpop.permute.xlu1 %4605 }
0x18ee   : > { %v4607_v47 = vsel %vm1795_vm12, %v4592_v49, %v4600_v29  ;;  %v4611_v36 = vsel %vm1795_vm12, %v4600_v29, %v4592_v49  ;;  %v4610_v52 = vsel %vm1795_vm12, %v4598_v28, %v4606_v42  ;;  %v4614_v41 = vsel %vm1795_vm12, %v4606_v42, %v4598_v28 }
0x18ef   : > { %v4615_v40 = vsel %vm1795_vm12, %v4607_v47, 0.0  ;;  %v4616_v44 = vsel %vm1795_vm12, %v4611_v36, 0.0  ;;  %v4621_v16 = vsel %vm1795_vm12, %v4610_v52, 0.0  ;;  %v4622_v49 = vsel %vm1795_vm12, %v4614_v41, 0.0 }
0x18f0   : > { %v4635_v3 = vmax.f32 %v4627_v6, 0.0  ;;  %v4636_v61 = vmax.f32 %v4628_v26, 0.0  ;;  %v4629_v43 = vadd.f32 %v4621_v16, %v4589_v56  ;;  %v4630_v63 = vadd.f32 %v4622_v49, %v4590_v59 }
0x18f1   : > { %v4602_v37 = vpop.permute.xlu1 %4601  ;;  %v4623_v11 = vadd.f32 %v4615_v40, %v4583_v34  ;;  %v4624_v9 = vadd.f32 %v4616_v44, %v4584_v46 }
0x18f2   : > { %v4608_v13 = vsel %vm1795_vm12, %v4594_v60, %v4602_v37  ;;  %v4612_v4 = vsel %vm1795_vm12, %v4602_v37, %v4594_v60  ;;  %v4637_v5 = vmax.f32 %v4629_v43, 0.0  ;;  %v4638_v58 = vmax.f32 %v4630_v63, 0.0 }
0x18f3   : > { %v4617_v23 = vsel %vm1795_vm12, %v4608_v13, 0.0  ;;  %v4618_v17 = vsel %vm1795_vm12, %v4612_v4, 0.0  ;;  %v4631_v18 = vmax.f32 %v4623_v11, 0.0  ;;  %v4632_v25 = vmax.f32 %v4624_v9, 0.0 }
0x18f4   : > { %v4625_v19 = vadd.f32 %v4617_v23, %v4585_v39  ;;  %v4626_v24 = vadd.f32 %v4618_v17, %v4586_v55  ;;  %v4646_v30 = vpack.c.bf16 %v4637_v5, %v4635_v3  ;;  %v4647_v10 = vpack.c.bf16 %v4638_v58, %v4636_v61 }
0x18f6   : > { %v4633_v35 = vmax.f32 %v4625_v19, 0.0  ;;  %v4634_v28 = vmax.f32 %v4626_v24, 0.0  ;;  %4701 = vmatprep.subr.bf16.mxu1 %v4647_v10 }
0x18f7   : > { %4702 = vmatpush1.bf16.msra.mxu1 %v4646_v30 }
0x18f8   : > { %v4644_v8 = vpack.c.bf16 %v4633_v35, %v4631_v18  ;;  %v4645_v60 = vpack.c.bf16 %v4634_v28, %v4632_v25 }
0x18fa   : > { %4703 = vmatprep.subr.bf16.mxu1 %v4645_v60  ;;  %v4666_v62 = vpop.permute.xlu0 %4665 }
0x18fb   : > { %4704 = vmatpush1.bf16.msra.mxu1 %v4644_v8 }
0x18fe   : > { %5250 = vmatmul.mubr.msk.bf16.vlgmr.msra.gmra.mxu1 %vm782_vm1, %v5396_v12  ;;  %v4671_v20 = vpop.permute.xlu1 %4670  ;;  %v4656_v32 = vpop.permute.xlu0 %4655 }
0x18ff   : > { %4731 = vmatprep.mubr.bf16.mxu1 %v5491_v2 }
0x1902   : > { %v4661_v48 = vpop.permute.xlu1 %4660  ;;  %v4769_v37 = vpop.permute.xlu0 %4768 }
0x1906   : > { %5251 = vmatmul.mubr.msk.bf16.gmra.mxu1 %vm782_vm1, %v5397_v27 }
0x1907   : > { %4806 = vmatprep.mubr.bf16.mxu1 %v5491_v2 }
0x19be   : > { %v4723_v22 = vpop.f32.mrf.mxu1 }
0x19bf   : > { %v4724_v44 = vadd.f32 %v4723_v22, %v4656_v32 }
0x19c0   : > { %v4725_v57 = vpop.f32.mrf.mxu1 }
0x19c1   : > { %v4726_v29 = vadd.f32 %v4725_v57, %v4656_v32 }
0x19c2   : > { %v4727_v15 = vpop.f32.mrf.mxu1 }
0x19c3   : > { %v4728_v56 = vadd.f32 %v4727_v15, %v4661_v48  ;;  %v4743_v41 = vadd.f32 %v4726_v29, %v7362_v14 }
0x19c4   : > { %v4729_v0 = vpop.f32.mrf.mxu1 }
0x19c5   : > { %v4730_v46 = vadd.f32 %v4729_v0, %v4661_v48  ;;  %v4744_v55 = vadd.f32 %v4728_v56, %v7367_v45 }
0x19c6   : > { %v4733_v7 = vpop.f32.mrf.mxu1 }
0x19c7   : > { %v4734_v6 = vadd.f32 %v4733_v7, %v4666_v62  ;;  %v4745_v2 = vadd.f32 %v4730_v46, %v7349_v51 }
0x19c8   : > { %v4735_v34 = vpop.f32.mrf.mxu1 }
0x19c9   : > { %v4736_v1 = vadd.f32 %v4735_v34, %v4666_v62  ;;  %v4746_v52 = vadd.f32 %v4734_v6, %v7359_v50  ;;  %v4753_v49 = vmul.f32 %v4745_v2, %v5891_v38  ;;  %v4751_v50 = vmul.f32 %v4743_v41, %v5891_v38 }
0x19ca   : > { %v4737_v26 = vpop.f32.mrf.mxu1 }
0x19cb   : > { %v4738_v42 = vadd.f32 %v4737_v26, %v4671_v20  ;;  %v4747_v47 = vadd.f32 %v4736_v1, %v7352_v54  ;;  %v4754_v3 = vmul.f32 %v4746_v52, %v5887_v33  ;;  %v4761_v61 = vpack.c.bf16 %v4753_v49, %v4751_v50 }
0x19cc   : > { %v4739_v59 = vpop.f32.mrf.mxu1 }
0x19cd   : > { %v4748_v36 = vadd.f32 %v4738_v42, %v7346_v31  ;;  %v4740_v40 = vadd.f32 %v4739_v59, %v4671_v20  ;;  %v4755_v51 = vmul.f32 %v4747_v47, %v5891_v38  ;;  %v4742_v31 = vadd.f32 %v4724_v44, %v7374_v21  ;;  %v5252_v21 = vld [vmem:[%s7608_s16 + $0x4] sm:$0xf] }
0x19cf   : > { %v4749_v39 = vadd.f32 %v4740_v40, %v7355_v53  ;;  %v4756_v16 = vmul.f32 %v4748_v36, %v5887_v33  ;;  %v4752_v53 = vmul.f32 %v4744_v55, %v5887_v33  ;;  %v4750_v43 = vmul.f32 %v4742_v31, %v5887_v33 }
0x19d1   : > { %v4757_v54 = vmul.f32 %v4749_v39, %v5891_v38  ;;  %v4762_v45 = vpack.c.bf16 %v4756_v16, %v4754_v3  ;;  %v4760_v63 = vpack.c.bf16 %v4752_v53, %v4750_v43 }
0x19d3   : > { %v4763_v14 = vpack.c.bf16 %v4757_v54, %v4755_v51 }
0x19d5   : > { %4786 = vmatprep.subr.bf16.mxu1 %v4763_v14 }
0x19d6   : > { %4787 = vmatpush1.bf16.msra.mxu1 %v4762_v45 }
0x19d7   : > { %4788 = vmatprep.subr.bf16.mxu1 %v4761_v61 }
0x19da   : > { %4789 = vmatpush1.bf16.msra.mxu1 %v4760_v63 }
0x19dd   : > { %5254 = vmatmul.mubr.msk.bf16.vlgmr.msra.gmra.mxu1 %vm782_vm1, %v5252_v21 }
0x1a9d   : > { %v4808_v11 = vpop.f32.mrf.mxu1 }
0x1a9e   : > { %v4809_v9 = vadd.f32 %v4808_v11, %v4769_v37 }
0x1a9f   : > { %v4810_v13 = vpop.f32.mrf.mxu1 }
0x1aa0   : > { %v4815_v4 = vmul.f32 %v4809_v9, %v5887_v33  ;;  %v4811_v5 = vadd.f32 %v4810_v13, %v4769_v37 }
0x1aa1   : > { %v4812_v58 = vpop.f32.mrf.mxu1 }
0x1aa2   : > { %5255 = vst [vmem:[%s6335_s28 + $0x20] sm:$0xff] %v4815_v4  ;;  %v4816_v23 = vmul.f32 %v4811_v5, %v5891_v38 }
0x1aa3   : > { %v4813_v17 = vpop.f32.mrf.mxu1 }
0x1aa4   : > { %5256 = vst [vmem:[%s6335_s28 + $0x28] sm:$0xff] %v4816_v23 }
0x1aa5   : > { %5439 = shalt.err (!%p5436_p10)
}
0x1aa6   : > { %s5440_s28 = scalar_lea.hbm %s7546_s5, 768  ;;  %s5444_s30 = scalar_lea.hbm %s7610_s18, 1536 }
0x1aa7   : > { %p5441_p12 = scmp.ne.s32.totalorder %s7546_s5, %s5440_s28  ;;  %p5445_p3 = scmp.lt.s32.totalorder %s7546_s5, %s7610_s18 }
0x1aa8   : > { %p5446_p4 = scmp.lt.s32.totalorder %s5444_s30, %s5440_s28 }
0x1aa9   : > { %p5442_p1 = pnand %p5441_p12, %p5640_p11 }
0x1aaa   : > { %p5447_p5 = por %p5446_p4, %p5445_p3 }
0x1aab   : > { %p5443_p2 = pneg %p5442_p1 }
0x1aad   : > { %p5448_p6 = pnand %p5447_p5, %p5443_p2 }
0x1aaf   : > { %5451 = shalt.err (!%p5448_p6)
}
0x1ab0   : > { %s5500_s21 = smov 256   ;;  %s5501_s0 = smov 512  }
0x1ab1   : > { %s5502_s23 = smov 16  }
0x1ab2   : > { %5264 = dma.vmem_to_hbm [thread:$0]  (%p5640_p11), %s7540_s3, 768, %s7546_s5, %s4821_s12, %s5500_s21, %s5501_s0, %s5502_s23  }
0x1ab3 PF: > { %s4849_s9 = sand.u32 1, %s5476_s19   ;;  %p5267_p7 = pnand %p4904_p0, %p5644_p13 }
0x1ab4   : > { %s4850_s29 = scalar_lea.sflag [#allocation6], %s4849_s9 }
0x1ab5   : > { %p5268_p8 = pneg %p5267_p7 }
0x1ab7   : > { %5471 = dma.done.wait (%p5268_p8), %s4850_s29, 768  }
0x1ab8   : > { %5473 = vsyncadd (%p5268_p8), %s4850_s29, 4294966528  ;;  %s7667_s21 = sld [smem:[#allocation12_spill]] }
0x1ab9   : > { %s7668_s19 = sld [smem:[#allocation9_spill]] }
0x1aba   : > { %s7669_s1 = sld [smem:[#allocation10_spill]] }
0x1abb   : > { %s7670_s20 = sld [smem:[#allocation13_spill]] }
0x1abe   : > { %p34_p9 = scmp.ge.s32.totalorder %s7667_s21, 4  }
0x1ac0   :  { %36 = sbr.rel (!%p34_p9) target bundleno = 35 (0x23), region = 200 }
0x1ac5   :  { %4855 = vsyncpa [#allocation6], 1 }
0x1ac6   :  { %4857 = vsyncpa [#allocation6 + $0x1], 1 }

</bundles_post_ra>
